<compile_context>
chip_gen: v7x
topology: tpu7x:2x2x1
jax: 0.10.0
libtpu: 0.0.40
codegen_flags: <defaults>
</compile_context>

<pallas_src>
import numpy as np
import jax
import jax.numpy as jnp
from jax.experimental import pallas as pl
from jax.experimental.pallas import tpu as pltpu

# ---------------- problem sizes (small, consistent with the module) -----------
F_IND, F_ORG, F_EXT, F_TXN_EDGE = 4, 6, 5, 3
N_IND, N_ORG, N_EXT = 12, 9, 6
E_PER_REL = 8

DIMS = {"ind": F_IND, "org": F_ORG, "ext": F_EXT}
N_NODES = {"ind": N_IND, "org": N_ORG, "ext": N_EXT}
TYPES = ("ind", "org", "ext")
TYPE_IDX = {t: i for i, t in enumerate(TYPES)}

REL_FULL = [
    ("ind", "txn", "ind"), ("org", "txn", "ind"), ("ext", "txn", "ind"),
    ("ind", "txn", "org"), ("org", "txn", "org"), ("ext", "txn", "org"),
    ("ind", "txn", "ext"), ("org", "txn", "ext"),
    ("ind", "role", "org"),
    ("ind", "rev_txn", "ind"), ("org", "rev_txn", "ind"), ("ext", "rev_txn", "ind"),
    ("ind", "rev_txn", "org"), ("org", "rev_txn", "org"), ("ext", "rev_txn", "org"),
    ("ind", "rev_txn", "ext"), ("org", "rev_txn", "ext"),
    ("org", "rev_role", "ind"),
]
# conv4 has no relations targeting 'ext' and maps every dst to 1 channel.
REL_CONV4 = [r for r in REL_FULL if r[2] != "ext"]

R_REAL = len(REL_FULL)                 # 18 real relations
R_TOT = R_REAL + len(TYPES)            # + 3 root "self-loop" pseudo relations = 21

# ---------------- padded packing constants -------------------------------------
NP_ = 16                               # padded node count per type (>= 12, mult of 8)
FP = 8                                 # padded feature width (>= 6)
DEP = 8                                # padded (edge-attr + bias) width per relation
TH = FP * FP                           # 64: theta width, f_src-major with stride FP
NT = len(TYPES) * NP_                  # 48: node-slab rows (ind | org | ext)
ET = R_REAL * E_PER_REL + len(TYPES) * NP_   # 192: packed edge rows (incl. self loops)
DK = R_TOT * DEP                       # 168: block-diagonal edge-attr width


def edge_dim(rel_name):
    return 1 if rel_name in ("role", "rev_role") else F_TXN_EDGE


# ---------------- fused Pallas kernel -------------------------------------------
def fused_forward_kernel(x_ref, gat_ref, sct_ref, ea_ref,
                         wnn_ref, broot_ref, rep_ref, fold_ref, mask_ref, o_ref):
    """Whole 4-layer forward for one graph; everything VMEM resident.

    x_ref    : [1, NT, FP]   padded node features (ind | org | ext row blocks)
    gat_ref  : [1, ET, NT]   one-hot source gather (incl. root self-loop block)
    sct_ref  : [1, NT, ET]   one-hot destination scatter
    ea_ref   : [1, ET, DK]   block-diagonal edge attrs (+1 bias col per relation)
    wnn_ref  : [4, DK, TH]   block-diag edge-MLP weights (bias + root folded in)
    broot_ref: [4, NT, FP]   root bias per dst type, pre-summed over relations
    rep_ref  : [FP, TH]      constant: rep[s, s*FP+o]  = 1   (replicate features)
    fold_ref : [TH, FP]      constant: fold[s*FP+o, o] = 1   (sum over s chunks)
    mask_ref : [NT, FP]      1 on real (node row, feature col), 0 on padding
    o_ref    : [1, NT, FP]   sigmoid(conv4) slab (only ind/org column 0 is used)
    """
    x = x_ref[0]                        # [NT, FP]
    gat = gat_ref[0]                    # [ET, NT]
    sct = sct_ref[0]                    # [NT, ET]
    ea = ea_ref[0]                      # [ET, DK]
    rep = rep_ref[...]                  # [FP, TH]
    fold = fold_ref[...]                # [TH, FP]
    mask = mask_ref[...]                # [NT, FP]

    for layer in range(4):              # static -> fully unrolled
        # 18 (+3 root) edge-MLPs as ONE matmul.
        theta = jnp.dot(ea, wnn_ref[layer],
                        preferred_element_type=jnp.float32)           # [ET, TH]
        # All source gathers as ONE matmul; features pre-replicated FP times along
        # lanes so theta[e, s*FP+o] lines up with x_src[e, s].
        x_rep = jnp.dot(x, rep, preferred_element_type=jnp.float32)   # [NT, TH]
        xg_rep = jnp.dot(gat, x_rep,
                         preferred_element_type=jnp.float32)          # [ET, TH]
        # Per-edge bilinear message: full-vreg multiply + fold matmul (sums s chunks).
        msg = jnp.dot(xg_rep * theta, fold,
                      preferred_element_type=jnp.float32)             # [ET, FP]
        # All scatter-adds (and the root linear via the self-loop pseudo relations)
        # as ONE matmul; the per-relation sum becomes the MXU K-reduction.
        agg = jnp.dot(sct, msg, preferred_element_type=jnp.float32)   # [NT, FP]
        pre = agg + broot_ref[layer]                                   # [NT, FP]
        # sigmoid = exp (EUP) + approximate reciprocal (EUP); no VPU divide.
        act = pl.reciprocal(1.0 + jnp.exp(-pre), approx=True)
        # Zero padded rows/cols so padding can never leak into later layers.
        x = act * mask

    o_ref[0] = x


def _batched_spec(*dims):
    nd = len(dims)
    return pl.BlockSpec((1,) + tuple(dims), lambda b, nd=nd: (b,) + (0,) * nd)


def _shared_spec(*dims):
    nd = len(dims)
    return pl.BlockSpec(tuple(dims), lambda b, nd=nd: (0,) * nd)


def fused_forward_pallas(x_all, gat, sct, ea, wnn, broot, rep, fold, mask):
    """Batched fused forward: grid=(B,), one graph per grid step."""
    B = x_all.shape[0]
    return pl.pallas_call(
        fused_forward_kernel,
        out_shape=jax.ShapeDtypeStruct((B, NT, FP), jnp.float32),
        grid=(B,),
        in_specs=[
            _batched_spec(NT, FP),      # x slab
            _batched_spec(ET, NT),      # gather
            _batched_spec(NT, ET),      # scatter
            _batched_spec(ET, DK),      # block-diag edge attrs
            _shared_spec(4, DK, TH),    # edge-MLP weights (constant across grid)
            _shared_spec(4, NT, FP),    # root biases
            _shared_spec(FP, TH),       # rep
            _shared_spec(TH, FP),       # fold
            _shared_spec(NT, FP),       # pad mask
        ],
        out_specs=_batched_spec(NT, FP),
        compiler_params=pltpu.CompilerParams(
            dimension_semantics=("parallel",)),   # 2 TCs on v7x; pipelined loop elsewhere
    )(x_all, gat, sct, ea, wnn, broot, rep, fold, mask)


# ---------------- host-side packing (done ONCE, outside the jitted path) --------
def pack_params(params):
    """Pack per-relation params into block-diagonal slabs.

    Invariant relied on by the kernel: any relation absent from a layer (conv4 drops
    every dst='ext' relation) simply leaves zero rows in wnn[layer] / zero entries in
    broot[layer], so the fused matmuls are exact with no special-casing.
    """
    wnn = np.zeros((4, DK, TH), np.float32)
    broot = np.zeros((4, NT, FP), np.float32)
    for layer in range(4):
        rels = REL_FULL if layer < 3 else REL_CONV4
        wroot_sum = {t: np.zeros((DIMS[t], FP), np.float32) for t in TYPES}
        broot_sum = {t: np.zeros((FP,), np.float32) for t in TYPES}
        for r_idx, rel in enumerate(REL_FULL):
            if rel not in rels:
                continue
            src_t, rel_name, dst_t = rel
            p = params[layer][rel]
            f_src = DIMS[src_t]
            f_out = DIMS[dst_t] if layer < 3 else 1
            d_e = edge_dim(rel_name)
            w = np.asarray(p["w_nn"], np.float32)             # [d_e, f_src*f_out]
            b = np.asarray(p["b_nn"], np.float32).reshape(-1)  # [f_src*f_out]
            base = r_idx * DEP
            for s in range(f_src):
                wnn[layer, base:base + d_e, s * FP:s * FP + f_out] = \
                    w[:, s * f_out:(s + 1) * f_out]
                wnn[layer, base + d_e, s * FP:s * FP + f_out] = \
                    b[s * f_out:(s + 1) * f_out]              # bias row (ea col == 1)
            # HeteroConv(aggr='sum'): sum_r (x @ W_r + b_r) == x @ sum_r W_r + sum_r b_r
            wroot_sum[dst_t][:, :f_out] += np.asarray(p["w_root"], np.float32)
            broot_sum[dst_t][:f_out] += np.asarray(p["bias"], np.float32).reshape(-1)
        # Root linear folded in as one "self-loop pseudo relation" per dst type:
        # its single edge-attr column is a constant 1, so theta == flattened wroot.
        for ti, t in enumerate(TYPES):
            base = (R_REAL + ti) * DEP
            for s in range(DIMS[t]):
                wnn[layer, base, s * FP:s * FP + FP] = wroot_sum[t][s]
            broot[layer, ti * NP_:(ti + 1) * NP_, :] = broot_sum[t][None, :]
    return jnp.asarray(wnn), jnp.asarray(broot)


def pack_graph(x_dict, edges):
    """Pad node features; build fused one-hot gather/scatter and block-diag edge attrs."""
    x_all = np.zeros((NT, FP), np.float32)
    for ti, t in enumerate(TYPES):
        xt = np.asarray(x_dict[t], np.float32)
        x_all[ti * NP_:ti * NP_ + xt.shape[0], :xt.shape[1]] = xt
    gat = np.zeros((ET, NT), np.float32)
    sct = np.zeros((NT, ET), np.float32)
    ea = np.zeros((ET, DK), np.float32)
    for r_idx, rel in enumerate(REL_FULL):
        src_t, rel_name, dst_t = rel
        src_idx, dst_idx, eattr = edges[rel]
        src_idx = np.asarray(src_idx)
        dst_idx = np.asarray(dst_idx)
        eattr = np.asarray(eattr, np.float32)
        d_e = edge_dim(rel_name)
        erow = r_idx * E_PER_REL
        ecol = r_idx * DEP
        for e in range(E_PER_REL):
            gat[erow + e, TYPE_IDX[src_t] * NP_ + int(src_idx[e])] = 1.0
            sct[TYPE_IDX[dst_t] * NP_ + int(dst_idx[e]), erow + e] = 1.0
        ea[erow:erow + E_PER_REL, ecol:ecol + d_e] = eattr
        ea[erow:erow + E_PER_REL, ecol + d_e] = 1.0                 # bias column
    # Root self-loop pseudo relations: identity gather/scatter per node type.
    for ti, t in enumerate(TYPES):
        erow = R_REAL * E_PER_REL + ti * NP_
        ecol = (R_REAL + ti) * DEP
        for n in range(NP_):
            gat[erow + n, ti * NP_ + n] = 1.0
            sct[ti * NP_ + n, erow + n] = 1.0
        ea[erow:erow + NP_, ecol] = 1.0
    return x_all, gat, sct, ea


def make_constants():
    rep = np.zeros((FP, TH), np.float32)
    fold = np.zeros((TH, FP), np.float32)
    for s in range(FP):
        for o in range(FP):
            rep[s, s * FP + o] = 1.0
            fold[s * FP + o, o] = 1.0
    mask = np.zeros((NT, FP), np.float32)
    for ti, t in enumerate(TYPES):
        mask[ti * NP_:ti * NP_ + N_NODES[t], :DIMS[t]] = 1.0
    return jnp.asarray(rep), jnp.asarray(fold), jnp.asarray(mask)


# ---------------- deterministic parameter / data construction -------------------
def init_params(key):
    params = []
    for layer in range(4):
        rels = REL_FULL if layer < 3 else REL_CONV4
        layer_p = {}
        for rel in rels:
            src_t, rel_name, dst_t = rel
            f_src = DIMS[src_t]
            f_dst_in = DIMS[dst_t]
            f_out = DIMS[dst_t] if layer < 3 else 1
            d_e = edge_dim(rel_name)
            key, k1, k2, k3, k4 = jax.random.split(key, 5)
            layer_p[rel] = dict(
                w_nn=0.2 * jax.random.normal(k1, (d_e, f_src * f_out), jnp.float32),
                b_nn=0.1 * jax.random.normal(k2, (1, f_src * f_out), jnp.float32),
                w_root=0.2 * jax.random.normal(k3, (f_dst_in, f_out), jnp.float32),
                bias=0.1 * jax.random.normal(k4, (1, f_out), jnp.float32),
            )
        params.append(layer_p)
    return params


def make_graph(key):
    key, ki, ko, ke = jax.random.split(key, 4)
    x_dict = {
        "ind": jax.random.normal(ki, (N_IND, F_IND), jnp.float32),
        "org": jax.random.normal(ko, (N_ORG, F_ORG), jnp.float32),
        "ext": jax.random.normal(ke, (N_EXT, F_EXT), jnp.float32),
    }
    edges = {}
    for rel in REL_FULL:
        src_t, rel_name, dst_t = rel
        key, ks, kd, ka = jax.random.split(key, 4)
        src_idx = jax.random.randint(ks, (E_PER_REL,), 0, N_NODES[src_t], jnp.int32)
        dst_idx = jax.random.randint(kd, (E_PER_REL,), 0, N_NODES[dst_t], jnp.int32)
        ea = jax.random.normal(ka, (E_PER_REL, edge_dim(rel_name)), jnp.float32)
        edges[rel] = (src_idx, dst_idx, ea)
    return x_dict, edges


# ---------------- pure-NumPy reference (original per-relation semantics) --------
def reference_forward(params, x_dict, edges):
    x = {t: np.asarray(x_dict[t], np.float64) for t in TYPES}
    for layer in range(4):
        rels = REL_FULL if layer < 3 else REL_CONV4
        acc = {}
        for rel in rels:
            src_t, rel_name, dst_t = rel
            p = params[layer][rel]
            f_src = DIMS[src_t]
            f_out = DIMS[dst_t] if layer < 3 else 1
            src_idx, dst_idx, eattr = edges[rel]
            src_idx = np.asarray(src_idx)
            dst_idx = np.asarray(dst_idx)
            eattr = np.asarray(eattr, np.float64)
            theta = (eattr @ np.asarray(p["w_nn"], np.float64)
                     + np.asarray(p["b_nn"], np.float64).reshape(-1))
            theta = theta.reshape(-1, f_src, f_out)
            msg = np.einsum("es,eso->eo", x[src_t][src_idx], theta)
            contrib = np.zeros((N_NODES[dst_t], f_out))
            np.add.at(contrib, dst_idx, msg)
            contrib = contrib + x[dst_t] @ np.asarray(p["w_root"], np.float64) \
                              + np.asarray(p["bias"], np.float64).reshape(-1)
            acc[dst_t] = acc.get(dst_t, 0.0) + contrib
        for t in acc:
            x[t] = 1.0 / (1.0 + np.exp(-acc[t]))
    return x["ind"][:, 0], x["org"][:, 0]


if __name__ == "__main__":
    root_key = jax.random.PRNGKey(0)
    k_params, k_data = jax.random.split(root_key)
    params = init_params(k_params)
    wnn, broot = pack_params(params)
    rep, fold, mask = make_constants()

    B = 2                                       # batch of graphs -> 'parallel' grid axis
    graphs = [make_graph(k) for k in jax.random.split(k_data, B)]

    # Graph packing is hoisted out of the jitted per-call path (static topology).
    packed = [pack_graph(xd, ed) for xd, ed in graphs]
    x_all = jnp.asarray(np.stack([p[0] for p in packed]))
    gat = jnp.asarray(np.stack([p[1] for p in packed]))
    sct = jnp.asarray(np.stack([p[2] for p in packed]))
    ea = jnp.asarray(np.stack([p[3] for p in packed]))

    fwd = jax.jit(fused_forward_pallas)
    out = fwd(x_all, gat, sct, ea, wnn, broot, rep, fold, mask)
    jax.block_until_ready(out)

    pred_ind = out[:, :N_IND, 0]
    pred_org = out[:, NP_:NP_ + N_ORG, 0]

    assert pred_ind.shape == (B, N_IND) and pred_org.shape == (B, N_ORG)
    assert bool(jnp.all(jnp.isfinite(pred_ind))) and bool(jnp.all(jnp.isfinite(pred_org)))

    # Sanity-check against the straightforward per-relation reference. Tolerance is
    # loose on purpose: it covers MXU bf16-pass f32 matmuls + the approximate
    # EUP reciprocal in the in-kernel sigmoid, while still catching wiring bugs.
    max_err = 0.0
    for b, (xd, ed) in enumerate(graphs):
        ref_ind, ref_org = reference_forward(params, xd, ed)
        max_err = max(
            max_err,
            float(np.max(np.abs(np.asarray(pred_ind[b]) - ref_ind))),
            float(np.max(np.abs(np.asarray(pred_org[b]) - ref_org))),
        )
    assert max_err < 1e-1, f"mismatch vs reference: {max_err}"

    print("KERNEL_OK")
</pallas_src>

<mosaic_0001>
module attributes {stable_mosaic.version = 11 : i64} {
  func.func @fused_forward_kernel(%arg0: i32, %arg1: memref<1x48x8xf32, #tpu.memory_space<vmem>>, %arg2: memref<1x192x48xf32, #tpu.memory_space<vmem>>, %arg3: memref<1x48x192xf32, #tpu.memory_space<vmem>>, %arg4: memref<1x192x168xf32, #tpu.memory_space<vmem>>, %arg5: memref<4x168x64xf32, #tpu.memory_space<vmem>>, %arg6: memref<4x48x8xf32, #tpu.memory_space<vmem>>, %arg7: memref<8x64xf32, #tpu.memory_space<vmem>>, %arg8: memref<64x8xf32, #tpu.memory_space<vmem>>, %arg9: memref<48x8xf32, #tpu.memory_space<vmem>>, %arg10: memref<1x48x8xf32, #tpu.memory_space<vmem>>) attributes {dimension_semantics = [#tpu.dimension_semantics<parallel>], iteration_bounds = array<i64: 2>, scalar_prefetch = 0 : i64, scratch_operands = 0 : i64, tpu.core_type = #tpu.core_type<tc>, window_params = [{transform_indices = @transform_0, window_bounds = array<i64: 1, 48, 8>}, {transform_indices = @transform_1, window_bounds = array<i64: 1, 192, 48>}, {transform_indices = @transform_2, window_bounds = array<i64: 1, 48, 192>}, {transform_indices = @transform_3, window_bounds = array<i64: 1, 192, 168>}, {pipeline_mode = #tpu.pipeline_mode<synchronous>, transform_indices = @transform_4, window_bounds = array<i64: 4, 168, 64>}, {pipeline_mode = #tpu.pipeline_mode<synchronous>, transform_indices = @transform_5, window_bounds = array<i64: 4, 48, 8>}, {pipeline_mode = #tpu.pipeline_mode<synchronous>, transform_indices = @transform_6, window_bounds = array<i64: 8, 64>}, {pipeline_mode = #tpu.pipeline_mode<synchronous>, transform_indices = @transform_7, window_bounds = array<i64: 64, 8>}, {pipeline_mode = #tpu.pipeline_mode<synchronous>, transform_indices = @transform_8, window_bounds = array<i64: 48, 8>}, {transform_indices = @transform_9, window_bounds = array<i64: 1, 48, 8>}]} {
    %c0 = arith.constant 0 : index
    %c0_0 = arith.constant 0 : index
    %c0_1 = arith.constant 0 : index
    %0 = vector.load %arg1[%c0, %c0_0, %c0_1] : memref<1x48x8xf32, #tpu.memory_space<vmem>>, vector<1x48x8xf32>
    %1 = vector.shape_cast %0 : vector<1x48x8xf32> to vector<48x8xf32>
    %c0_2 = arith.constant 0 : index
    %c0_3 = arith.constant 0 : index
    %c0_4 = arith.constant 0 : index
    %2 = vector.load %arg2[%c0_2, %c0_3, %c0_4] : memref<1x192x48xf32, #tpu.memory_space<vmem>>, vector<1x192x48xf32>
    %3 = vector.shape_cast %2 : vector<1x192x48xf32> to vector<192x48xf32>
    %c0_5 = arith.constant 0 : index
    %c0_6 = arith.constant 0 : index
    %c0_7 = arith.constant 0 : index
    %4 = vector.load %arg3[%c0_5, %c0_6, %c0_7] : memref<1x48x192xf32, #tpu.memory_space<vmem>>, vector<1x48x192xf32>
    %5 = vector.shape_cast %4 : vector<1x48x192xf32> to vector<48x192xf32>
    %c0_8 = arith.constant 0 : index
    %c0_9 = arith.constant 0 : index
    %c0_10 = arith.constant 0 : index
    %6 = vector.load %arg4[%c0_8, %c0_9, %c0_10] : memref<1x192x168xf32, #tpu.memory_space<vmem>>, vector<1x192x168xf32>
    %7 = vector.shape_cast %6 : vector<1x192x168xf32> to vector<192x168xf32>
    %c0_11 = arith.constant 0 : index
    %c0_12 = arith.constant 0 : index
    %8 = vector.load %arg7[%c0_11, %c0_12] : memref<8x64xf32, #tpu.memory_space<vmem>>, vector<8x64xf32>
    %c0_13 = arith.constant 0 : index
    %c0_14 = arith.constant 0 : index
    %9 = vector.load %arg8[%c0_13, %c0_14] : memref<64x8xf32, #tpu.memory_space<vmem>>, vector<64x8xf32>
    %c0_15 = arith.constant 0 : index
    %c0_16 = arith.constant 0 : index
    %10 = vector.load %arg9[%c0_15, %c0_16] : memref<48x8xf32, #tpu.memory_space<vmem>>, vector<48x8xf32>
    %c0_17 = arith.constant 0 : index
    %c0_18 = arith.constant 0 : index
    %c0_19 = arith.constant 0 : index
    %11 = vector.load %arg5[%c0_17, %c0_18, %c0_19] : memref<4x168x64xf32, #tpu.memory_space<vmem>>, vector<1x168x64xf32>
    %12 = vector.shape_cast %11 : vector<1x168x64xf32> to vector<168x64xf32>
    %cst = arith.constant dense<0.000000e+00> : vector<192x64xf32>
    %13 = tpu.matmul %7, %12, %cst {dimension_numbers = #tpu.dot_dimension_numbers<[1], [0], [0], [1], [0, 0, 1, 1], [], []>} : vector<192x168xf32>, vector<168x64xf32>, vector<192x64xf32> -> vector<192x64xf32>
    %cst_20 = arith.constant dense<0.000000e+00> : vector<48x64xf32>
    %14 = tpu.matmul %1, %8, %cst_20 {dimension_numbers = #tpu.dot_dimension_numbers<[1], [0], [0], [1], [0, 0, 1, 1], [], []>} : vector<48x8xf32>, vector<8x64xf32>, vector<48x64xf32> -> vector<48x64xf32>
    %cst_21 = arith.constant dense<0.000000e+00> : vector<192x64xf32>
    %15 = tpu.matmul %3, %14, %cst_21 {dimension_numbers = #tpu.dot_dimension_numbers<[1], [0], [0], [1], [0, 0, 1, 1], [], []>} : vector<192x48xf32>, vector<48x64xf32>, vector<192x64xf32> -> vector<192x64xf32>
    %16 = arith.mulf %15, %13 : vector<192x64xf32>
    %cst_22 = arith.constant dense<0.000000e+00> : vector<192x8xf32>
    %17 = tpu.matmul %16, %9, %cst_22 {dimension_numbers = #tpu.dot_dimension_numbers<[1], [0], [0], [1], [0, 0, 1, 1], [], []>} : vector<192x64xf32>, vector<64x8xf32>, vector<192x8xf32> -> vector<192x8xf32>
    %cst_23 = arith.constant dense<0.000000e+00> : vector<48x8xf32>
    %18 = tpu.matmul %5, %17, %cst_23 {dimension_numbers = #tpu.dot_dimension_numbers<[1], [0], [0], [1], [0, 0, 1, 1], [], []>} : vector<48x192xf32>, vector<192x8xf32>, vector<48x8xf32> -> vector<48x8xf32>
    %c0_24 = arith.constant 0 : index
    %c0_25 = arith.constant 0 : index
    %c0_26 = arith.constant 0 : index
    %19 = vector.load %arg6[%c0_24, %c0_25, %c0_26] : memref<4x48x8xf32, #tpu.memory_space<vmem>>, vector<1x48x8xf32>
    %20 = vector.shape_cast %19 : vector<1x48x8xf32> to vector<48x8xf32>
    %21 = arith.addf %18, %20 : vector<48x8xf32>
    %cst_27 = arith.constant 0.000000e+00 : f32
    %22 = vector.broadcast %cst_27 : f32 to vector<48x8xf32>
    %23 = arith.subf %22, %21 : vector<48x8xf32>
    %24 = math.exp %23 : vector<48x8xf32>
    %cst_28 = arith.constant 1.000000e+00 : f32
    %25 = vector.broadcast %cst_28 : f32 to vector<48x8xf32>
    %26 = arith.addf %25, %24 : vector<48x8xf32>
    %27 = tpu.reciprocal %26 {approx = true} : vector<48x8xf32> -> vector<48x8xf32>
    %28 = arith.mulf %27, %10 : vector<48x8xf32>
    %c1 = arith.constant 1 : index
    %c0_29 = arith.constant 0 : index
    %c0_30 = arith.constant 0 : index
    %29 = vector.load %arg5[%c1, %c0_29, %c0_30] : memref<4x168x64xf32, #tpu.memory_space<vmem>>, vector<1x168x64xf32>
    %30 = vector.shape_cast %29 : vector<1x168x64xf32> to vector<168x64xf32>
    %cst_31 = arith.constant dense<0.000000e+00> : vector<192x64xf32>
    %31 = tpu.matmul %7, %30, %cst_31 {dimension_numbers = #tpu.dot_dimension_numbers<[1], [0], [0], [1], [0, 0, 1, 1], [], []>} : vector<192x168xf32>, vector<168x64xf32>, vector<192x64xf32> -> vector<192x64xf32>
    %cst_32 = arith.constant dense<0.000000e+00> : vector<48x64xf32>
    %32 = tpu.matmul %28, %8, %cst_32 {dimension_numbers = #tpu.dot_dimension_numbers<[1], [0], [0], [1], [0, 0, 1, 1], [], []>} : vector<48x8xf32>, vector<8x64xf32>, vector<48x64xf32> -> vector<48x64xf32>
    %cst_33 = arith.constant dense<0.000000e+00> : vector<192x64xf32>
    %33 = tpu.matmul %3, %32, %cst_33 {dimension_numbers = #tpu.dot_dimension_numbers<[1], [0], [0], [1], [0, 0, 1, 1], [], []>} : vector<192x48xf32>, vector<48x64xf32>, vector<192x64xf32> -> vector<192x64xf32>
    %34 = arith.mulf %33, %31 : vector<192x64xf32>
    %cst_34 = arith.constant dense<0.000000e+00> : vector<192x8xf32>
    %35 = tpu.matmul %34, %9, %cst_34 {dimension_numbers = #tpu.dot_dimension_numbers<[1], [0], [0], [1], [0, 0, 1, 1], [], []>} : vector<192x64xf32>, vector<64x8xf32>, vector<192x8xf32> -> vector<192x8xf32>
    %cst_35 = arith.constant dense<0.000000e+00> : vector<48x8xf32>
    %36 = tpu.matmul %5, %35, %cst_35 {dimension_numbers = #tpu.dot_dimension_numbers<[1], [0], [0], [1], [0, 0, 1, 1], [], []>} : vector<48x192xf32>, vector<192x8xf32>, vector<48x8xf32> -> vector<48x8xf32>
    %c1_36 = arith.constant 1 : index
    %c0_37 = arith.constant 0 : index
    %c0_38 = arith.constant 0 : index
    %37 = vector.load %arg6[%c1_36, %c0_37, %c0_38] : memref<4x48x8xf32, #tpu.memory_space<vmem>>, vector<1x48x8xf32>
    %38 = vector.shape_cast %37 : vector<1x48x8xf32> to vector<48x8xf32>
    %39 = arith.addf %36, %38 : vector<48x8xf32>
    %cst_39 = arith.constant 0.000000e+00 : f32
    %40 = vector.broadcast %cst_39 : f32 to vector<48x8xf32>
    %41 = arith.subf %40, %39 : vector<48x8xf32>
    %42 = math.exp %41 : vector<48x8xf32>
    %cst_40 = arith.constant 1.000000e+00 : f32
    %43 = vector.broadcast %cst_40 : f32 to vector<48x8xf32>
    %44 = arith.addf %43, %42 : vector<48x8xf32>
    %45 = tpu.reciprocal %44 {approx = true} : vector<48x8xf32> -> vector<48x8xf32>
    %46 = arith.mulf %45, %10 : vector<48x8xf32>
    %c2 = arith.constant 2 : index
    %c0_41 = arith.constant 0 : index
    %c0_42 = arith.constant 0 : index
    %47 = vector.load %arg5[%c2, %c0_41, %c0_42] : memref<4x168x64xf32, #tpu.memory_space<vmem>>, vector<1x168x64xf32>
    %48 = vector.shape_cast %47 : vector<1x168x64xf32> to vector<168x64xf32>
    %cst_43 = arith.constant dense<0.000000e+00> : vector<192x64xf32>
    %49 = tpu.matmul %7, %48, %cst_43 {dimension_numbers = #tpu.dot_dimension_numbers<[1], [0], [0], [1], [0, 0, 1, 1], [], []>} : vector<192x168xf32>, vector<168x64xf32>, vector<192x64xf32> -> vector<192x64xf32>
    %cst_44 = arith.constant dense<0.000000e+00> : vector<48x64xf32>
    %50 = tpu.matmul %46, %8, %cst_44 {dimension_numbers = #tpu.dot_dimension_numbers<[1], [0], [0], [1], [0, 0, 1, 1], [], []>} : vector<48x8xf32>, vector<8x64xf32>, vector<48x64xf32> -> vector<48x64xf32>
    %cst_45 = arith.constant dense<0.000000e+00> : vector<192x64xf32>
    %51 = tpu.matmul %3, %50, %cst_45 {dimension_numbers = #tpu.dot_dimension_numbers<[1], [0], [0], [1], [0, 0, 1, 1], [], []>} : vector<192x48xf32>, vector<48x64xf32>, vector<192x64xf32> -> vector<192x64xf32>
    %52 = arith.mulf %51, %49 : vector<192x64xf32>
    %cst_46 = arith.constant dense<0.000000e+00> : vector<192x8xf32>
    %53 = tpu.matmul %52, %9, %cst_46 {dimension_numbers = #tpu.dot_dimension_numbers<[1], [0], [0], [1], [0, 0, 1, 1], [], []>} : vector<192x64xf32>, vector<64x8xf32>, vector<192x8xf32> -> vector<192x8xf32>
    %cst_47 = arith.constant dense<0.000000e+00> : vector<48x8xf32>
    %54 = tpu.matmul %5, %53, %cst_47 {dimension_numbers = #tpu.dot_dimension_numbers<[1], [0], [0], [1], [0, 0, 1, 1], [], []>} : vector<48x192xf32>, vector<192x8xf32>, vector<48x8xf32> -> vector<48x8xf32>
    %c2_48 = arith.constant 2 : index
    %c0_49 = arith.constant 0 : index
    %c0_50 = arith.constant 0 : index
    %55 = vector.load %arg6[%c2_48, %c0_49, %c0_50] : memref<4x48x8xf32, #tpu.memory_space<vmem>>, vector<1x48x8xf32>
    %56 = vector.shape_cast %55 : vector<1x48x8xf32> to vector<48x8xf32>
    %57 = arith.addf %54, %56 : vector<48x8xf32>
    %cst_51 = arith.constant 0.000000e+00 : f32
    %58 = vector.broadcast %cst_51 : f32 to vector<48x8xf32>
    %59 = arith.subf %58, %57 : vector<48x8xf32>
    %60 = math.exp %59 : vector<48x8xf32>
    %cst_52 = arith.constant 1.000000e+00 : f32
    %61 = vector.broadcast %cst_52 : f32 to vector<48x8xf32>
    %62 = arith.addf %61, %60 : vector<48x8xf32>
    %63 = tpu.reciprocal %62 {approx = true} : vector<48x8xf32> -> vector<48x8xf32>
    %64 = arith.mulf %63, %10 : vector<48x8xf32>
    %c3 = arith.constant 3 : index
    %c0_53 = arith.constant 0 : index
    %c0_54 = arith.constant 0 : index
    %65 = vector.load %arg5[%c3, %c0_53, %c0_54] : memref<4x168x64xf32, #tpu.memory_space<vmem>>, vector<1x168x64xf32>
    %66 = vector.shape_cast %65 : vector<1x168x64xf32> to vector<168x64xf32>
    %cst_55 = arith.constant dense<0.000000e+00> : vector<192x64xf32>
    %67 = tpu.matmul %7, %66, %cst_55 {dimension_numbers = #tpu.dot_dimension_numbers<[1], [0], [0], [1], [0, 0, 1, 1], [], []>} : vector<192x168xf32>, vector<168x64xf32>, vector<192x64xf32> -> vector<192x64xf32>
    %cst_56 = arith.constant dense<0.000000e+00> : vector<48x64xf32>
    %68 = tpu.matmul %64, %8, %cst_56 {dimension_numbers = #tpu.dot_dimension_numbers<[1], [0], [0], [1], [0, 0, 1, 1], [], []>} : vector<48x8xf32>, vector<8x64xf32>, vector<48x64xf32> -> vector<48x64xf32>
    %cst_57 = arith.constant dense<0.000000e+00> : vector<192x64xf32>
    %69 = tpu.matmul %3, %68, %cst_57 {dimension_numbers = #tpu.dot_dimension_numbers<[1], [0], [0], [1], [0, 0, 1, 1], [], []>} : vector<192x48xf32>, vector<48x64xf32>, vector<192x64xf32> -> vector<192x64xf32>
    %70 = arith.mulf %69, %67 : vector<192x64xf32>
    %cst_58 = arith.constant dense<0.000000e+00> : vector<192x8xf32>
    %71 = tpu.matmul %70, %9, %cst_58 {dimension_numbers = #tpu.dot_dimension_numbers<[1], [0], [0], [1], [0, 0, 1, 1], [], []>} : vector<192x64xf32>, vector<64x8xf32>, vector<192x8xf32> -> vector<192x8xf32>
    %cst_59 = arith.constant dense<0.000000e+00> : vector<48x8xf32>
    %72 = tpu.matmul %5, %71, %cst_59 {dimension_numbers = #tpu.dot_dimension_numbers<[1], [0], [0], [1], [0, 0, 1, 1], [], []>} : vector<48x192xf32>, vector<192x8xf32>, vector<48x8xf32> -> vector<48x8xf32>
    %c3_60 = arith.constant 3 : index
    %c0_61 = arith.constant 0 : index
    %c0_62 = arith.constant 0 : index
    %73 = vector.load %arg6[%c3_60, %c0_61, %c0_62] : memref<4x48x8xf32, #tpu.memory_space<vmem>>, vector<1x48x8xf32>
    %74 = vector.shape_cast %73 : vector<1x48x8xf32> to vector<48x8xf32>
    %75 = arith.addf %72, %74 : vector<48x8xf32>
    %cst_63 = arith.constant 0.000000e+00 : f32
    %76 = vector.broadcast %cst_63 : f32 to vector<48x8xf32>
    %77 = arith.subf %76, %75 : vector<48x8xf32>
    %78 = math.exp %77 : vector<48x8xf32>
    %cst_64 = arith.constant 1.000000e+00 : f32
    %79 = vector.broadcast %cst_64 : f32 to vector<48x8xf32>
    %80 = arith.addf %79, %78 : vector<48x8xf32>
    %81 = tpu.reciprocal %80 {approx = true} : vector<48x8xf32> -> vector<48x8xf32>
    %82 = arith.mulf %81, %10 : vector<48x8xf32>
    %c0_65 = arith.constant 0 : index
    %c0_66 = arith.constant 0 : index
    %c0_67 = arith.constant 0 : index
    %83 = vector.load %arg10[%c0_65, %c0_66, %c0_67] : memref<1x48x8xf32, #tpu.memory_space<vmem>>, vector<1x48x8xf32>
    %84 = vector.shape_cast %83 : vector<1x48x8xf32> to vector<48x8xf32>
    %85 = vector.shape_cast %82 : vector<48x8xf32> to vector<1x48x8xf32>
    tpu.vector_store %arg10[%c0_65, %c0_66, %c0_67], %85 {strides = array<i32>} : memref<1x48x8xf32, #tpu.memory_space<vmem>>, vector<1x48x8xf32>,
    return
  }
  func.func @transform_0(%arg0: i32) -> (i32, i32, i32) {
    %c0_i32 = arith.constant 0 : i32
    %c0_i32_0 = arith.constant 0 : i32
    %c0_i32_1 = arith.constant 0 : i32
    return %arg0, %c0_i32, %c0_i32_0 : i32, i32, i32
  }
  func.func @transform_1(%arg0: i32) -> (i32, i32, i32) {
    %c0_i32 = arith.constant 0 : i32
    %c0_i32_0 = arith.constant 0 : i32
    %c0_i32_1 = arith.constant 0 : i32
    return %arg0, %c0_i32, %c0_i32_0 : i32, i32, i32
  }
  func.func @transform_2(%arg0: i32) -> (i32, i32, i32) {
    %c0_i32 = arith.constant 0 : i32
    %c0_i32_0 = arith.constant 0 : i32
    %c0_i32_1 = arith.constant 0 : i32
    return %arg0, %c0_i32, %c0_i32_0 : i32, i32, i32
  }
  func.func @transform_3(%arg0: i32) -> (i32, i32, i32) {
    %c0_i32 = arith.constant 0 : i32
    %c0_i32_0 = arith.constant 0 : i32
    %c0_i32_1 = arith.constant 0 : i32
    return %arg0, %c0_i32, %c0_i32_0 : i32, i32, i32
  }
  func.func @transform_4(%arg0: i32) -> (i32, i32, i32) {
    %c0_i32 = arith.constant 0 : i32
    %c0_i32_0 = arith.constant 0 : i32
    %c0_i32_1 = arith.constant 0 : i32
    %c0_i32_2 = arith.constant 0 : i32
    return %c0_i32, %c0_i32_0, %c0_i32_1 : i32, i32, i32
  }
  func.func @transform_5(%arg0: i32) -> (i32, i32, i32) {
    %c0_i32 = arith.constant 0 : i32
    %c0_i32_0 = arith.constant 0 : i32
    %c0_i32_1 = arith.constant 0 : i32
    %c0_i32_2 = arith.constant 0 : i32
    return %c0_i32, %c0_i32_0, %c0_i32_1 : i32, i32, i32
  }
  func.func @transform_6(%arg0: i32) -> (i32, i32) {
    %c0_i32 = arith.constant 0 : i32
    %c0_i32_0 = arith.constant 0 : i32
    %c0_i32_1 = arith.constant 0 : i32
    return %c0_i32, %c0_i32_0 : i32, i32
  }
  func.func @transform_7(%arg0: i32) -> (i32, i32) {
    %c0_i32 = arith.constant 0 : i32
    %c0_i32_0 = arith.constant 0 : i32
    %c0_i32_1 = arith.constant 0 : i32
    return %c0_i32, %c0_i32_0 : i32, i32
  }
  func.func @transform_8(%arg0: i32) -> (i32, i32) {
    %c0_i32 = arith.constant 0 : i32
    %c0_i32_0 = arith.constant 0 : i32
    %c0_i32_1 = arith.constant 0 : i32
    return %c0_i32, %c0_i32_0 : i32, i32
  }
  func.func @transform_9(%arg0: i32) -> (i32, i32, i32) {
    %c0_i32 = arith.constant 0 : i32
    %c0_i32_0 = arith.constant 0 : i32
    %c0_i32_1 = arith.constant 0 : i32
    return %arg0, %c0_i32, %c0_i32_0 : i32, i32, i32
  }
}

</mosaic_0001>

<bundles_post_ra>
// kernel: fused_forward_pallas.1
= control target key start
LH: loop header
LB: loop body
LE: loop exit
PB: predicated region body
PF: predicated region fallthrough
CT: control target
= control target key end

     0   :  { %s6266_s30 = smov 0   ;;  %s8294_s0 = inlined_call_operand.vmem [shape: f32[2,48,8], index: 0, kind: input, shape index: {}]   ;;  %s8295_s1 = inlined_call_operand.vmem [shape: f32[2,192,48], index: 1, kind: input, shape index: {}]   ;;  %s8296_s2 = inlined_call_operand.vmem [shape: f32[2,48,192], index: 2, kind: input, shape index: {}]   ;;  %s8297_s3 = inlined_call_operand.vmem [shape: f32[2,192,168], index: 3, kind: input, shape index: {}]   ;;  %s8298_s4 = inlined_call_operand.vmem [shape: f32[4,168,64], index: 4, kind: input, shape index: {}]   ;;  %s8299_s5 = inlined_call_operand.vmem [shape: f32[4,48,8], index: 5, kind: input, shape index: {}]   ;;  %s8300_s6 = inlined_call_operand.vmem [shape: f32[8,64], index: 6, kind: input, shape index: {}]   ;;  %s8301_s7 = inlined_call_operand.vmem [shape: f32[64,8], index: 7, kind: input, shape index: {}]   ;;  %s8302_s8 = inlined_call_operand.vmem [shape: f32[48,8], index: 8, kind: input, shape index: {}]   ;;  %s8303_s9 = inlined_call_operand.vmem [shape: f32[2,48,8], index: 9, kind: output, shape index: {}]  }
   0x1 LB: > { %s4455_s10 = sadd.s32 4294967295, %s6212_s30   ;;  %p4459_p0 = scmp.ge.s32.totalorder %s6212_s30, 1  ;;  %s6212_s30 = sphi %s6266_s30, %s19_s30  }
   0x2   : > { %p317_p1 = scmp.lt.s32.totalorder %s6212_s30, 3 }
   0x4   : > { %p318_p2 = pnand %p4459_p0, %p317_p1 }
   0x6   : > { %321 = sbr.rel (%p318_p2) target bundleno = 3866 (0xf1a), region = 56 }
   0xd   : > { %v6277_v0 = vld [vmem:[%s8300_s6] sm:$0xff]  ;;  %p368_p3 = scmp.lt.s32.totalorder %s4455_s10, 1  ;;  %v499_v2 = vld [vmem:[%s8298_s4 + $0x8] sm:$0xff]  ;;  %v8306_v3 = vmov 0.0|0.0   ;;  %v500_v5 = vld [vmem:[%s8298_s4 + $0x10] sm:$0xff]  ;;  %vm777_vm0 = vcmask 64512  }
   0xe   : > { %v498_v1 = vld [vmem:[%s8298_s4] sm:$0xff]  ;;  %5160 = vmatprep.subr.mxu1 %v6277_v0  ;;  %5604 = vmatprep.subr.bf16.mxu0 %v8306_v3  ;;  %v501_v6 = vld [vmem:[%s8298_s4 + $0x18] sm:$0xff]  ;;  %v503_v9 = vld [vmem:[%s8298_s4 + $0x28] sm:$0xff]  ;;  %vm519_vm1 = vcmask 326656   ;;  %v8304_v39 = vmov 0.0   ;;  %vm891_vm2 = vcmask 392192  }
   0xf   : > { %v5605_v4 = vpack.c.bf16 %v499_v2, %v498_v1  ;;  %5161 = vmatpush3.msra.mxu1 %v6277_v0  ;;  %s8602_s10 = smov (!%p368_p3, %s4455_s10), 1  ;;  %v5608_v7 = vpack.c.bf16 %v501_v6, %v500_v5  ;;  %v502_v8 = vld [vmem:[%s8298_s4 + $0x20] sm:$0xff]  ;;  %v504_v14 = vld [vmem:[%s8298_s4 + $0x30] sm:$0xff]  ;;  %v505_v15 = vld [vmem:[%s8298_s4 + $0x38] sm:$0xff]  ;;  %vm1173_vm3 = vcmask 523264  }
  0x10   : > { %s6004_s21 = smul.u32 48, %s8602_s10  ;;  %v5611_v13 = vpack.c.bf16 %v503_v9, %v502_v8  ;;  %v5614_v19 = vpack.c.bf16 %v505_v15, %v504_v14  ;;  %v506_v20 = vld [vmem:[%s8298_s4 + $0x40] sm:$0xff]  ;;  %v507_v21 = vld [vmem:[%s8298_s4 + $0x48] sm:$0xff]  ;;  %v508_v24 = vld [vmem:[%s8298_s4 + $0x50] sm:$0xff] }
  0x11   : > { %5606 = vmatpush1.bf16.msra.mxu0 %v5605_v4  ;;  %s6007_s29 = smul.u32 384, %s8602_s10  ;;  %v5617_v23 = vpack.c.bf16 %v507_v21, %v506_v20  ;;  %v509_v25 = vld [vmem:[%s8298_s4 + $0x58] sm:$0xff]  ;;  %v510_v27 = vld [vmem:[%s8298_s4 + $0x60] sm:$0xff]  ;;  %v511_v28 = vld [vmem:[%s8298_s4 + $0x68] sm:$0xff] }
  0x12   : > { %5607 = vmatprep.subr.bf16.mxu0 %v8306_v3  ;;  %s372_s28 = scalar_lea.vmem %s8294_s0, %s6004_s21  ;;  %v5620_v26 = vpack.c.bf16 %v509_v25, %v508_v24  ;;  %v5623_v29 = vpack.c.bf16 %v511_v28, %v510_v27  ;;  %v512_v30 = vld [vmem:[%s8298_s4 + $0x70] sm:$0xff]  ;;  %v513_v31 = vld [vmem:[%s8298_s4 + $0x78] sm:$0xff]  ;;  %v514_v33 = vld [vmem:[%s8298_s4 + $0x80] sm:$0xff]  ;;  %s6006_s13 = smul.u32 96, %s8602_s10 }
  0x13   : > { %v393_v10 = vld [vmem:[%s372_s28] sm:$0xff]  ;;  %v394_v11 = vld [vmem:[%s372_s28 + $0x8] sm:$0xff]  ;;  %v395_v12 = vld [vmem:[%s372_s28 + $0x10] sm:$0xff]  ;;  %s6321_s17 = scalar_lea.vmem %s8297_s3, %s6007_s29  ;;  %v5626_v32 = vpack.c.bf16 %v513_v31, %v512_v30  ;;  %s392_s29 = scalar_lea.vmem %s8303_s9, %s6004_s21 }
  0x14   : > { %5162 = vmatprep.mubr.msk.f32.mxu1 %vm777_vm0, %v393_v10  ;;  %v396_v16 = vld [vmem:[%s372_s28 + $0x18] sm:$0xff]  ;;  %v6326_v17 = vld [vmem:[%s6321_s17 + $0x8] sm:$0xff]  ;;  %v397_v18 = vld [vmem:[%s372_s28 + $0x20] sm:$0xff]  ;;  %s6843_s16 = scalar_lea.vmem %s8296_s2, %s6006_s13 }
  0x15   : > { %5609 = vmatpush1.bf16.msra.mxu0 %v5608_v7  ;;  %5163 = vmatmul.mubr.msk.f32.vlgmr.msra.gmra.mrb[0].mxu1 %vm777_vm0, %v394_v11  ;;  %v398_v22 = vld [vmem:[%s372_s28 + $0x28] sm:$0xff]  ;;  %v516_v36 = vld [vmem:[%s8298_s4 + $0x90] sm:$0xff]  ;;  %v517_v37 = vld [vmem:[%s8298_s4 + $0x98] sm:$0xff]  ;;  %s6005_s28 = smul.u32 192, %s8602_s10 }
  0x16   : > { %5610 = vmatprep.subr.bf16.mxu0 %v8306_v3  ;;  %5165 = vmatprep.mubr.msk.f32.mxu1 %vm777_vm0, %v395_v12  ;;  %v515_v34 = vld [vmem:[%s8298_s4 + $0x88] sm:$0xff]  ;;  %v5632_v38 = vpack.c.bf16 %v517_v37, %v516_v36  ;;  %v518_v40 = vld [vmem:[%s8298_s4 + $0xa0] sm:$0xff]  ;;  %v6384_v42 = vld [vmem:[%s6321_s17 + $0x18] sm:$0xff] }
  0x17   : > { %4465 = vmatprep.mubr.msk.f32.mxu0 %vm519_vm1, %v6326_v17  ;;  %v5629_v35 = vpack.c.bf16 %v515_v34, %v514_v33  ;;  %v6381_v41 = vld [vmem:[%s6321_s17] sm:$0xff]  ;;  %v6391_v43 = vld [vmem:[%s6321_s17 + $0x10] sm:$0xff]  ;;  %v6394_v44 = vld [vmem:[%s6321_s17 + $0x28] sm:$0xff]  ;;  %s6479_s12 = scalar_lea.vmem %s8295_s1, %s6005_s28 }
  0x18   : > { %v6400_v45 = vld [vmem:[%s6321_s17 + $0x20] sm:$0xff]  ;;  %v6403_v46 = vld [vmem:[%s6321_s17 + $0x38] sm:$0xff]  ;;  %v6409_v47 = vld [vmem:[%s6321_s17 + $0x30] sm:$0xff] }
  0x19   : > { %5612 = vmatpush1.bf16.msra.mxu0 %v5611_v13  ;;  %5166 = vmatmul.mubr.msk.f32.gmra.mrb[2].mxu1 %vm777_vm0, %v396_v16  ;;  %v6412_v48 = vld [vmem:[%s6321_s17 + $0x48] sm:$0xff]  ;;  %v6418_v49 = vld [vmem:[%s6321_s17 + $0x40] sm:$0xff]  ;;  %v6421_v50 = vld [vmem:[%s6321_s17 + $0x58] sm:$0xff] }
  0x1a   : > { %5613 = vmatprep.subr.bf16.mxu0 %v8306_v3  ;;  %5168 = vmatprep.mubr.msk.f32.mxu1 %vm777_vm0, %v397_v18  ;;  %v6427_v51 = vld [vmem:[%s6321_s17 + $0x50] sm:$0xff]  ;;  %v6430_v52 = vld [vmem:[%s6321_s17 + $0x68] sm:$0xff]  ;;  %v6436_v53 = vld [vmem:[%s6321_s17 + $0x60] sm:$0xff] }
  0x1b   : > { %v6439_v54 = vld [vmem:[%s6321_s17 + $0x78] sm:$0xff]  ;;  %v6445_v55 = vld [vmem:[%s6321_s17 + $0x70] sm:$0xff]  ;;  %v6448_v56 = vld [vmem:[%s6321_s17 + $0x88] sm:$0xff] }
  0x1c   : > { %v6454_v57 = vld [vmem:[%s6321_s17 + $0x80] sm:$0xff]  ;;  %v6458_v58 = vld [vmem:[%s6321_s17 + $0x98] sm:$0xff]  ;;  %v6461_v59 = vld [vmem:[%s6321_s17 + $0x90] sm:$0xff] }
  0x1d   : > { %5615 = vmatpush1.bf16.msra.mxu0 %v5614_v19  ;;  %5169 = vmatmul.mubr.msk.f32.gmra.mrb[4].mxu1 %vm777_vm0, %v398_v22  ;;  %v6468_v60 = vld [vmem:[%s6321_s17 + $0xa8] sm:$0xff]  ;;  %v6471_v61 = vld [vmem:[%s6321_s17 + $0xa0] sm:$0xff]  ;;  %v6482_v62 = vld [vmem:[%s6321_s17 + $0xb8] sm:$0xff] }
  0x1e   : > { %5616 = vmatprep.subr.bf16.mxu0 %v8306_v3  ;;  %v6485_v63 = vld [vmem:[%s6321_s17 + $0xb0] sm:$0xff]  ;;  %v6491_v1 = vld [vmem:[%s6321_s17 + $0xc8] sm:$0xff]  ;;  %v399_v2 = vld [vmem:[%s6479_s12] sm:$0xff] }
  0x1f   : > { %v6495_v4 = vld [vmem:[%s6321_s17 + $0xc0] sm:$0xff]  ;;  %5183 = vmatprep.mubr.msk.f32.mxu1 %vm891_vm2, %v399_v2  ;;  %v6502_v5 = vld [vmem:[%s6321_s17 + $0xd8] sm:$0xff]  ;;  %v6507_v6 = vld [vmem:[%s6321_s17 + $0xd0] sm:$0xff] }
  0x20   : > { %v6511_v7 = vld [vmem:[%s6321_s17 + $0xe8] sm:$0xff]  ;;  %v6516_v8 = vld [vmem:[%s6321_s17 + $0xe0] sm:$0xff]  ;;  %v6520_v9 = vld [vmem:[%s6321_s17 + $0xf8] sm:$0xff] }
  0x21   : > { %5618 = vmatpush1.bf16.msra.mxu0 %v5617_v23  ;;  %8409 = vst [vmem:[#allocation2_spill] sm:$0xff] %v6511_v7  ;;  %8410 = vst [vmem:[#allocation3_spill] sm:$0xff] %v6516_v8  ;;  %v6525_v10 = vld [vmem:[%s6321_s17 + $0xf0] sm:$0xff]  ;;  %v6529_v11 = vld [vmem:[%s6321_s17 + $0x108] sm:$0xff] }
  0x22   : > { %5619 = vmatprep.subr.bf16.mxu0 %v8306_v3  ;;  %8411 = vst [vmem:[#allocation4_spill] sm:$0xff] %v6520_v9  ;;  %8412 = vst [vmem:[#allocation5_spill] sm:$0xff] %v6525_v10  ;;  %v6534_v12 = vld [vmem:[%s6321_s17 + $0x100] sm:$0xff]  ;;  %v6538_v13 = vld [vmem:[%s6321_s17 + $0x118] sm:$0xff] }
  0x23   : > { %8413 = vst [vmem:[#allocation6_spill] sm:$0xff] %v6529_v11  ;;  %8414 = vst [vmem:[#allocation7_spill] sm:$0xff] %v6534_v12  ;;  %v6543_v14 = vld [vmem:[%s6321_s17 + $0x110] sm:$0xff]  ;;  %v6547_v15 = vld [vmem:[%s6321_s17 + $0x128] sm:$0xff] }
  0x24   : > { %8415 = vst [vmem:[#allocation8_spill] sm:$0xff] %v6538_v13  ;;  %8416 = vst [vmem:[#allocation9_spill] sm:$0xff] %v6543_v14  ;;  %v6552_v16 = vld [vmem:[%s6321_s17 + $0x120] sm:$0xff]  ;;  %v6556_v18 = vld [vmem:[%s6321_s17 + $0x138] sm:$0xff] }
  0x25   : > { %5621 = vmatpush1.bf16.msra.mxu0 %v5620_v26  ;;  %8417 = vst [vmem:[#allocation10_spill] sm:$0xff] %v6547_v15  ;;  %8418 = vst [vmem:[#allocation11_spill] sm:$0xff] %v6552_v16  ;;  %v6561_v19 = vld [vmem:[%s6321_s17 + $0x130] sm:$0xff]  ;;  %v6565_v20 = vld [vmem:[%s6321_s17 + $0x148] sm:$0xff] }
  0x26   : > { %5622 = vmatprep.subr.bf16.mxu0 %v8306_v3  ;;  %8419 = vst [vmem:[#allocation12_spill] sm:$0xff] %v6556_v18  ;;  %8420 = vst [vmem:[#allocation13_spill] sm:$0xff] %v6561_v19  ;;  %v6570_v21 = vld [vmem:[%s6321_s17 + $0x140] sm:$0xff]  ;;  %v6574_v22 = vld [vmem:[%s6321_s17 + $0x158] sm:$0xff] }
  0x27   : > { %8421 = vst [vmem:[#allocation14_spill] sm:$0xff] %v6565_v20  ;;  %8422 = vst [vmem:[#allocation15_spill] sm:$0xff] %v6570_v21  ;;  %v6579_v23 = vld [vmem:[%s6321_s17 + $0x150] sm:$0xff]  ;;  %v6583_v24 = vld [vmem:[%s6321_s17 + $0x168] sm:$0xff] }
  0x28   : > { %8423 = vst [vmem:[#allocation16_spill] sm:$0xff] %v6574_v22  ;;  %8424 = vst [vmem:[#allocation17_spill] sm:$0xff] %v6579_v23  ;;  %v6588_v25 = vld [vmem:[%s6321_s17 + $0x160] sm:$0xff]  ;;  %v6592_v26 = vld [vmem:[%s6321_s17 + $0x178] sm:$0xff] }
  0x29   : > { %5624 = vmatpush1.bf16.msra.mxu0 %v5623_v29  ;;  %8425 = vst [vmem:[#allocation18_spill] sm:$0xff] %v6583_v24  ;;  %8426 = vst [vmem:[#allocation19_spill] sm:$0xff] %v6588_v25  ;;  %v6597_v27 = vld [vmem:[%s6321_s17 + $0x170] sm:$0xff]  ;;  %v484_v34 = vld [vmem:[%s8301_s7] sm:$0xff] }
  0x2a   : > { %5625 = vmatprep.subr.bf16.mxu0 %v8306_v3  ;;  %8427 = vst [vmem:[#allocation20_spill] sm:$0xff] %v6592_v26  ;;  %8428 = vst [vmem:[#allocation21_spill] sm:$0xff] %v6597_v27  ;;  %v487_v2 = vld [vmem:[%s8301_s7 + $0x18] sm:$0xff] }
  0x2d   : > { %5627 = vmatpush1.bf16.msra.mxu0 %v5626_v32 }
  0x2e   : > { %5628 = vmatprep.subr.bf16.mxu0 %v8306_v3 }
  0x31   : > { %5630 = vmatpush1.bf16.msra.mxu0 %v5629_v35  ;;  %v485_v35 = vld [vmem:[%s8301_s7 + $0x8] sm:$0xff] }
  0x32   : > { %5631 = vmatprep.subr.bf16.mxu0 %v8306_v3 }
  0x35   : > { %5633 = vmatpush1.bf16.msra.mxu0 %v5632_v38  ;;  %v6608_v38 = vpack.c.bf16 %v485_v35, %v484_v34  ;;  %v6640_v34 = vld [vmem:[%s6479_s12 + $0x20] sm:$0xff] }
  0x36   : > { %632 = vmatprep.subr.mxu0 %v8304_v39  ;;  %8434 = vst [vmem:[#allocation27_spill] sm:$0xff] %v6640_v34  ;;  %v6686_v39 = vld [vmem:[%s6479_s12 + $0x60] sm:$0xff] }
  0x37   : > { %8429 = vst [vmem:[#allocation22_spill] sm:$0xff] %v6608_v38  ;;  %8443 = vst [vmem:[#allocation36_spill] sm:$0xff] %v6686_v39 }
  0x39   : > { %633 = vmatpush1.msra.mxu0 %v518_v40  ;;  %v486_v40 = vld [vmem:[%s8301_s7 + $0x10] sm:$0xff] }
  0x3a   : > { %657 = vmatmul.mubr.f32.vlgmr.msra.gmra.mrb[0].mxu0 %v6381_v41  ;;  %5698 = vmatprep.subr.bf16.mxu0 %v8306_v3 }
  0x3b   : > { %4466 = vmatprep.mubr.msk.f32.mxu0 %vm519_vm1, %v6384_v42 }
  0x3e   : > { %662 = vmatmul.mubr.f32.gmra.mrb[2].mxu0 %v6391_v43 }
  0x3f   : > { %4467 = vmatprep.mubr.msk.f32.mxu0 %vm519_vm1, %v6394_v44 }
  0x42   : > { %667 = vmatmul.mubr.f32.gmra.mrb[4].mxu0 %v6400_v45 }
  0x43   : > { %4468 = vmatprep.mubr.msk.f32.mxu0 %vm519_vm1, %v6403_v46 }
  0x46   : > { %672 = vmatmul.mubr.f32.gmra.mrb[6].mxu0 %v6409_v47 }
  0x47   : > { %4469 = vmatprep.mubr.msk.f32.mxu0 %vm519_vm1, %v6412_v48 }
  0x4a   : > { %677 = vmatmul.mubr.f32.gmra.mrb[8].mxu0 %v6418_v49 }
  0x4b   : > { %4470 = vmatprep.mubr.msk.f32.mxu0 %vm519_vm1, %v6421_v50 }
  0x4e   : > { %682 = vmatmul.mubr.f32.gmra.mrb[10].mxu0 %v6427_v51 }
  0x4f   : > { %4471 = vmatprep.mubr.msk.f32.mxu0 %vm519_vm1, %v6430_v52 }
  0x52   : > { %687 = vmatmul.mubr.f32.gmra.mrb[12].mxu0 %v6436_v53 }
  0x53   : > { %4472 = vmatprep.mubr.msk.f32.mxu0 %vm519_vm1, %v6439_v54 }
  0x56   : > { %692 = vmatmul.mubr.f32.gmra.mrb[14].mxu0 %v6445_v55 }
  0x57   : > { %4473 = vmatprep.mubr.msk.f32.mxu0 %vm519_vm1, %v6448_v56 }
  0x5a   : > { %697 = vmatmul.mubr.f32.gmra.mrb[16].mxu0 %v6454_v57 }
  0x5b   : > { %4474 = vmatprep.mubr.msk.f32.mxu0 %vm519_vm1, %v6458_v58 }
  0x5e   : > { %702 = vmatmul.mubr.f32.gmra.mrb[18].mxu0 %v6461_v59 }
  0x5f   : > { %4475 = vmatprep.mubr.msk.f32.mxu0 %vm519_vm1, %v6468_v60 }
  0x62   : > { %707 = vmatmul.mubr.f32.gmra.mrb[20].mxu0 %v6471_v61 }
  0x63   : > { %4476 = vmatprep.mubr.msk.f32.mxu0 %vm519_vm1, %v6482_v62 }
  0x66   : > { %712 = vmatmul.mubr.f32.gmra.mrb[22].mxu0 %v6485_v63 }
  0x67   : > { %4477 = vmatprep.mubr.msk.f32.mxu0 %vm519_vm1, %v6491_v1 }
  0x6a   : > { %717 = vmatmul.mubr.f32.gmra.mrb[24].mxu0 %v6495_v4 }
  0x6b   : > { %4478 = vmatprep.mubr.msk.f32.mxu0 %vm519_vm1, %v6502_v5 }
  0x6e   : > { %722 = vmatmul.mubr.f32.gmra.mrb[26].mxu0 %v6507_v6 }
  0x6f   : > { %4479 = vmatprep.mubr.msk.f32.mxu0 %vm519_vm1, %v6511_v7 }
  0x72   : > { %727 = vmatmul.mubr.f32.gmra.mrb[28].mxu0 %v6516_v8 }
  0x73   : > { %4480 = vmatprep.mubr.msk.f32.mxu0 %vm519_vm1, %v6520_v9 }
  0x76   : > { %732 = vmatmul.mubr.f32.gmra.mrb[30].mxu0 %v6525_v10 }
  0x77   : > { %4481 = vmatprep.mubr.msk.f32.mxu0 %vm519_vm1, %v6529_v11 }
  0x7a   : > { %737 = vmatmul.mubr.f32.gmra.mrb[32].mxu0 %v6534_v12 }
  0x7b   : > { %4482 = vmatprep.mubr.msk.f32.mxu0 %vm519_vm1, %v6538_v13 }
  0x7e   : > { %742 = vmatmul.mubr.f32.gmra.mrb[34].mxu0 %v6543_v14 }
  0x7f   : > { %4483 = vmatprep.mubr.msk.f32.mxu0 %vm519_vm1, %v6547_v15 }
  0x82   : > { %747 = vmatmul.mubr.f32.gmra.mrb[36].mxu0 %v6552_v16 }
  0x83   : > { %4484 = vmatprep.mubr.msk.f32.mxu0 %vm519_vm1, %v6556_v18 }
  0x86   : > { %752 = vmatmul.mubr.f32.gmra.mrb[38].mxu0 %v6561_v19 }
  0x87   : > { %4485 = vmatprep.mubr.msk.f32.mxu0 %vm519_vm1, %v6565_v20 }
  0x8a   : > { %757 = vmatmul.mubr.f32.gmra.mrb[40].mxu0 %v6570_v21 }
  0x8b   : > { %4486 = vmatprep.mubr.msk.f32.mxu0 %vm519_vm1, %v6574_v22 }
  0x8e   : > { %762 = vmatmul.mubr.f32.gmra.mrb[42].mxu0 %v6579_v23 }
  0x8f   : > { %4487 = vmatprep.mubr.msk.f32.mxu0 %vm519_vm1, %v6583_v24  ;;  %v490_v24 = vld [vmem:[%s8301_s7 + $0x30] sm:$0xff] }
  0x92   : > { %767 = vmatmul.mubr.f32.gmra.mrb[44].mxu0 %v6588_v25 }
  0x93   : > { %4488 = vmatprep.mubr.msk.f32.mxu0 %vm519_vm1, %v6592_v26 }
  0x96   : > { %772 = vmatmul.mubr.f32.gmra.mrb[46].mxu0 %v6597_v27 }
  0x97   : > { %4570 = vmatprep.mubr.msk.f32.mxu0 %vm519_vm1, %v6326_v17 }
  0xe8   : > { %v5164_v28 = vpop.f32.mrb[0].mxu1 }
  0xe9   : > { %v862_v29 = vpop.f32.mrb[1].mxu1 }
  0xea   : > { %v5634_v30 = vpack.c.bf16 %v5164_v28, %v862_v29  ;;  %v6617_v28 = vld [vmem:[%s6479_s12 + $0x8] sm:$0xff]  ;;  %v6620_v29 = vld [vmem:[%s6479_s12 + $0x10] sm:$0xff] }
  0xeb   : > { %8430 = vst [vmem:[#allocation23_spill] sm:$0xff] %v6617_v28  ;;  %8431 = vst [vmem:[#allocation24_spill] sm:$0xff] %v6620_v29 }
  0xec   : > { %v5167_v31 = vpop.f32.mrb[2].mxu1  ;;  %5635 = vmatprep.subr.bf16.mxu1 %v5634_v30 }
  0xed   : > { %v872_v32 = vpop.f32.mrb[3].mxu1  ;;  %5637 = vmatpush3.bf16.msra.mxu1 %v5634_v30  ;;  %v6623_v30 = vpack.c.bf16 %v487_v2, %v486_v40  ;;  %v6666_v40 = vld [vmem:[%s6479_s12 + $0x40] sm:$0xff]  ;;  %v6673_v2 = vld [vmem:[%s6479_s12 + $0x48] sm:$0xff] }
  0xee   : > { %v5638_v33 = vpack.c.bf16 %v5167_v31, %v872_v32  ;;  %v488_v31 = vld [vmem:[%s8301_s7 + $0x20] sm:$0xff]  ;;  %v489_v32 = vld [vmem:[%s8301_s7 + $0x28] sm:$0xff]  ;;  %8439 = vst [vmem:[#allocation32_spill] sm:$0xff] %v6666_v40  ;;  %8440 = vst [vmem:[#allocation33_spill] sm:$0xff] %v6673_v2 }
  0xef   : > { %8432 = vst [vmem:[#allocation25_spill] sm:$0xff] %v6623_v30  ;;  %v6643_v35 = vpack.c.bf16 %v489_v32, %v488_v31  ;;  %v6676_v31 = vld [vmem:[%s6479_s12 + $0x50] sm:$0xff]  ;;  %v6683_v32 = vld [vmem:[%s6479_s12 + $0x58] sm:$0xff] }
  0xf0   : > { %v5170_v36 = vpop.f32.mrb[4].mxu1  ;;  %5639 = vmatprep.subr.bf16.mxu1 %v5638_v33  ;;  %8441 = vst [vmem:[#allocation34_spill] sm:$0xff] %v6676_v31  ;;  %8442 = vst [vmem:[#allocation35_spill] sm:$0xff] %v6683_v32 }
  0xf1   : > { %v882_v17 = vpop.f32.mrb[5].mxu1  ;;  %5641 = vmatpush3.bf16.msra.mxu1 %v5638_v33  ;;  %v6636_v33 = vld [vmem:[%s6479_s12 + $0x18] sm:$0xff]  ;;  %8435 = vst [vmem:[#allocation28_spill] sm:$0xff] %v6643_v35 }
  0xf2   : > { %v5642_v37 = vpack.c.bf16 %v5170_v36, %v882_v17  ;;  %8433 = vst [vmem:[#allocation26_spill] sm:$0xff] %v6636_v33  ;;  %v6650_v36 = vld [vmem:[%s6479_s12 + $0x28] sm:$0xff]  ;;  %v6654_v17 = vld [vmem:[%s6479_s12 + $0x30] sm:$0xff] }
  0xf3   : > { %8436 = vst [vmem:[#allocation29_spill] sm:$0xff] %v6650_v36  ;;  %8437 = vst [vmem:[#allocation30_spill] sm:$0xff] %v6654_v17 }
  0xf4   : > { %5643 = vmatprep.subr.bf16.mxu1 %v5642_v37 }
  0xf5   : > { %5645 = vmatpush3.bf16.msra.mxu1 %v5642_v37  ;;  %v6662_v37 = vld [vmem:[%s6479_s12 + $0x38] sm:$0xff] }
  0xf6   : > { %5647 = vmatprep.subr.bf16.mxu1 %v6608_v38  ;;  %8438 = vst [vmem:[#allocation31_spill] sm:$0xff] %v6662_v37 }
  0xf8   : > { %5184 = vmatmul.mubr.msk.f32.vlgmr.msra.gmra.mrb[6].mxu1 %vm891_vm2, %v6617_v28 }
  0xf9   : > { %5186 = vmatprep.mubr.msk.f32.mxu1 %vm891_vm2, %v6620_v29  ;;  %5649 = vmatpush3.bf16.msra.mxu1 %v6608_v38 }
  0xfa   : > { %5651 = vmatprep.subr.bf16.mxu1 %v6623_v30 }
  0xfc   : > { %5187 = vmatmul.mubr.msk.f32.gmra.mrb[8].mxu1 %vm891_vm2, %v6636_v33  ;;  %v6743_v33 = vld [vmem:[%s6479_s12 + $0xa8] sm:$0xff] }
  0xfd   : > { %5189 = vmatprep.mubr.msk.f32.mxu1 %vm891_vm2, %v6640_v34  ;;  %5653 = vmatpush3.bf16.msra.mxu1 %v6623_v30  ;;  %8452 = vst [vmem:[#allocation45_spill] sm:$0xff] %v6743_v33  ;;  %v6753_v30 = vld [vmem:[%s6479_s12 + $0xb8] sm:$0xff] }
  0xfe   : > { %5655 = vmatprep.subr.bf16.mxu1 %v6643_v35  ;;  %8454 = vst [vmem:[#allocation47_spill] sm:$0xff] %v6753_v30 }
 0x100   : > { %5190 = vmatmul.mubr.msk.f32.gmra.mrb[10].mxu1 %vm891_vm2, %v6650_v36 }
 0x101   : > { %5192 = vmatprep.mubr.msk.f32.mxu1 %vm891_vm2, %v6654_v17  ;;  %5657 = vmatpush3.bf16.msra.mxu1 %v6643_v35 }
 0x104   : > { %5193 = vmatmul.mubr.msk.f32.gmra.mrb[12].mxu1 %vm891_vm2, %v6662_v37  ;;  %v6695_v37 = vld [vmem:[%s6479_s12 + $0x68] sm:$0xff] }
 0x105   : > { %5195 = vmatprep.mubr.msk.f32.mxu1 %vm891_vm2, %v6666_v40  ;;  %8444 = vst [vmem:[#allocation37_spill] sm:$0xff] %v6695_v37 }
 0x108   : > { %5196 = vmatmul.mubr.msk.f32.gmra.mrb[14].mxu1 %vm891_vm2, %v6673_v2  ;;  %v6698_v2 = vld [vmem:[%s6479_s12 + $0x70] sm:$0xff] }
 0x109   : > { %5198 = vmatprep.mubr.msk.f32.mxu1 %vm891_vm2, %v6676_v31  ;;  %8445 = vst [vmem:[#allocation38_spill] sm:$0xff] %v6698_v2 }
 0x10c   : > { %5199 = vmatmul.mubr.msk.f32.gmra.mrb[16].mxu1 %vm891_vm2, %v6683_v32  ;;  %v6707_v32 = vld [vmem:[%s6479_s12 + $0x78] sm:$0xff] }
 0x10d   : > { %v6688_v3 = vpop.f32.mrb[0].mxu0  ;;  %5201 = vmatprep.mubr.msk.f32.mxu1 %vm891_vm2, %v6686_v39  ;;  %8446 = vst [vmem:[#allocation39_spill] sm:$0xff] %v6707_v32 }
 0x10e   : > { %v660_v40 = vpop.f32.mrb[1].mxu0 }
 0x10f   : > { %v6710_v40 = vld [vmem:[%s6479_s12 + $0x80] sm:$0xff] }
 0x110   : > { %5202 = vmatmul.mubr.msk.f32.gmra.mrb[18].mxu1 %vm891_vm2, %v6695_v37  ;;  %8447 = vst [vmem:[#allocation40_spill] sm:$0xff] %v6710_v40  ;;  %v6719_v37 = vld [vmem:[%s6479_s12 + $0x88] sm:$0xff] }
 0x111   : > { %v6700_v31 = vpop.f32.mrb[2].mxu0  ;;  %5204 = vmatprep.mubr.msk.f32.mxu1 %vm891_vm2, %v6698_v2  ;;  %8448 = vst [vmem:[#allocation41_spill] sm:$0xff] %v6719_v37 }
 0x112   : > { %v665_v17 = vpop.f32.mrb[3].mxu0 }
 0x113   : > { %v6722_v17 = vld [vmem:[%s6479_s12 + $0x90] sm:$0xff] }
 0x114   : > { %5205 = vmatmul.mubr.msk.f32.gmra.mrb[20].mxu1 %vm891_vm2, %v6707_v32  ;;  %8449 = vst [vmem:[#allocation42_spill] sm:$0xff] %v6722_v17  ;;  %v6731_v32 = vld [vmem:[%s6479_s12 + $0x98] sm:$0xff] }
 0x115   : > { %v6712_v39 = vpop.f32.mrb[4].mxu0  ;;  %5207 = vmatprep.mubr.msk.f32.mxu1 %vm891_vm2, %v6710_v40  ;;  %8450 = vst [vmem:[#allocation43_spill] sm:$0xff] %v6731_v32 }
 0x116   : > { %v670_v36 = vpop.f32.mrb[5].mxu0 }
 0x117   : > { %v6734_v36 = vld [vmem:[%s6479_s12 + $0xa0] sm:$0xff] }
 0x118   : > { %5208 = vmatmul.mubr.msk.f32.gmra.mrb[22].mxu1 %vm891_vm2, %v6719_v37  ;;  %8451 = vst [vmem:[#allocation44_spill] sm:$0xff] %v6734_v36  ;;  %v6746_v37 = vld [vmem:[%s6479_s12 + $0xb0] sm:$0xff] }
 0x119   : > { %v6724_v2 = vpop.f32.mrb[6].mxu0  ;;  %5210 = vmatprep.mubr.msk.f32.mxu1 %vm891_vm2, %v6722_v17  ;;  %8453 = vst [vmem:[#allocation46_spill] sm:$0xff] %v6746_v37 }
 0x11a   : > { %v675_v35 = vpop.f32.mrb[7].mxu0 }
 0x11c   : > { %5211 = vmatmul.mubr.msk.f32.gmra.mrb[24].mxu1 %vm891_vm2, %v6731_v32 }
 0x11d   : > { %v6736_v34 = vpop.f32.mrb[8].mxu0  ;;  %5213 = vmatprep.mubr.msk.f32.mxu1 %vm891_vm2, %v6734_v36 }
 0x11e   : > { %v680_v40 = vpop.f32.mrb[9].mxu0 }
 0x120   : > { %5214 = vmatmul.mubr.msk.f32.gmra.mrb[26].mxu1 %vm891_vm2, %v6743_v33 }
 0x121   : > { %v683_v35 = vpop.f32.mrb[10].mxu0  ;;  %5216 = vmatprep.mubr.msk.f32.mxu1 %vm891_vm2, %v6746_v37 }
 0x122   : > { %v685_v17 = vpop.f32.mrb[11].mxu0 }
 0x124   : > { %5217 = vmatmul.mubr.msk.f32.gmra.mrb[28].mxu1 %vm891_vm2, %v6753_v30 }
 0x125   : > { %v6755_v29 = vpop.f32.mrb[12].mxu0 }
 0x126   : > { %v690_v40 = vpop.f32.mrb[13].mxu0 }
 0x127   : > { %v491_v40 = vld [vmem:[%s8301_s7 + $0x38] sm:$0xff] }
 0x129   : > { %v693_v36 = vpop.f32.mrb[14].mxu0 }
 0x12a   : > { %v695_v32 = vpop.f32.mrb[15].mxu0 }
 0x12b   : > { %v6771_v32 = vpack.c.bf16 %v491_v40, %v490_v24 }
 0x12d   : > { %v6759_v28 = vpop.f32.mrb[16].mxu0  ;;  %8455 = vst [vmem:[#allocation48_spill] sm:$0xff] %v6771_v32  ;;  %5659 = vmatprep.subr.bf16.mxu1 %v6771_v32 }
 0x12e   : > { %v700_v38 = vpop.f32.mrb[17].mxu0  ;;  %5661 = vmatpush3.bf16.msra.mxu1 %v6771_v32 }
 0x12f   : > { %v8456_v38 = vmov 0.0|0.0  }
 0x130   : > { %5662 = vmatprep.subr.bf16.mxu1 %v8456_v38 }
 0x131   : > { %v703_v27 = vpop.f32.mrb[18].mxu0 }
 0x132   : > { %v705_v26 = vpop.f32.mrb[19].mxu0 }
 0x135   : > { %v6761_v33 = vpop.f32.mrb[20].mxu0 }
 0x136   : > { %v710_v17 = vpop.f32.mrb[21].mxu0 }
 0x139   : > { %v6763_v25 = vpop.f32.mrb[22].mxu0 }
 0x13a   : > { %v715_v37 = vpop.f32.mrb[23].mxu0 }
 0x13d   : > { %v6773_v30 = vpop.f32.mrb[24].mxu0 }
 0x13e   : > { %v720_v26 = vpop.f32.mrb[25].mxu0 }
 0x141   : > { %v723_v37 = vpop.f32.mrb[26].mxu0 }
 0x142   : > { %v725_v17 = vpop.f32.mrb[27].mxu0 }
 0x145   : > { %v6778_v23 = vpop.f32.mrb[28].mxu0 }
 0x146   : > { %v730_v22 = vpop.f32.mrb[29].mxu0 }
 0x149   : > { %v733_v21 = vpop.f32.mrb[30].mxu0 }
 0x14a   : > { %v735_v20 = vpop.f32.mrb[31].mxu0 }
 0x14d   : > { %v6780_v19 = vpop.f32.mrb[32].mxu0 }
 0x14e   : > { %v740_v24 = vpop.f32.mrb[33].mxu0 }
 0x151   : > { %v6782_v40 = vpop.f32.mrb[34].mxu0 }
 0x152   : > { %v745_v18 = vpop.f32.mrb[35].mxu0 }
 0x155   : > { %v6784_v16 = vpop.f32.mrb[36].mxu0 }
 0x156   : > { %v750_v26 = vpop.f32.mrb[37].mxu0 }
 0x159   : > { %v6786_v15 = vpop.f32.mrb[38].mxu0 }
 0x15a   : > { %v755_v32 = vpop.f32.mrb[39].mxu0 }
 0x15d   : > { %v6788_v14 = vpop.f32.mrb[40].mxu0 }
 0x15e   : > { %v760_v17 = vpop.f32.mrb[41].mxu0 }
 0x161   : > { %v6790_v13 = vpop.f32.mrb[42].mxu0 }
 0x162   : > { %v765_v22 = vpop.f32.mrb[43].mxu0 }
 0x165   : > { %v6792_v12 = vpop.f32.mrb[44].mxu0 }
 0x166   : > { %v770_v20 = vpop.f32.mrb[45].mxu0 }
 0x169   : > { %v6794_v11 = vpop.f32.mrb[46].mxu0 }
 0x16a   : > { %v775_v24 = vpop.f32.mrb[47].mxu0 }
 0x1cb   : > { %v5185_v10 = vpop.f32.mrb[6].mxu1 }
 0x1cc   : > { %v1150_v18 = vmul.f32 %v5185_v10, %v6700_v31  ;;  %v1030_v9 = vpop.f32.mrb[7].mxu1 }
 0x1cd   : > { %v1149_v26 = vmul.f32 %v1030_v9, %v6688_v3 }
 0x1cf   : > { %v5188_v32 = vpop.f32.mrb[8].mxu1  ;;  %5235 = vmatprep.mubr.msk.f32.mxu1 %vm1173_vm3, %v1149_v26 }
 0x1d0   : > { %v1152_v17 = vmul.f32 %v5188_v32, %v6724_v2  ;;  %v1040_v8 = vpop.f32.mrb[9].mxu1  ;;  %5236 = vmatmul.mubr.msk.f32.vlgmr.msra.gmra.mrb[30].mxu1 %vm1173_vm3, %v1150_v18 }
 0x1d1   : > { %v1151_v22 = vmul.f32 %v1040_v8, %v6712_v39 }
 0x1d3   : > { %v5191_v20 = vpop.f32.mrb[10].mxu1  ;;  %5238 = vmatprep.mubr.msk.f32.mxu1 %vm1173_vm3, %v1151_v22 }
 0x1d4   : > { %v1154_v24 = vmul.f32 %v5191_v20, %v683_v35  ;;  %v1050_v7 = vpop.f32.mrb[11].mxu1  ;;  %5239 = vmatmul.mubr.msk.f32.gmra.mrb[32].mxu1 %vm1173_vm3, %v1152_v17 }
 0x1d5   : > { %v1153_v10 = vmul.f32 %v1050_v7, %v6736_v34 }
 0x1d7   : > { %v5194_v3 = vpop.f32.mrb[12].mxu1  ;;  %5241 = vmatprep.mubr.msk.f32.mxu1 %vm1173_vm3, %v1153_v10 }
 0x1d8   : > { %v1156_v9 = vmul.f32 %v5194_v3, %v693_v36  ;;  %v1060_v31 = vpop.f32.mrb[13].mxu1  ;;  %5242 = vmatmul.mubr.msk.f32.gmra.mrb[34].mxu1 %vm1173_vm3, %v1154_v24 }
 0x1d9   : > { %v1155_v2 = vmul.f32 %v1060_v31, %v6755_v29 }
 0x1db   : > { %v5197_v18 = vpop.f32.mrb[14].mxu1  ;;  %5244 = vmatprep.mubr.msk.f32.mxu1 %vm1173_vm3, %v1155_v2 }
 0x1dc   : > { %v1158_v39 = vmul.f32 %v5197_v18, %v703_v27  ;;  %v1070_v8 = vpop.f32.mrb[15].mxu1  ;;  %5245 = vmatmul.mubr.msk.f32.gmra.mrb[36].mxu1 %vm1173_vm3, %v1156_v9 }
 0x1dd   : > { %v1157_v35 = vmul.f32 %v1070_v8, %v6759_v28 }
 0x1df   : > { %v5200_v26 = vpop.f32.mrb[16].mxu1  ;;  %5247 = vmatprep.mubr.msk.f32.mxu1 %vm1173_vm3, %v1157_v35 }
 0x1e0   : > { %v1160_v7 = vmul.f32 %v5200_v26, %v6763_v25  ;;  %v1080_v34 = vpop.f32.mrb[17].mxu1  ;;  %5248 = vmatmul.mubr.msk.f32.gmra.mrb[38].mxu1 %vm1173_vm3, %v1158_v39 }
 0x1e1   : > { %v1159_v36 = vmul.f32 %v1080_v34, %v6761_v33 }
 0x1e3   : > { %v5203_v29 = vpop.f32.mrb[18].mxu1  ;;  %5250 = vmatprep.mubr.msk.f32.mxu1 %vm1173_vm3, %v1159_v36 }
 0x1e4   : > { %v1162_v32 = vmul.f32 %v5203_v29, %v723_v37  ;;  %v1090_v27 = vpop.f32.mrb[19].mxu1  ;;  %5251 = vmatmul.mubr.msk.f32.gmra.mrb[40].mxu1 %vm1173_vm3, %v1160_v7 }
 0x1e5   : > { %v1161_v17 = vmul.f32 %v1090_v27, %v6773_v30 }
 0x1e7   : > { %v5206_v28 = vpop.f32.mrb[20].mxu1  ;;  %5253 = vmatprep.mubr.msk.f32.mxu1 %vm1173_vm3, %v1161_v17 }
 0x1e8   : > { %v1164_v22 = vmul.f32 %v5206_v28, %v733_v21  ;;  %v1100_v20 = vpop.f32.mrb[21].mxu1  ;;  %5254 = vmatmul.mubr.msk.f32.gmra.mrb[42].mxu1 %vm1173_vm3, %v1162_v32 }
 0x1e9   : > { %v1163_v25 = vmul.f32 %v1100_v20, %v6778_v23 }
 0x1eb   : > { %v5209_v24 = vpop.f32.mrb[22].mxu1  ;;  %5256 = vmatprep.mubr.msk.f32.mxu1 %vm1173_vm3, %v1163_v25 }
 0x1ec   : > { %v1166_v33 = vmul.f32 %v5209_v24, %v6782_v40  ;;  %v1110_v37 = vpop.f32.mrb[23].mxu1  ;;  %5257 = vmatmul.mubr.msk.f32.gmra.mrb[44].mxu1 %vm1173_vm3, %v1164_v22 }
 0x1ed   : > { %v1165_v10 = vmul.f32 %v1110_v37, %v6780_v19 }
 0x1ef   : > { %v5212_v30 = vpop.f32.mrb[24].mxu1  ;;  %5259 = vmatprep.mubr.msk.f32.mxu1 %vm1173_vm3, %v1165_v10 }
 0x1f0   : > { %v1168_v21 = vmul.f32 %v5212_v30, %v6786_v15  ;;  %v1120_v3 = vpop.f32.mrb[25].mxu1  ;;  %5260 = vmatmul.mubr.msk.f32.gmra.mrb[46].mxu1 %vm1173_vm3, %v1166_v33 }
 0x1f1   : > { %v1167_v23 = vmul.f32 %v1120_v3, %v6784_v16 }
 0x1f3   : > { %v5215_v9 = vpop.f32.mrb[26].mxu1  ;;  %5262 = vmatprep.mubr.msk.f32.mxu1 %vm1173_vm3, %v1167_v23 }
 0x1f4   : > { %v1170_v40 = vmul.f32 %v5215_v9, %v6790_v13  ;;  %v1130_v31 = vpop.f32.mrb[27].mxu1  ;;  %5263 = vmatmul.mubr.msk.f32.gmra.mrb[48].mxu1 %vm1173_vm3, %v1168_v21  ;;  %v6846_v13 = vld [vmem:[%s6843_s16 + $0x8] sm:$0xff] }
 0x1f5   : > { %v1169_v19 = vmul.f32 %v1130_v31, %v6788_v14 }
 0x1f7   : > { %v5218_v2 = vpop.f32.mrb[28].mxu1  ;;  %5265 = vmatprep.mubr.msk.f32.mxu1 %vm1173_vm3, %v1169_v19 }
 0x1f8   : > { %v1172_v15 = vmul.f32 %v5218_v2, %v6794_v11  ;;  %v1140_v18 = vpop.f32.mrb[29].mxu1  ;;  %5266 = vmatmul.mubr.msk.f32.gmra.mrb[50].mxu1 %vm1173_vm3, %v1170_v40 }
 0x1f9   : > { %v1171_v16 = vmul.f32 %v1140_v18, %v6792_v12 }
 0x1fb   : > { %5268 = vmatprep.mubr.msk.f32.mxu1 %vm1173_vm3, %v1171_v16 }
 0x1fc   : > { %5269 = vmatmul.mubr.msk.f32.gmra.mrb[52].mxu1 %vm1173_vm3, %v1172_v15 }
 0x1fd   : > { %4543 = vmatprep.mubr.msk.f32.mxu1 %vm1173_vm3, %v6846_v13 }
 0x2a3   : > { %v5237_v11 = vpop.f32.mrb[30].mxu1 }
 0x2a4   : > { %v1312_v14 = vpop.f32.mrb[31].mxu1 }
 0x2a5   : > { %v5663_v39 = vpack.c.bf16 %v5237_v11, %v1312_v14 }
 0x2a7   : > { %v5240_v12 = vpop.f32.mrb[32].mxu1  ;;  %5664 = vmatpush1.bf16.msra.mxu1 %v5663_v39  ;;  %v6862_v39 = vld [vmem:[%s6843_s16] sm:$0xff] }
 0x2a8   : > { %v1322_v8 = vpop.f32.mrb[33].mxu1  ;;  %5665 = vmatprep.subr.bf16.mxu1 %v8456_v38 }
 0x2a9   : > { %v5666_v35 = vpack.c.bf16 %v5240_v12, %v1322_v8  ;;  %v6865_v12 = vld [vmem:[%s6843_s16 + $0x18] sm:$0xff]  ;;  %v6872_v8 = vld [vmem:[%s6843_s16 + $0x10] sm:$0xff] }
 0x2ab   : > { %v5243_v26 = vpop.f32.mrb[34].mxu1  ;;  %5667 = vmatpush1.bf16.msra.mxu1 %v5666_v35  ;;  %v6876_v35 = vld [vmem:[%s6843_s16 + $0x28] sm:$0xff] }
 0x2ac   : > { %v1332_v7 = vpop.f32.mrb[35].mxu1  ;;  %5668 = vmatprep.subr.bf16.mxu1 %v8456_v38 }
 0x2ad   : > { %v5669_v34 = vpack.c.bf16 %v5243_v26, %v1332_v7  ;;  %v6882_v26 = vld [vmem:[%s6843_s16 + $0x20] sm:$0xff]  ;;  %v6885_v7 = vld [vmem:[%s6843_s16 + $0x38] sm:$0xff] }
 0x2af   : > { %v5246_v36 = vpop.f32.mrb[36].mxu1  ;;  %5670 = vmatpush1.bf16.msra.mxu1 %v5669_v34  ;;  %v6891_v34 = vld [vmem:[%s6843_s16 + $0x30] sm:$0xff] }
 0x2b0   : > { %v1342_v29 = vpop.f32.mrb[37].mxu1  ;;  %5671 = vmatprep.subr.bf16.mxu1 %v8456_v38 }
 0x2b1   : > { %v5672_v32 = vpack.c.bf16 %v5246_v36, %v1342_v29  ;;  %v6900_v36 = vld [vmem:[%s6843_s16 + $0x40] sm:$0xff]  ;;  %v6903_v29 = vld [vmem:[%s6843_s16 + $0x58] sm:$0xff] }
 0x2b3   : > { %v5249_v27 = vpop.f32.mrb[38].mxu1  ;;  %5673 = vmatpush1.bf16.msra.mxu1 %v5672_v32  ;;  %v6909_v32 = vld [vmem:[%s6843_s16 + $0x50] sm:$0xff] }
 0x2b4   : > { %v1352_v17 = vpop.f32.mrb[39].mxu1  ;;  %5674 = vmatprep.subr.bf16.mxu1 %v8456_v38 }
 0x2b5   : > { %v5675_v28 = vpack.c.bf16 %v5249_v27, %v1352_v17  ;;  %v4549_v27 = vld [vmem:[%s8298_s4 + $0xa8] sm:$0xff]  ;;  %v4550_v17 = vld [vmem:[%s8298_s4 + $0xb0] sm:$0xff] }
 0x2b7   : > { %v5252_v22 = vpop.f32.mrb[40].mxu1  ;;  %5676 = vmatpush1.bf16.msra.mxu1 %v5675_v28  ;;  %v4551_v28 = vld [vmem:[%s8298_s4 + $0xb8] sm:$0xff] }
 0x2b8   : > { %v1362_v20 = vpop.f32.mrb[41].mxu1  ;;  %5677 = vmatprep.subr.bf16.mxu1 %v8456_v38 }
 0x2b9   : > { %v5678_v25 = vpack.c.bf16 %v5252_v22, %v1362_v20  ;;  %v5699_v22 = vpack.c.bf16 %v4550_v17, %v4549_v27  ;;  %v4552_v20 = vld [vmem:[%s8298_s4 + $0xc0] sm:$0xff]  ;;  %v4565_v27 = vld [vmem:[%s8298_s4 + $0x128] sm:$0xff]  ;;  %v4566_v17 = vld [vmem:[%s8298_s4 + $0x130] sm:$0xff] }
 0x2bb   : > { %v5255_v24 = vpop.f32.mrb[42].mxu1  ;;  %5679 = vmatpush1.bf16.msra.mxu1 %v5678_v25  ;;  %5700 = vmatpush1.bf16.msra.mxu0 %v5699_v22  ;;  %v5702_v25 = vpack.c.bf16 %v4552_v20, %v4551_v28  ;;  %v5723_v28 = vpack.c.bf16 %v4566_v17, %v4565_v27  ;;  %v4567_v22 = vld [vmem:[%s8298_s4 + $0x138] sm:$0xff]  ;;  %v4568_v20 = vld [vmem:[%s8298_s4 + $0x140] sm:$0xff] }
 0x2bc   : > { %v1372_v33 = vpop.f32.mrb[43].mxu1  ;;  %5680 = vmatprep.subr.bf16.mxu1 %v8456_v38  ;;  %5701 = vmatprep.subr.bf16.mxu0 %v8456_v38 }
 0x2bd   : > { %v5681_v37 = vpack.c.bf16 %v5255_v24, %v1372_v33  ;;  %v4553_v24 = vld [vmem:[%s8298_s4 + $0xc8] sm:$0xff]  ;;  %v4554_v33 = vld [vmem:[%s8298_s4 + $0xd0] sm:$0xff] }
 0x2bf   : > { %v5258_v10 = vpop.f32.mrb[44].mxu1  ;;  %5682 = vmatpush1.bf16.msra.mxu1 %v5681_v37  ;;  %5703 = vmatpush1.bf16.msra.mxu0 %v5702_v25  ;;  %v5705_v37 = vpack.c.bf16 %v4554_v33, %v4553_v24  ;;  %v5726_v25 = vpack.c.bf16 %v4568_v20, %v4567_v22  ;;  %v8457_v24 = vmov 0.0   ;;  %v4569_v33 = vld [vmem:[%s8298_s4 + $0x148] sm:$0xff]  ;;  %v8461_v20 = vld [vmem:[#allocation5_spill] sm:$0xff] }
 0x2c0   : > { %v1382_v30 = vpop.f32.mrb[45].mxu1  ;;  %5683 = vmatprep.subr.bf16.mxu1 %v8456_v38  ;;  %5704 = vmatprep.subr.bf16.mxu0 %v8456_v38 }
 0x2c1   : > { %v5684_v21 = vpack.c.bf16 %v5258_v10, %v1382_v30  ;;  %v4555_v10 = vld [vmem:[%s8298_s4 + $0xd8] sm:$0xff]  ;;  %v4556_v30 = vld [vmem:[%s8298_s4 + $0xe0] sm:$0xff] }
 0x2c3   : > { %v5261_v3 = vpop.f32.mrb[46].mxu1  ;;  %5685 = vmatpush1.bf16.msra.mxu1 %v5684_v21  ;;  %5706 = vmatpush1.bf16.msra.mxu0 %v5705_v37  ;;  %v5708_v21 = vpack.c.bf16 %v4556_v30, %v4555_v10  ;;  %v1435_v30 = vld [vmem:[%s8299_s5 + $0x20] sm:$0xff] }
 0x2c4   : > { %v1392_v23 = vpop.f32.mrb[47].mxu1  ;;  %5686 = vmatprep.subr.bf16.mxu1 %v8456_v38  ;;  %5707 = vmatprep.subr.bf16.mxu0 %v8456_v38 }
 0x2c5   : > { %v5687_v9 = vpack.c.bf16 %v5261_v3, %v1392_v23  ;;  %v4557_v3 = vld [vmem:[%s8298_s4 + $0xe8] sm:$0xff]  ;;  %v4558_v23 = vld [vmem:[%s8298_s4 + $0xf0] sm:$0xff] }
 0x2c7   : > { %v5264_v40 = vpop.f32.mrb[48].mxu1  ;;  %5688 = vmatpush1.bf16.msra.mxu1 %v5687_v9  ;;  %5709 = vmatpush1.bf16.msra.mxu0 %v5708_v21  ;;  %v5711_v9 = vpack.c.bf16 %v4558_v23, %v4557_v3 }
 0x2c8   : > { %v1402_v31 = vpop.f32.mrb[49].mxu1  ;;  %5689 = vmatprep.subr.bf16.mxu1 %v8456_v38  ;;  %5710 = vmatprep.subr.bf16.mxu0 %v8456_v38 }
 0x2c9   : > { %v5690_v19 = vpack.c.bf16 %v5264_v40, %v1402_v31  ;;  %v4559_v40 = vld [vmem:[%s8298_s4 + $0xf8] sm:$0xff]  ;;  %v4560_v31 = vld [vmem:[%s8298_s4 + $0x100] sm:$0xff] }
 0x2cb   : > { %v5267_v2 = vpop.f32.mrb[50].mxu1  ;;  %5691 = vmatpush1.bf16.msra.mxu1 %v5690_v19  ;;  %5712 = vmatpush1.bf16.msra.mxu0 %v5711_v9  ;;  %v5714_v19 = vpack.c.bf16 %v4560_v31, %v4559_v40 }
 0x2cc   : > { %v1412_v15 = vpop.f32.mrb[51].mxu1  ;;  %5692 = vmatprep.subr.bf16.mxu1 %v8456_v38  ;;  %5713 = vmatprep.subr.bf16.mxu0 %v8456_v38 }
 0x2cd   : > { %v5693_v18 = vpack.c.bf16 %v5267_v2, %v1412_v15  ;;  %v4561_v2 = vld [vmem:[%s8298_s4 + $0x108] sm:$0xff]  ;;  %v4562_v15 = vld [vmem:[%s8298_s4 + $0x110] sm:$0xff] }
 0x2cf   : > { %v5270_v16 = vpop.f32.mrb[52].mxu1  ;;  %5694 = vmatpush1.bf16.msra.mxu1 %v5693_v18  ;;  %5715 = vmatpush1.bf16.msra.mxu0 %v5714_v19  ;;  %v5717_v18 = vpack.c.bf16 %v4562_v15, %v4561_v2 }
 0x2d0   : > { %v1422_v11 = vpop.f32.mrb[53].mxu1  ;;  %5695 = vmatprep.subr.bf16.mxu1 %v8456_v38  ;;  %5716 = vmatprep.subr.bf16.mxu0 %v8456_v38 }
 0x2d1   : > { %v5696_v14 = vpack.c.bf16 %v5270_v16, %v1422_v11  ;;  %v4563_v16 = vld [vmem:[%s8298_s4 + $0x118] sm:$0xff]  ;;  %v4564_v11 = vld [vmem:[%s8298_s4 + $0x120] sm:$0xff] }
 0x2d3   : > { %5697 = vmatpush1.bf16.msra.mxu1 %v5696_v14  ;;  %5718 = vmatpush1.bf16.msra.mxu0 %v5717_v18  ;;  %v5720_v14 = vpack.c.bf16 %v4564_v11, %v4563_v16 }
 0x2d4   : > { %5271 = vmatprep.subr.mxu1 %v6277_v0  ;;  %5719 = vmatprep.subr.bf16.mxu0 %v8456_v38 }
 0x2d6   : > { %1520 = vmatmul.mubr.f32.vlgmr.msra.gmra.mrb[54].mxu1 %v6862_v39 }
 0x2d7   : > { %4544 = vmatprep.mubr.msk.f32.mxu1 %vm1173_vm3, %v6865_v12  ;;  %5272 = vmatpush3.msra.mxu1 %v6277_v0  ;;  %v6894_v0 = vld [vmem:[%s6843_s16 + $0x48] sm:$0xff] }
 0x2d8   : > { %5721 = vmatpush1.bf16.msra.mxu0 %v5720_v14 }
 0x2d9   : > { %5722 = vmatprep.subr.bf16.mxu0 %v8456_v38 }
 0x2da   : > { %1525 = vmatmul.mubr.f32.gmra.mrb[56].mxu1 %v6872_v8 }
 0x2db   : > { %4545 = vmatprep.mubr.msk.f32.mxu1 %vm1173_vm3, %v6876_v35 }
 0x2dc   : > { %5724 = vmatpush1.bf16.msra.mxu0 %v5723_v28  ;;  %v8460_v28 = vld [vmem:[#allocation4_spill] sm:$0xff] }
 0x2dd   : > { %5725 = vmatprep.subr.bf16.mxu0 %v8456_v38 }
 0x2de   : > { %1530 = vmatmul.mubr.f32.gmra.mrb[58].mxu1 %v6882_v26 }
 0x2df   : > { %4546 = vmatprep.mubr.msk.f32.mxu1 %vm1173_vm3, %v6885_v7 }
 0x2e0   : > { %5727 = vmatpush1.bf16.msra.mxu0 %v5726_v25 }
 0x2e1   : > { %1648 = vmatprep.subr.mxu0 %v8457_v24 }
 0x2e2   : > { %1535 = vmatmul.mubr.f32.gmra.mrb[60].mxu1 %v6891_v34 }
 0x2e3   : > { %4547 = vmatprep.mubr.msk.f32.mxu1 %vm1173_vm3, %v6894_v0 }
 0x2e4   : > { %1649 = vmatpush1.msra.mxu0 %v4569_v33 }
 0x2e5   : > { %1673 = vmatmul.mubr.f32.vlgmr.msra.gmra.mrb[48].mxu0 %v6381_v41  ;;  %5756 = vmatprep.subr.bf16.mxu0 %v8456_v38  ;;  %v1431_v41 = vld [vmem:[%s8299_s5] sm:$0xff] }
 0x2e6   : > { %1540 = vmatmul.mubr.f32.gmra.mrb[62].mxu1 %v6900_v36  ;;  %4571 = vmatprep.mubr.msk.f32.mxu0 %vm519_vm1, %v6384_v42 }
 0x2e7   : > { %4548 = vmatprep.mubr.msk.f32.mxu1 %vm1173_vm3, %v6903_v29 }
 0x2e9   : > { %1678 = vmatmul.mubr.f32.gmra.mrb[50].mxu0 %v6391_v43 }
 0x2ea   : > { %1545 = vmatmul.mubr.f32.gmra.mrb[64].mxu1 %v6909_v32  ;;  %4572 = vmatprep.mubr.msk.f32.mxu0 %vm519_vm1, %v6394_v44 }
 0x2ed   : > { %1683 = vmatmul.mubr.f32.gmra.mrb[52].mxu0 %v6400_v45  ;;  %v1432_v45 = vld [vmem:[%s8299_s5 + $0x8] sm:$0xff] }
 0x2ee   : > { %4573 = vmatprep.mubr.msk.f32.mxu0 %vm519_vm1, %v6403_v46 }
 0x2f1   : > { %1688 = vmatmul.mubr.f32.gmra.mrb[54].mxu0 %v6409_v47 }
 0x2f2   : > { %4574 = vmatprep.mubr.msk.f32.mxu0 %vm519_vm1, %v6412_v48 }
 0x2f5   : > { %1693 = vmatmul.mubr.f32.gmra.mrb[56].mxu0 %v6418_v49 }
 0x2f6   : > { %4575 = vmatprep.mubr.msk.f32.mxu0 %vm519_vm1, %v6421_v50 }
 0x2f9   : > { %1698 = vmatmul.mubr.f32.gmra.mrb[58].mxu0 %v6427_v51  ;;  %v1433_v51 = vld [vmem:[%s8299_s5 + $0x10] sm:$0xff] }
 0x2fa   : > { %4576 = vmatprep.mubr.msk.f32.mxu0 %vm519_vm1, %v6430_v52 }
 0x2fd   : > { %1703 = vmatmul.mubr.f32.gmra.mrb[60].mxu0 %v6436_v53 }
 0x2fe   : > { %4577 = vmatprep.mubr.msk.f32.mxu0 %vm519_vm1, %v6439_v54 }
 0x301   : > { %1708 = vmatmul.mubr.f32.gmra.mrb[62].mxu0 %v6445_v55 }
 0x302   : > { %4578 = vmatprep.mubr.msk.f32.mxu0 %vm519_vm1, %v6448_v56 }
 0x305   : > { %1713 = vmatmul.mubr.f32.gmra.mrb[64].mxu0 %v6454_v57  ;;  %v1434_v57 = vld [vmem:[%s8299_s5 + $0x18] sm:$0xff] }
 0x306   : > { %4579 = vmatprep.mubr.msk.f32.mxu0 %vm519_vm1, %v6458_v58 }
 0x309   : > { %1718 = vmatmul.mubr.f32.gmra.mrb[66].mxu0 %v6461_v59 }
 0x30a   : > { %4580 = vmatprep.mubr.msk.f32.mxu0 %vm519_vm1, %v6468_v60 }
 0x30d   : > { %1723 = vmatmul.mubr.f32.gmra.mrb[68].mxu0 %v6471_v61 }
 0x30e   : > { %4581 = vmatprep.mubr.msk.f32.mxu0 %vm519_vm1, %v6482_v62 }
 0x311   : > { %1728 = vmatmul.mubr.f32.gmra.mrb[70].mxu0 %v6485_v63  ;;  %v1436_v63 = vld [vmem:[%s8299_s5 + $0x28] sm:$0xff] }
 0x312   : > { %4582 = vmatprep.mubr.msk.f32.mxu0 %vm519_vm1, %v6491_v1 }
 0x315   : > { %1733 = vmatmul.mubr.f32.gmra.mrb[72].mxu0 %v6495_v4  ;;  %v8458_v4 = vld [vmem:[#allocation2_spill] sm:$0xff] }
 0x316   : > { %4583 = vmatprep.mubr.msk.f32.mxu0 %vm519_vm1, %v6502_v5  ;;  %v8459_v5 = vld [vmem:[#allocation3_spill] sm:$0xff] }
 0x319   : > { %1738 = vmatmul.mubr.f32.gmra.mrb[74].mxu0 %v6507_v6  ;;  %v7052_v6 = vld [vmem:[%s8302_s8] sm:$0xff] }
 0x31a   : > { %4584 = vmatprep.mubr.msk.f32.mxu0 %vm519_vm1, %v8458_v4 }
 0x31d   : > { %1743 = vmatmul.mubr.f32.gmra.mrb[76].mxu0 %v8459_v5 }
 0x31e   : > { %4585 = vmatprep.mubr.msk.f32.mxu0 %vm519_vm1, %v8460_v28 }
 0x321   : > { %1748 = vmatmul.mubr.f32.gmra.mrb[78].mxu0 %v8461_v20 }
 0x3a9   : > { %v1521_v42 = vpop.f32.mrb[54].mxu1 }
 0x3aa   : > { %v1522_v43 = vadd.f32 %v1521_v42, %v1431_v41  ;;  %v1523_v44 = vpop.f32.mrb[55].mxu1  ;;  %v8462_v41 = vld [vmem:[#allocation6_spill] sm:$0xff] }
 0x3ab   : > { %4586 = vmatprep.mubr.msk.f32.mxu0 %vm519_vm1, %v8462_v41 }
 0x3ac   : > { %v1550_v46 = vsub.f32 0.0, %v1522_v43  ;;  %v7061_v43 = vld [vmem:[%s8302_s8 + $0x8] sm:$0xff] }
 0x3ad   : > { %v1526_v47 = vpop.f32.mrb[56].mxu1 }
 0x3ae   : > { %v1556_v48 = vmul.f32 1.442695, %v1550_v46  ;;  %v1527_v49 = vadd.f32 %v1526_v47, %v1432_v45  ;;  %v1528_v50 = vpop.f32.mrb[57].mxu1  ;;  %v8463_v45 = vld [vmem:[#allocation7_spill] sm:$0xff] }
 0x3af   : > { %1753 = vmatmul.mubr.f32.gmra.mrb[80].mxu0 %v8463_v45  ;;  %v7071_v50 = vld [vmem:[%s8302_s8 + $0x10] sm:$0xff] }
 0x3b0   : > { %6018 = vpow2.f32 %v1556_v48  ;;  %v1551_v52 = vsub.f32 0.0, %v1527_v49  ;;  %v8464_v48 = vld [vmem:[#allocation8_spill] sm:$0xff] }
 0x3b1   : > { %v1531_v53 = vpop.f32.mrb[58].mxu1  ;;  %4587 = vmatprep.mubr.msk.f32.mxu0 %vm519_vm1, %v8464_v48 }
 0x3b2   : > { %v1558_v54 = vmul.f32 1.442695, %v1551_v52  ;;  %v1532_v55 = vadd.f32 %v1531_v53, %v1433_v51  ;;  %v1533_v56 = vpop.f32.mrb[59].mxu1  ;;  %v8465_v52 = vld [vmem:[#allocation9_spill] sm:$0xff] }
 0x3b3   : > { %1758 = vmatmul.mubr.f32.gmra.mrb[82].mxu0 %v8465_v52 }
 0x3b4   : > { %6020 = vpow2.f32 %v1558_v54  ;;  %v1552_v58 = vsub.f32 0.0, %v1532_v55  ;;  %v8466_v55 = vld [vmem:[#allocation10_spill] sm:$0xff] }
 0x3b5   : > { %v1536_v59 = vpop.f32.mrb[60].mxu1  ;;  %4588 = vmatprep.mubr.msk.f32.mxu0 %vm519_vm1, %v8466_v55 }
 0x3b6   : > { %v1560_v37 = vmul.f32 1.442695, %v1552_v58  ;;  %v1537_v60 = vadd.f32 %v1536_v59, %v1434_v57  ;;  %v1538_v10 = vpop.f32.mrb[61].mxu1  ;;  %v7081_v57 = vld [vmem:[%s8302_s8 + $0x18] sm:$0xff]  ;;  %v8467_v58 = vld [vmem:[#allocation11_spill] sm:$0xff] }
 0x3b7   : > { %1763 = vmatmul.mubr.f32.gmra.mrb[84].mxu0 %v8467_v58  ;;  %v7091_v10 = vld [vmem:[%s8302_s8 + $0x20] sm:$0xff] }
 0x3b8   : > { %6022 = vpow2.f32 %v1560_v37  ;;  %v1553_v61 = vsub.f32 0.0, %v1537_v60  ;;  %v8468_v37 = vld [vmem:[#allocation12_spill] sm:$0xff] }
 0x3b9   : > { %v1541_v21 = vpop.f32.mrb[62].mxu1  ;;  %4589 = vmatprep.mubr.msk.f32.mxu0 %vm519_vm1, %v8468_v37 }
 0x3ba   : > { %v6019_v3 = vpop.eup %6018  ;;  %v1562_v62 = vmul.f32 1.442695, %v1553_v61  ;;  %v1542_v23 = vadd.f32 %v1541_v21, %v1435_v30  ;;  %v1543_v9 = vpop.f32.mrb[63].mxu1  ;;  %v8469_v30 = vld [vmem:[#allocation13_spill] sm:$0xff]  ;;  %v8470_v21 = vld [vmem:[#allocation14_spill] sm:$0xff] }
 0x3bb   : > { %v1568_v40 = vadd.f32 1.0, %v6019_v3  ;;  %1768 = vmatmul.mubr.f32.gmra.mrb[86].mxu0 %v8469_v30 }
 0x3bc   : > { %6024 = vpow2.f32 %v1562_v62  ;;  %v1554_v31 = vsub.f32 0.0, %v1542_v23  ;;  %4590 = vmatprep.mubr.msk.f32.mxu0 %vm519_vm1, %v8470_v21  ;;  %v7101_v62 = vld [vmem:[%s8302_s8 + $0x28] sm:$0xff]  ;;  %v8478_v21 = vld [vmem:[#allocation22_spill] sm:$0xff] }
 0x3bd   : > { %6026 = vrcp.f32 %v1568_v40  ;;  %v1546_v1 = vpop.f32.mrb[64].mxu1  ;;  %v8471_v23 = vld [vmem:[#allocation15_spill] sm:$0xff]  ;;  %v8472_v40 = vld [vmem:[#allocation16_spill] sm:$0xff] }
 0x3be   : > { %v6021_v19 = vpop.eup %6020  ;;  %v1564_v2 = vmul.f32 1.442695, %v1554_v31  ;;  %v1547_v15 = vadd.f32 %v1546_v1, %v1436_v63  ;;  %v1548_v18 = vpop.f32.mrb[65].mxu1  ;;  %v8473_v31 = vld [vmem:[#allocation17_spill] sm:$0xff]  ;;  %v7111_v1 = vld [vmem:[%s6479_s12] sm:$0xff] }
 0x3bf   : > { %v1569_v16 = vadd.f32 1.0, %v6021_v19  ;;  %1773 = vmatmul.mubr.f32.gmra.mrb[88].mxu0 %v8471_v23  ;;  %v8474_v19 = vld [vmem:[#allocation18_spill] sm:$0xff]  ;;  %v8477_v18 = vld [vmem:[#allocation21_spill] sm:$0xff]  ;;  %v8480_v23 = vld [vmem:[#allocation24_spill] sm:$0xff] }
 0x3c0   : > { %6028 = vpow2.f32 %v1564_v2  ;;  %v1555_v11 = vsub.f32 0.0, %v1547_v15  ;;  %4591 = vmatprep.mubr.msk.f32.mxu0 %vm519_vm1, %v8472_v40  ;;  %v8475_v2 = vld [vmem:[#allocation19_spill] sm:$0xff]  ;;  %v8476_v15 = vld [vmem:[#allocation20_spill] sm:$0xff]  ;;  %v8482_v40 = vld [vmem:[#allocation26_spill] sm:$0xff] }
 0x3c1   : > { %6030 = vrcp.f32 %v1569_v16  ;;  %v7123_v16 = vpop.f32.mrb[48].mxu0 }
 0x3c2   : > { %v6023_v14 = vpop.eup %6022  ;;  %v1566_v27 = vmul.f32 1.442695, %v1555_v11  ;;  %v1676_v4 = vpop.f32.mrb[49].mxu0 }
 0x3c3   : > { %v1570_v17 = vadd.f32 1.0, %v6023_v14  ;;  %1778 = vmatmul.mubr.f32.gmra.mrb[90].mxu0 %v8473_v31  ;;  %v7125_v11 = vpop.f32.mrb[50].mxu0  ;;  %v8484_v31 = vld [vmem:[#allocation28_spill] sm:$0xff] }
 0x3c4   : > { %6032 = vpow2.f32 %v1566_v27  ;;  %4592 = vmatprep.mubr.msk.f32.mxu0 %vm519_vm1, %v8474_v19  ;;  %v1681_v14 = vpop.f32.mrb[51].mxu0  ;;  %v8485_v19 = vld [vmem:[#allocation29_spill] sm:$0xff]  ;;  %v8489_v4 = vld [vmem:[#allocation32_spill] sm:$0xff] }
 0x3c5   : > { %6034 = vrcp.f32 %v1570_v17  ;;  %v7127_v27 = vpop.f32.mrb[52].mxu0  ;;  %v8490_v14 = vld [vmem:[#allocation33_spill] sm:$0xff] }
 0x3c6   : > { %v6025_v22 = vpop.eup %6024  ;;  %v1686_v5 = vpop.f32.mrb[53].mxu0 }
 0x3c7   : > { %v6027_v25 = vpop.eup %6026  ;;  %v1571_v33 = vadd.f32 1.0, %v6025_v22  ;;  %1783 = vmatmul.mubr.f32.gmra.mrb[92].mxu0 %v8475_v2  ;;  %v7129_v17 = vpop.f32.mrb[54].mxu0  ;;  %v8486_v2 = vld [vmem:[#allocation30_spill] sm:$0xff] }
 0x3c8   : > { %v1580_v42 = vmul.f32 %v6027_v25, %v7052_v6  ;;  %4593 = vmatprep.mubr.msk.f32.mxu0 %vm519_vm1, %v8476_v15  ;;  %v1691_v28 = vpop.f32.mrb[55].mxu0  ;;  %v8487_v15 = vld [vmem:[#allocation48_spill] sm:$0xff]  ;;  %v8491_v5 = vld [vmem:[#allocation34_spill] sm:$0xff] }
 0x3c9   : > { %6036 = vrcp.f32 %v1571_v33  ;;  %v7131_v22 = vpop.f32.mrb[56].mxu0  ;;  %v8492_v28 = vld [vmem:[#allocation35_spill] sm:$0xff] }
 0x3ca   : > { %v6029_v44 = vpop.eup %6028  ;;  %5273 = vmatprep.mubr.msk.f32.mxu1 %vm777_vm0, %v1580_v42  ;;  %v1696_v20 = vpop.f32.mrb[57].mxu0 }
 0x3cb   : > { %v6031_v46 = vpop.eup %6030  ;;  %v1572_v47 = vadd.f32 1.0, %v6029_v44  ;;  %1788 = vmatmul.mubr.f32.gmra.mrb[94].mxu0 %v8477_v18  ;;  %v8488_v18 = vld [vmem:[#allocation31_spill] sm:$0xff]  ;;  %v8493_v20 = vld [vmem:[#allocation36_spill] sm:$0xff] }
 0x3cc   : > { %v1581_v49 = vmul.f32 %v6031_v46, %v7061_v43  ;;  %4654 = vmatprep.mubr.msk.f32.mxu0 %vm1173_vm3, %v6846_v13  ;;  %v7133_v25 = vpop.f32.mrb[58].mxu0 }
 0x3cd   : > { %6038 = vrcp.f32 %v1572_v47  ;;  %v1701_v33 = vpop.f32.mrb[59].mxu0 }
 0x3ce   : > { %v6033_v51 = vpop.eup %6032  ;;  %5274 = vmatmul.mubr.msk.f32.vlgmr.msra.gmra.mrb[66].mxu1 %vm777_vm0, %v1581_v49  ;;  %v8494_v33 = vld [vmem:[#allocation37_spill] sm:$0xff] }
 0x3cf   : > { %v6035_v53 = vpop.eup %6034  ;;  %v1573_v54 = vadd.f32 1.0, %v6033_v51 }
 0x3d0   : > { %v1582_v56 = vmul.f32 %v6035_v53, %v7071_v50  ;;  %v7135_v41 = vpop.f32.mrb[60].mxu0 }
 0x3d1   : > { %6040 = vrcp.f32 %v1573_v54  ;;  %v1706_v13 = vpop.f32.mrb[61].mxu0 }
 0x3d2   : > { %5276 = vmatprep.mubr.msk.f32.mxu1 %vm777_vm0, %v1582_v56  ;;  %v8495_v13 = vld [vmem:[#allocation38_spill] sm:$0xff] }
 0x3d3   : > { %v6037_v59 = vpop.eup %6036 }
 0x3d4   : > { %v1583_v60 = vmul.f32 %v6037_v59, %v7081_v57  ;;  %v7137_v42 = vpop.f32.mrb[62].mxu0 }
 0x3d5   : > { %v1711_v44 = vpop.f32.mrb[63].mxu0 }
 0x3d6   : > { %5277 = vmatmul.mubr.msk.f32.gmra.mrb[68].mxu1 %vm777_vm0, %v1583_v60  ;;  %v8496_v44 = vld [vmem:[#allocation39_spill] sm:$0xff] }
 0x3d7   : > { %v6039_v61 = vpop.eup %6038 }
 0x3d8   : > { %v1584_v3 = vmul.f32 %v6039_v61, %v7091_v10  ;;  %v7139_v45 = vpop.f32.mrb[64].mxu0 }
 0x3d9   : > { %v1716_v46 = vpop.f32.mrb[65].mxu0 }
 0x3da   : > { %5279 = vmatprep.mubr.msk.f32.mxu1 %vm777_vm0, %v1584_v3  ;;  %v8479_v3 = vld [vmem:[#allocation23_spill] sm:$0xff]  ;;  %v8497_v46 = vld [vmem:[#allocation40_spill] sm:$0xff] }
 0x3db   : > { %v6041_v9 = vpop.eup %6040 }
 0x3dc   : > { %v1585_v63 = vmul.f32 %v6041_v9, %v7101_v62  ;;  %v7141_v47 = vpop.f32.mrb[66].mxu0  ;;  %v8481_v9 = vld [vmem:[#allocation25_spill] sm:$0xff] }
 0x3dd   : > { %v1721_v48 = vpop.f32.mrb[67].mxu0 }
 0x3de   : > { %5280 = vmatmul.mubr.msk.f32.gmra.mrb[70].mxu1 %vm777_vm0, %v1585_v63  ;;  %v8483_v63 = vld [vmem:[#allocation27_spill] sm:$0xff]  ;;  %v8498_v48 = vld [vmem:[#allocation41_spill] sm:$0xff] }
 0x3df   : > { %5294 = vmatprep.mubr.msk.f32.mxu1 %vm891_vm2, %v7111_v1 }
 0x3e0   : > { %v7143_v49 = vpop.f32.mrb[68].mxu0 }
 0x3e1   : > { %v1726_v51 = vpop.f32.mrb[69].mxu0 }
 0x3e2   : > { %v8499_v51 = vld [vmem:[#allocation42_spill] sm:$0xff] }
 0x3e4   : > { %v7145_v52 = vpop.f32.mrb[70].mxu0 }
 0x3e5   : > { %v1731_v53 = vpop.f32.mrb[71].mxu0 }
 0x3e6   : > { %v8500_v53 = vld [vmem:[#allocation43_spill] sm:$0xff] }
 0x4a1   : > { %v5275_v54 = vpop.f32.mrb[66].mxu1 }
 0x4a2   : > { %v1877_v55 = vpop.f32.mrb[67].mxu1 }
 0x4a3   : > { %v5728_v56 = vpack.c.bf16 %v5275_v54, %v1877_v55  ;;  %v8501_v54 = vld [vmem:[#allocation44_spill] sm:$0xff]  ;;  %v8502_v55 = vld [vmem:[#allocation45_spill] sm:$0xff] }
 0x4a5   : > { %5729 = vmatprep.subr.bf16.mxu1 %v5728_v56 }
 0x4a6   : > { %5731 = vmatpush3.bf16.msra.mxu1 %v5728_v56  ;;  %v8503_v56 = vld [vmem:[#allocation46_spill] sm:$0xff] }
 0x4a9   : > { %v5278_v58 = vpop.f32.mrb[68].mxu1 }
 0x4aa   : > { %v1887_v59 = vpop.f32.mrb[69].mxu1 }
 0x4ab   : > { %v5732_v37 = vpack.c.bf16 %v5278_v58, %v1887_v59  ;;  %v8504_v58 = vld [vmem:[#allocation47_spill] sm:$0xff]  ;;  %v7202_v59 = vpop.f32.mrb[72].mxu0 }
 0x4ad   : > { %5733 = vmatprep.subr.bf16.mxu1 %v5732_v37 }
 0x4ae   : > { %5735 = vmatpush3.bf16.msra.mxu1 %v5732_v37  ;;  %v1736_v37 = vpop.f32.mrb[73].mxu0 }
 0x4b1   : > { %v5281_v60 = vpop.f32.mrb[70].mxu1 }
 0x4b2   : > { %v1897_v30 = vpop.f32.mrb[71].mxu1 }
 0x4b3   : > { %v5736_v61 = vpack.c.bf16 %v5281_v60, %v1897_v30  ;;  %v1739_v60 = vpop.f32.mrb[74].mxu0 }
 0x4b4   : > { %v1741_v30 = vpop.f32.mrb[75].mxu0 }
 0x4b5   : > { %5737 = vmatprep.subr.bf16.mxu1 %v5736_v61 }
 0x4b6   : > { %5739 = vmatpush3.bf16.msra.mxu1 %v5736_v61  ;;  %v7204_v61 = vpop.f32.mrb[76].mxu0 }
 0x4b7   : > { %5741 = vmatprep.subr.bf16.mxu1 %v8478_v21 }
 0x4b9   : > { %5295 = vmatmul.mubr.msk.f32.vlgmr.msra.gmra.mrb[72].mxu1 %vm891_vm2, %v8479_v3  ;;  %v1746_v3 = vpop.f32.mrb[77].mxu0 }
 0x4ba   : > { %5297 = vmatprep.mubr.msk.f32.mxu1 %vm891_vm2, %v8480_v23  ;;  %5743 = vmatpush3.bf16.msra.mxu1 %v8478_v21  ;;  %v1749_v23 = vpop.f32.mrb[78].mxu0 }
 0x4bb   : > { %5745 = vmatprep.subr.bf16.mxu1 %v8481_v9 }
 0x4bd   : > { %5298 = vmatmul.mubr.msk.f32.gmra.mrb[74].mxu1 %vm891_vm2, %v8482_v40  ;;  %v1751_v40 = vpop.f32.mrb[79].mxu0 }
 0x4be   : > { %5300 = vmatprep.mubr.msk.f32.mxu1 %vm891_vm2, %v8483_v63  ;;  %5747 = vmatpush3.bf16.msra.mxu1 %v8481_v9  ;;  %v7206_v63 = vpop.f32.mrb[80].mxu0 }
 0x4bf   : > { %5749 = vmatprep.subr.bf16.mxu1 %v8484_v31 }
 0x4c1   : > { %5301 = vmatmul.mubr.msk.f32.gmra.mrb[76].mxu1 %vm891_vm2, %v8485_v19  ;;  %v1756_v19 = vpop.f32.mrb[81].mxu0 }
 0x4c2   : > { %5303 = vmatprep.mubr.msk.f32.mxu1 %vm891_vm2, %v8486_v2  ;;  %5751 = vmatpush3.bf16.msra.mxu1 %v8484_v31  ;;  %v1759_v2 = vpop.f32.mrb[82].mxu0 }
 0x4c3   : > { %5753 = vmatprep.subr.bf16.mxu1 %v8487_v15 }
 0x4c5   : > { %5304 = vmatmul.mubr.msk.f32.gmra.mrb[78].mxu1 %vm891_vm2, %v8488_v18  ;;  %v1761_v18 = vpop.f32.mrb[83].mxu0 }
 0x4c6   : > { %5306 = vmatprep.mubr.msk.f32.mxu1 %vm891_vm2, %v8489_v4  ;;  %5755 = vmatpush3.bf16.msra.mxu1 %v8487_v15  ;;  %v7208_v4 = vpop.f32.mrb[84].mxu0 }
 0x4c7   : > { %5792 = vmatprep.subr.bf16.mxu1 %v8456_v38 }
 0x4c9   : > { %5307 = vmatmul.mubr.msk.f32.gmra.mrb[80].mxu1 %vm891_vm2, %v8490_v14  ;;  %v1766_v14 = vpop.f32.mrb[85].mxu0 }
 0x4ca   : > { %5309 = vmatprep.mubr.msk.f32.mxu1 %vm891_vm2, %v8491_v5  ;;  %v7210_v5 = vpop.f32.mrb[86].mxu0 }
 0x4cd   : > { %5310 = vmatmul.mubr.msk.f32.gmra.mrb[82].mxu1 %vm891_vm2, %v8492_v28  ;;  %v1771_v28 = vpop.f32.mrb[87].mxu0 }
 0x4ce   : > { %5312 = vmatprep.mubr.msk.f32.mxu1 %vm891_vm2, %v8493_v20  ;;  %v7212_v20 = vpop.f32.mrb[88].mxu0 }
 0x4d1   : > { %5313 = vmatmul.mubr.msk.f32.gmra.mrb[84].mxu1 %vm891_vm2, %v8494_v33  ;;  %v1776_v33 = vpop.f32.mrb[89].mxu0 }
 0x4d2   : > { %5315 = vmatprep.mubr.msk.f32.mxu1 %vm891_vm2, %v8495_v13  ;;  %v7214_v13 = vpop.f32.mrb[90].mxu0 }
 0x4d5   : > { %5316 = vmatmul.mubr.msk.f32.gmra.mrb[86].mxu1 %vm891_vm2, %v8496_v44  ;;  %v1781_v44 = vpop.f32.mrb[91].mxu0 }
 0x4d6   : > { %5318 = vmatprep.mubr.msk.f32.mxu1 %vm891_vm2, %v8497_v46  ;;  %v7216_v46 = vpop.f32.mrb[92].mxu0 }
 0x4d9   : > { %5319 = vmatmul.mubr.msk.f32.gmra.mrb[88].mxu1 %vm891_vm2, %v8498_v48  ;;  %v1786_v48 = vpop.f32.mrb[93].mxu0 }
 0x4da   : > { %5321 = vmatprep.mubr.msk.f32.mxu1 %vm891_vm2, %v8499_v51  ;;  %v7218_v51 = vpop.f32.mrb[94].mxu0 }
 0x4dd   : > { %5322 = vmatmul.mubr.msk.f32.gmra.mrb[90].mxu1 %vm891_vm2, %v8500_v53  ;;  %v1791_v53 = vpop.f32.mrb[95].mxu0 }
 0x4de   : > { %5324 = vmatprep.mubr.msk.f32.mxu1 %vm891_vm2, %v8501_v54 }
 0x4e1   : > { %5325 = vmatmul.mubr.msk.f32.gmra.mrb[92].mxu1 %vm891_vm2, %v8502_v55 }
 0x4e2   : > { %5327 = vmatprep.mubr.msk.f32.mxu1 %vm891_vm2, %v8503_v56 }
 0x4e5   : > { %5328 = vmatmul.mubr.msk.f32.gmra.mrb[94].mxu1 %vm891_vm2, %v8504_v58 }
 0x58c   : > { %v5296_v54 = vpop.f32.mrb[72].mxu1 }
 0x58d   : > { %v2092_v55 = vmul.f32 %v5296_v54, %v7125_v11  ;;  %v1972_v56 = vpop.f32.mrb[73].mxu1 }
 0x58e   : > { %v2091_v58 = vmul.f32 %v1972_v56, %v7123_v16 }
 0x590   : > { %v5299_v37 = vpop.f32.mrb[74].mxu1  ;;  %5346 = vmatprep.mubr.msk.f32.mxu1 %vm1173_vm3, %v2091_v58 }
 0x591   : > { %v2094_v30 = vmul.f32 %v5299_v37, %v7129_v17  ;;  %v1982_v3 = vpop.f32.mrb[75].mxu1  ;;  %5347 = vmatmul.mubr.msk.f32.vlgmr.msra.gmra.mrb[96].mxu1 %vm1173_vm3, %v2092_v55 }
 0x592   : > { %v2093_v40 = vmul.f32 %v1982_v3, %v7127_v27 }
 0x594   : > { %v5302_v19 = vpop.f32.mrb[76].mxu1  ;;  %5349 = vmatprep.mubr.msk.f32.mxu1 %vm1173_vm3, %v2093_v40 }
 0x595   : > { %v2096_v18 = vmul.f32 %v5302_v19, %v7133_v25  ;;  %v1992_v14 = vpop.f32.mrb[77].mxu1  ;;  %5350 = vmatmul.mubr.msk.f32.gmra.mrb[98].mxu1 %vm1173_vm3, %v2094_v30 }
 0x596   : > { %v2095_v16 = vmul.f32 %v1992_v14, %v7131_v22 }
 0x598   : > { %v5305_v11 = vpop.f32.mrb[78].mxu1  ;;  %5352 = vmatprep.mubr.msk.f32.mxu1 %vm1173_vm3, %v2095_v16 }
 0x599   : > { %v2098_v17 = vmul.f32 %v5305_v11, %v7137_v42  ;;  %v2002_v28 = vpop.f32.mrb[79].mxu1  ;;  %5353 = vmatmul.mubr.msk.f32.gmra.mrb[100].mxu1 %vm1173_vm3, %v2096_v18 }
 0x59a   : > { %v2097_v27 = vmul.f32 %v2002_v28, %v7135_v41 }
 0x59c   : > { %v5308_v33 = vpop.f32.mrb[80].mxu1  ;;  %5355 = vmatprep.mubr.msk.f32.mxu1 %vm1173_vm3, %v2097_v27 }
 0x59d   : > { %v2100_v25 = vmul.f32 %v5308_v33, %v7141_v47  ;;  %v2012_v44 = vpop.f32.mrb[81].mxu1  ;;  %5356 = vmatmul.mubr.msk.f32.gmra.mrb[102].mxu1 %vm1173_vm3, %v2098_v17 }
 0x59e   : > { %v2099_v22 = vmul.f32 %v2012_v44, %v7139_v45 }
 0x5a0   : > { %v5311_v48 = vpop.f32.mrb[82].mxu1  ;;  %5358 = vmatprep.mubr.msk.f32.mxu1 %vm1173_vm3, %v2099_v22 }
 0x5a1   : > { %v2102_v42 = vmul.f32 %v5311_v48, %v7145_v52  ;;  %v2022_v53 = vpop.f32.mrb[83].mxu1  ;;  %5359 = vmatmul.mubr.msk.f32.gmra.mrb[104].mxu1 %vm1173_vm3, %v2100_v25 }
 0x5a2   : > { %v2101_v41 = vmul.f32 %v2022_v53, %v7143_v49 }
 0x5a4   : > { %v5314_v54 = vpop.f32.mrb[84].mxu1  ;;  %5361 = vmatprep.mubr.msk.f32.mxu1 %vm1173_vm3, %v2101_v41 }
 0x5a5   : > { %v2104_v55 = vmul.f32 %v5314_v54, %v1739_v60  ;;  %v2032_v47 = vpop.f32.mrb[85].mxu1  ;;  %5362 = vmatmul.mubr.msk.f32.gmra.mrb[106].mxu1 %vm1173_vm3, %v2102_v42 }
 0x5a6   : > { %v2103_v56 = vmul.f32 %v2032_v47, %v7202_v59 }
 0x5a8   : > { %v5317_v45 = vpop.f32.mrb[86].mxu1  ;;  %5364 = vmatprep.mubr.msk.f32.mxu1 %vm1173_vm3, %v2103_v56 }
 0x5a9   : > { %v2106_v58 = vmul.f32 %v5317_v45, %v1749_v23  ;;  %v2042_v37 = vpop.f32.mrb[87].mxu1  ;;  %5365 = vmatmul.mubr.msk.f32.gmra.mrb[108].mxu1 %vm1173_vm3, %v2104_v55 }
 0x5aa   : > { %v2105_v52 = vmul.f32 %v2042_v37, %v7204_v61 }
 0x5ac   : > { %v5320_v30 = vpop.f32.mrb[88].mxu1  ;;  %5367 = vmatprep.mubr.msk.f32.mxu1 %vm1173_vm3, %v2105_v52 }
 0x5ad   : > { %v2108_v49 = vmul.f32 %v5320_v30, %v1759_v2  ;;  %v2052_v3 = vpop.f32.mrb[89].mxu1  ;;  %5368 = vmatmul.mubr.msk.f32.gmra.mrb[110].mxu1 %vm1173_vm3, %v2106_v58 }
 0x5ae   : > { %v2107_v60 = vmul.f32 %v2052_v3, %v7206_v63 }
 0x5b0   : > { %v5323_v40 = vpop.f32.mrb[90].mxu1  ;;  %5370 = vmatprep.mubr.msk.f32.mxu1 %vm1173_vm3, %v2107_v60 }
 0x5b1   : > { %v2110_v59 = vmul.f32 %v5323_v40, %v7210_v5  ;;  %v2062_v23 = vpop.f32.mrb[91].mxu1  ;;  %5371 = vmatmul.mubr.msk.f32.gmra.mrb[112].mxu1 %vm1173_vm3, %v2108_v49 }
 0x5b2   : > { %v2109_v61 = vmul.f32 %v2062_v23, %v7208_v4 }
 0x5b4   : > { %v5326_v19 = vpop.f32.mrb[92].mxu1  ;;  %5373 = vmatprep.mubr.msk.f32.mxu1 %vm1173_vm3, %v2109_v61 }
 0x5b5   : > { %v2112_v2 = vmul.f32 %v5326_v19, %v7214_v13  ;;  %v2072_v18 = vpop.f32.mrb[93].mxu1  ;;  %5374 = vmatmul.mubr.msk.f32.gmra.mrb[114].mxu1 %vm1173_vm3, %v2110_v59  ;;  %v7266_v13 = vld [vmem:[%s6321_s17 + $0x8] sm:$0xff] }
 0x5b6   : > { %v2111_v63 = vmul.f32 %v2072_v18, %v7212_v20 }
 0x5b8   : > { %v5329_v14 = vpop.f32.mrb[94].mxu1  ;;  %5376 = vmatprep.mubr.msk.f32.mxu1 %vm1173_vm3, %v2111_v63 }
 0x5b9   : > { %v2114_v5 = vmul.f32 %v5329_v14, %v7218_v51  ;;  %v2082_v16 = vpop.f32.mrb[95].mxu1  ;;  %5377 = vmatmul.mubr.msk.f32.gmra.mrb[116].mxu1 %vm1173_vm3, %v2112_v2 }
 0x5ba   : > { %v2113_v4 = vmul.f32 %v2082_v16, %v7216_v46 }
 0x5bc   : > { %5379 = vmatprep.mubr.msk.f32.mxu1 %vm1173_vm3, %v2113_v4  ;;  %v4668_v4 = vld [vmem:[%s8298_s4 + $0x190] sm:$0xff] }
 0x5bd   : > { %5380 = vmatmul.mubr.msk.f32.gmra.mrb[118].mxu1 %vm1173_vm3, %v2114_v5  ;;  %v7284_v5 = vld [vmem:[%s8300_s6] sm:$0xff] }
 0x5be   : > { %4681 = vmatprep.mubr.msk.f32.mxu1 %vm519_vm1, %v7266_v13 }
 0x664   : > { %v5348_v20 = vpop.f32.mrb[96].mxu1 }
 0x665   : > { %v2253_v11 = vpop.f32.mrb[97].mxu1 }
 0x666   : > { %v5757_v17 = vpack.c.bf16 %v5348_v20, %v2253_v11  ;;  %v4669_v20 = vld [vmem:[%s8298_s4 + $0x198] sm:$0xff] }
 0x667   : > { %v5805_v11 = vpack.c.bf16 %v4669_v20, %v4668_v4  ;;  %v7473_v4 = vld [vmem:[%s6321_s17 + $0xa8] sm:$0xff] }
 0x668   : > { %v5351_v28 = vpop.f32.mrb[98].mxu1  ;;  %5758 = vmatpush1.bf16.msra.mxu0 %v5757_v17  ;;  %v4670_v17 = vld [vmem:[%s8298_s4 + $0x1a0] sm:$0xff] }
 0x669   : > { %v2263_v51 = vpop.f32.mrb[99].mxu1  ;;  %5759 = vmatprep.subr.bf16.mxu0 %v8456_v38 }
 0x66a   : > { %v5760_v27 = vpack.c.bf16 %v5351_v28, %v2263_v51  ;;  %v4671_v28 = vld [vmem:[%s8298_s4 + $0x1a8] sm:$0xff] }
 0x66b   : > { %v5808_v51 = vpack.c.bf16 %v4671_v28, %v4670_v17 }
 0x66c   : > { %v5354_v33 = vpop.f32.mrb[100].mxu1  ;;  %5761 = vmatpush1.bf16.msra.mxu0 %v5760_v27  ;;  %v4672_v27 = vld [vmem:[%s8298_s4 + $0x1b0] sm:$0xff] }
 0x66d   : > { %v2273_v46 = vpop.f32.mrb[101].mxu1  ;;  %5762 = vmatprep.subr.bf16.mxu0 %v8456_v38 }
 0x66e   : > { %v5763_v25 = vpack.c.bf16 %v5354_v33, %v2273_v46  ;;  %v4673_v33 = vld [vmem:[%s8298_s4 + $0x1b8] sm:$0xff] }
 0x66f   : > { %v5811_v46 = vpack.c.bf16 %v4673_v33, %v4672_v27  ;;  %v7478_v27 = vld [vmem:[%s6321_s17 + $0xa0] sm:$0xff]  ;;  %v4651_v33 = vld [vmem:[%s8299_s5 + $0x48] sm:$0xff] }
 0x670   : > { %v5357_v44 = vpop.f32.mrb[102].mxu1  ;;  %5764 = vmatpush1.bf16.msra.mxu0 %v5763_v25  ;;  %v4674_v25 = vld [vmem:[%s8298_s4 + $0x1c0] sm:$0xff] }
 0x671   : > { %v2283_v22 = vpop.f32.mrb[103].mxu1  ;;  %5765 = vmatprep.subr.bf16.mxu0 %v8456_v38 }
 0x672   : > { %v5766_v48 = vpack.c.bf16 %v5357_v44, %v2283_v22  ;;  %v4675_v44 = vld [vmem:[%s8298_s4 + $0x1c8] sm:$0xff] }
 0x673   : > { %v5814_v22 = vpack.c.bf16 %v4675_v44, %v4674_v25 }
 0x674   : > { %v5360_v42 = vpop.f32.mrb[104].mxu1  ;;  %5767 = vmatpush1.bf16.msra.mxu0 %v5766_v48  ;;  %v4676_v48 = vld [vmem:[%s8298_s4 + $0x1d0] sm:$0xff] }
 0x675   : > { %v2293_v53 = vpop.f32.mrb[105].mxu1  ;;  %5768 = vmatprep.subr.bf16.mxu0 %v8456_v38 }
 0x676   : > { %v5769_v41 = vpack.c.bf16 %v5360_v42, %v2293_v53  ;;  %v4677_v42 = vld [vmem:[%s8298_s4 + $0x1d8] sm:$0xff] }
 0x677   : > { %v5817_v53 = vpack.c.bf16 %v4677_v42, %v4676_v48 }
 0x678   : > { %v5363_v54 = vpop.f32.mrb[106].mxu1  ;;  %5770 = vmatpush1.bf16.msra.mxu0 %v5769_v41  ;;  %v4678_v41 = vld [vmem:[%s8298_s4 + $0x1e0] sm:$0xff] }
 0x679   : > { %v2303_v55 = vpop.f32.mrb[107].mxu1  ;;  %5771 = vmatprep.subr.bf16.mxu0 %v8456_v38 }
 0x67a   : > { %v5772_v47 = vpack.c.bf16 %v5363_v54, %v2303_v55  ;;  %v4679_v54 = vld [vmem:[%s8298_s4 + $0x1e8] sm:$0xff] }
 0x67b   : > { %v5820_v55 = vpack.c.bf16 %v4679_v54, %v4678_v41  ;;  %v4652_v41 = vld [vmem:[%s8299_s5 + $0x50] sm:$0xff]  ;;  %v7497_v54 = vld [vmem:[%s6321_s17 + $0xc8] sm:$0xff] }
 0x67c   : > { %v5366_v56 = vpop.f32.mrb[108].mxu1  ;;  %5773 = vmatpush1.bf16.msra.mxu0 %v5772_v47  ;;  %v4680_v47 = vld [vmem:[%s8298_s4 + $0x1f0] sm:$0xff] }
 0x67d   : > { %v2313_v45 = vpop.f32.mrb[109].mxu1  ;;  %5774 = vmatprep.subr.bf16.mxu0 %v8456_v38 }
 0x67e   : > { %v5775_v58 = vpack.c.bf16 %v5366_v56, %v2313_v45  ;;  %v7378_v56 = vld [vmem:[%s6321_s17] sm:$0xff]  ;;  %v7383_v45 = vld [vmem:[%s6321_s17 + $0x18] sm:$0xff] }
 0x680   : > { %v5369_v37 = vpop.f32.mrb[110].mxu1  ;;  %5776 = vmatpush1.bf16.msra.mxu0 %v5775_v58  ;;  %v7388_v58 = vld [vmem:[%s6321_s17 + $0x10] sm:$0xff] }
 0x681   : > { %v2323_v52 = vpop.f32.mrb[111].mxu1  ;;  %5777 = vmatprep.subr.bf16.mxu0 %v8456_v38 }
 0x682   : > { %v5778_v30 = vpack.c.bf16 %v5369_v37, %v2323_v52  ;;  %v7392_v37 = vld [vmem:[%s6321_s17 + $0x28] sm:$0xff]  ;;  %v7397_v52 = vld [vmem:[%s6321_s17 + $0x20] sm:$0xff] }
 0x684   : > { %v5372_v49 = vpop.f32.mrb[112].mxu1  ;;  %5779 = vmatpush1.bf16.msra.mxu0 %v5778_v30  ;;  %v7401_v30 = vld [vmem:[%s6321_s17 + $0x38] sm:$0xff] }
 0x685   : > { %v2333_v3 = vpop.f32.mrb[113].mxu1  ;;  %5780 = vmatprep.subr.bf16.mxu0 %v8456_v38 }
 0x686   : > { %v5781_v60 = vpack.c.bf16 %v5372_v49, %v2333_v3  ;;  %v7406_v49 = vld [vmem:[%s6321_s17 + $0x30] sm:$0xff]  ;;  %v7410_v3 = vld [vmem:[%s6321_s17 + $0x48] sm:$0xff] }
 0x688   : > { %v5375_v40 = vpop.f32.mrb[114].mxu1  ;;  %5782 = vmatpush1.bf16.msra.mxu0 %v5781_v60  ;;  %v7415_v60 = vld [vmem:[%s6321_s17 + $0x40] sm:$0xff] }
 0x689   : > { %v2343_v59 = vpop.f32.mrb[115].mxu1  ;;  %5783 = vmatprep.subr.bf16.mxu0 %v8456_v38 }
 0x68a   : > { %v5784_v23 = vpack.c.bf16 %v5375_v40, %v2343_v59  ;;  %v7419_v40 = vld [vmem:[%s6321_s17 + $0x58] sm:$0xff]  ;;  %v7424_v59 = vld [vmem:[%s6321_s17 + $0x50] sm:$0xff] }
 0x68c   : > { %v5378_v61 = vpop.f32.mrb[116].mxu1  ;;  %5785 = vmatpush1.bf16.msra.mxu0 %v5784_v23  ;;  %v7428_v23 = vld [vmem:[%s6321_s17 + $0x68] sm:$0xff] }
 0x68d   : > { %v2353_v19 = vpop.f32.mrb[117].mxu1  ;;  %5786 = vmatprep.subr.bf16.mxu0 %v8456_v38 }
 0x68e   : > { %v5787_v2 = vpack.c.bf16 %v5378_v61, %v2353_v19  ;;  %v7433_v61 = vld [vmem:[%s6321_s17 + $0x60] sm:$0xff]  ;;  %v7437_v19 = vld [vmem:[%s6321_s17 + $0x78] sm:$0xff] }
 0x690   : > { %v5381_v18 = vpop.f32.mrb[118].mxu1  ;;  %5788 = vmatpush1.bf16.msra.mxu0 %v5787_v2  ;;  %v7442_v2 = vld [vmem:[%s6321_s17 + $0x70] sm:$0xff] }
 0x691   : > { %v2363_v63 = vpop.f32.mrb[119].mxu1  ;;  %5789 = vmatprep.subr.bf16.mxu0 %v8456_v38 }
 0x692   : > { %v5790_v14 = vpack.c.bf16 %v5381_v18, %v2363_v63  ;;  %v4648_v18 = vld [vmem:[%s8299_s5 + $0x30] sm:$0xff]  ;;  %v7449_v63 = vld [vmem:[%s6321_s17 + $0x88] sm:$0xff] }
 0x694   : > { %5791 = vmatpush1.bf16.msra.mxu0 %v5790_v14 }
 0x695   : > { %5382 = vmatprep.subr.mxu0 %v7284_v5 }
 0x697   : > { %2444 = vmatmul.mubr.f32.vlgmr.msra.gmra.mrb[96].mxu0 %v6862_v39  ;;  %v4660_v39 = vld [vmem:[%s8298_s4 + $0x150] sm:$0xff] }
 0x698   : > { %4655 = vmatprep.mubr.msk.f32.mxu0 %vm1173_vm3, %v6865_v12  ;;  %5383 = vmatpush3.msra.mxu0 %v7284_v5  ;;  %v4661_v12 = vld [vmem:[%s8298_s4 + $0x158] sm:$0xff] }
 0x69b   : > { %2449 = vmatmul.mubr.f32.gmra.mrb[98].mxu0 %v6872_v8  ;;  %v4662_v8 = vld [vmem:[%s8298_s4 + $0x160] sm:$0xff] }
 0x69c   : > { %4656 = vmatprep.mubr.msk.f32.mxu0 %vm1173_vm3, %v6876_v35  ;;  %v5793_v35 = vpack.c.bf16 %v4661_v12, %v4660_v39 }
 0x69e   : > { %5794 = vmatpush1.bf16.msra.mxu1 %v5793_v35  ;;  %v4649_v35 = vld [vmem:[%s8299_s5 + $0x38] sm:$0xff] }
 0x69f   : > { %2454 = vmatmul.mubr.f32.gmra.mrb[100].mxu0 %v6882_v26  ;;  %v4663_v26 = vld [vmem:[%s8298_s4 + $0x168] sm:$0xff]  ;;  %5795 = vmatprep.subr.bf16.mxu1 %v8456_v38 }
 0x6a0   : > { %4657 = vmatprep.mubr.msk.f32.mxu0 %vm1173_vm3, %v6885_v7  ;;  %v5796_v7 = vpack.c.bf16 %v4663_v26, %v4662_v8  ;;  %v7454_v8 = vld [vmem:[%s6321_s17 + $0x80] sm:$0xff]  ;;  %v7461_v26 = vld [vmem:[%s6321_s17 + $0x98] sm:$0xff] }
 0x6a2   : > { %5797 = vmatpush1.bf16.msra.mxu1 %v5796_v7 }
 0x6a3   : > { %2459 = vmatmul.mubr.f32.gmra.mrb[102].mxu0 %v6891_v34  ;;  %v4664_v34 = vld [vmem:[%s8298_s4 + $0x170] sm:$0xff]  ;;  %5798 = vmatprep.subr.bf16.mxu1 %v8456_v38 }
 0x6a4   : > { %4658 = vmatprep.mubr.msk.f32.mxu0 %vm1173_vm3, %v6894_v0  ;;  %v4665_v0 = vld [vmem:[%s8298_s4 + $0x178] sm:$0xff] }
 0x6a7   : > { %2464 = vmatmul.mubr.f32.gmra.mrb[104].mxu0 %v6900_v36  ;;  %v5799_v36 = vpack.c.bf16 %v4665_v0, %v4664_v34 }
 0x6a8   : > { %4659 = vmatprep.mubr.msk.f32.mxu0 %vm1173_vm3, %v6903_v29  ;;  %v4666_v29 = vld [vmem:[%s8298_s4 + $0x180] sm:$0xff] }
 0x6a9   : > { %5800 = vmatpush1.bf16.msra.mxu1 %v5799_v36 }
 0x6aa   : > { %5801 = vmatprep.subr.bf16.mxu1 %v8456_v38 }
 0x6ab   : > { %2469 = vmatmul.mubr.f32.gmra.mrb[106].mxu0 %v6909_v32  ;;  %v4667_v32 = vld [vmem:[%s8298_s4 + $0x188] sm:$0xff] }
 0x6ac   : > { %v5802_v16 = vpack.c.bf16 %v4667_v32, %v4666_v29  ;;  %v7466_v32 = vld [vmem:[%s6321_s17 + $0x90] sm:$0xff] }
 0x6ae   : > { %5803 = vmatpush1.bf16.msra.mxu1 %v5802_v16  ;;  %v4650_v16 = vld [vmem:[%s8299_s5 + $0x40] sm:$0xff] }
 0x6af   : > { %5804 = vmatprep.subr.bf16.mxu1 %v8456_v38 }
 0x6b2   : > { %5806 = vmatpush1.bf16.msra.mxu1 %v5805_v11 }
 0x6b3   : > { %5807 = vmatprep.subr.bf16.mxu1 %v8456_v38 }
 0x6b6   : > { %5809 = vmatpush1.bf16.msra.mxu1 %v5808_v51 }
 0x6b7   : > { %5810 = vmatprep.subr.bf16.mxu1 %v8456_v38 }
 0x6ba   : > { %5812 = vmatpush1.bf16.msra.mxu1 %v5811_v46  ;;  %v7485_v46 = vld [vmem:[%s6321_s17 + $0xb8] sm:$0xff] }
 0x6bb   : > { %5813 = vmatprep.subr.bf16.mxu1 %v8456_v38 }
 0x6be   : > { %5815 = vmatpush1.bf16.msra.mxu1 %v5814_v22 }
 0x6bf   : > { %5816 = vmatprep.subr.bf16.mxu1 %v8456_v38 }
 0x6c2   : > { %5818 = vmatpush1.bf16.msra.mxu1 %v5817_v53  ;;  %v7490_v53 = vld [vmem:[%s6321_s17 + $0xb0] sm:$0xff] }
 0x6c3   : > { %5819 = vmatprep.subr.bf16.mxu1 %v8456_v38 }
 0x6c6   : > { %5821 = vmatpush1.bf16.msra.mxu1 %v5820_v55 }
 0x6c7   : > { %2572 = vmatprep.subr.mxu1 %v8457_v24 }
 0x6ca   : > { %2573 = vmatpush1.msra.mxu1 %v4680_v47 }
 0x6cb   : > { %2597 = vmatmul.mubr.f32.vlgmr.msra.gmra.mrb[120].mxu1 %v7378_v56  ;;  %5850 = vmatprep.subr.bf16.mxu1 %v8456_v38 }
 0x6cc   : > { %4682 = vmatprep.mubr.msk.f32.mxu1 %vm519_vm1, %v7383_v45 }
 0x6cf   : > { %2602 = vmatmul.mubr.f32.gmra.mrb[122].mxu1 %v7388_v58 }
 0x6d0   : > { %4683 = vmatprep.mubr.msk.f32.mxu1 %vm519_vm1, %v7392_v37 }
 0x6d3   : > { %2607 = vmatmul.mubr.f32.gmra.mrb[124].mxu1 %v7397_v52 }
 0x6d4   : > { %4684 = vmatprep.mubr.msk.f32.mxu1 %vm519_vm1, %v7401_v30 }
 0x6d7   : > { %2612 = vmatmul.mubr.f32.gmra.mrb[126].mxu1 %v7406_v49 }
 0x6d8   : > { %4685 = vmatprep.mubr.msk.f32.mxu1 %vm519_vm1, %v7410_v3 }
 0x6db   : > { %2617 = vmatmul.mubr.f32.gmra.mrb[128].mxu1 %v7415_v60 }
 0x6dc   : > { %4686 = vmatprep.mubr.msk.f32.mxu1 %vm519_vm1, %v7419_v40 }
 0x6df   : > { %2622 = vmatmul.mubr.f32.gmra.mrb[130].mxu1 %v7424_v59 }
 0x6e0   : > { %4687 = vmatprep.mubr.msk.f32.mxu1 %vm519_vm1, %v7428_v23 }
 0x6e3   : > { %2627 = vmatmul.mubr.f32.gmra.mrb[132].mxu1 %v7433_v61 }
 0x6e4   : > { %4688 = vmatprep.mubr.msk.f32.mxu1 %vm519_vm1, %v7437_v19 }
 0x6e7   : > { %2632 = vmatmul.mubr.f32.gmra.mrb[134].mxu1 %v7442_v2 }
 0x6e8   : > { %4689 = vmatprep.mubr.msk.f32.mxu1 %vm519_vm1, %v7449_v63 }
 0x6eb   : > { %2637 = vmatmul.mubr.f32.gmra.mrb[136].mxu1 %v7454_v8 }
 0x6ec   : > { %4690 = vmatprep.mubr.msk.f32.mxu1 %vm519_vm1, %v7461_v26 }
 0x6ef   : > { %2642 = vmatmul.mubr.f32.gmra.mrb[138].mxu1 %v7466_v32 }
 0x6f0   : > { %4691 = vmatprep.mubr.msk.f32.mxu1 %vm519_vm1, %v7473_v4 }
 0x6f3   : > { %2647 = vmatmul.mubr.f32.gmra.mrb[140].mxu1 %v7478_v27 }
 0x6f4   : > { %4692 = vmatprep.mubr.msk.f32.mxu1 %vm519_vm1, %v7485_v46 }
 0x6f7   : > { %2652 = vmatmul.mubr.f32.gmra.mrb[142].mxu1 %v7490_v53 }
 0x6f8   : > { %4693 = vmatprep.mubr.msk.f32.mxu1 %vm519_vm1, %v7497_v54 }
 0x76a   : > { %v2445_v14 = vpop.f32.mrb[96].mxu0 }
 0x76b   : > { %v2446_v39 = vadd.f32 %v4648_v18, %v2445_v14  ;;  %v2447_v12 = vpop.f32.mrb[97].mxu0 }
 0x76d   : > { %v2474_v7 = vsub.f32 0.0, %v2446_v39 }
 0x76e   : > { %v2450_v34 = vpop.f32.mrb[98].mxu0 }
 0x76f   : > { %v2480_v0 = vmul.f32 1.442695, %v2474_v7  ;;  %v2451_v36 = vadd.f32 %v4649_v35, %v2450_v34  ;;  %v2452_v29 = vpop.f32.mrb[99].mxu0  ;;  %v7502_v35 = vld [vmem:[%s6321_s17 + $0xc0] sm:$0xff]  ;;  %v4653_v34 = vld [vmem:[%s8299_s5 + $0x58] sm:$0xff] }
 0x770   : > { %2657 = vmatmul.mubr.f32.gmra.mrb[144].mxu1 %v7502_v35 }
 0x771   : > { %6042 = vpow2.f32 %v2480_v0  ;;  %v2475_v20 = vsub.f32 0.0, %v2451_v36  ;;  %v7509_v0 = vld [vmem:[%s6321_s17 + $0xd8] sm:$0xff] }
 0x772   : > { %v2455_v11 = vpop.f32.mrb[100].mxu0  ;;  %8505 = vst [vmem:[#allocation2_spill] sm:$0xff] %v7509_v0  ;;  %4694 = vmatprep.mubr.msk.f32.mxu1 %vm519_vm1, %v7509_v0 }
 0x773   : > { %v2482_v17 = vmul.f32 1.442695, %v2475_v20  ;;  %v2456_v28 = vadd.f32 %v4650_v16, %v2455_v11  ;;  %v2457_v51 = vpop.f32.mrb[101].mxu0 }
 0x775   : > { %6044 = vpow2.f32 %v2482_v17  ;;  %v2476_v25 = vsub.f32 0.0, %v2456_v28  ;;  %v7514_v28 = vld [vmem:[%s6321_s17 + $0xd0] sm:$0xff] }
 0x776   : > { %v2460_v44 = vpop.f32.mrb[102].mxu0  ;;  %8506 = vst [vmem:[#allocation3_spill] sm:$0xff] %v7514_v28  ;;  %2662 = vmatmul.mubr.f32.gmra.mrb[146].mxu1 %v7514_v28 }
 0x777   : > { %v2484_v22 = vmul.f32 1.442695, %v2476_v25  ;;  %v2461_v48 = vadd.f32 %v4651_v33, %v2460_v44  ;;  %v2462_v42 = vpop.f32.mrb[103].mxu0  ;;  %v7518_v33 = vld [vmem:[%s6321_s17 + $0xe8] sm:$0xff] }
 0x778   : > { %8507 = vst [vmem:[#allocation4_spill] sm:$0xff] %v7518_v33  ;;  %4695 = vmatprep.mubr.msk.f32.mxu1 %vm519_vm1, %v7518_v33 }
 0x779   : > { %6046 = vpow2.f32 %v2484_v22  ;;  %v2477_v55 = vsub.f32 0.0, %v2461_v48  ;;  %v7523_v48 = vld [vmem:[%s6321_s17 + $0xe0] sm:$0xff] }
 0x77a   : > { %v2465_v47 = vpop.f32.mrb[104].mxu0  ;;  %8508 = vst [vmem:[#allocation5_spill] sm:$0xff] %v7523_v48  ;;  %2667 = vmatmul.mubr.f32.gmra.mrb[148].mxu1 %v7523_v48 }
 0x77b   : > { %v6043_v18 = vpop.eup %6042  ;;  %v2486_v14 = vmul.f32 1.442695, %v2477_v55  ;;  %v2466_v39 = vadd.f32 %v4652_v41, %v2465_v47  ;;  %v2467_v12 = vpop.f32.mrb[105].mxu0  ;;  %v7527_v41 = vld [vmem:[%s6321_s17 + $0xf8] sm:$0xff]  ;;  %v7532_v47 = vld [vmem:[%s6321_s17 + $0xf0] sm:$0xff] }
 0x77c   : > { %v2492_v7 = vadd.f32 1.0, %v6043_v18  ;;  %8509 = vst [vmem:[#allocation6_spill] sm:$0xff] %v7527_v41  ;;  %4696 = vmatprep.mubr.msk.f32.mxu1 %vm519_vm1, %v7527_v41  ;;  %8510 = vst [vmem:[#allocation7_spill] sm:$0xff] %v7532_v47 }
 0x77d   : > { %6048 = vpow2.f32 %v2486_v14  ;;  %v2478_v36 = vsub.f32 0.0, %v2466_v39  ;;  %v7536_v39 = vld [vmem:[%s6321_s17 + $0x108] sm:$0xff] }
 0x77e   : > { %6050 = vrcp.f32 %v2492_v7  ;;  %v2470_v29 = vpop.f32.mrb[106].mxu0  ;;  %2672 = vmatmul.mubr.f32.gmra.mrb[150].mxu1 %v7532_v47  ;;  %8511 = vst [vmem:[#allocation8_spill] sm:$0xff] %v7536_v39 }
 0x77f   : > { %v6045_v16 = vpop.eup %6044  ;;  %v2488_v20 = vmul.f32 1.442695, %v2478_v36  ;;  %v2471_v11 = vadd.f32 %v4653_v34, %v2470_v29  ;;  %v2472_v17 = vpop.f32.mrb[107].mxu0  ;;  %4697 = vmatprep.mubr.msk.f32.mxu1 %vm519_vm1, %v7536_v39  ;;  %v7543_v34 = vld [vmem:[%s6321_s17 + $0x100] sm:$0xff] }
 0x780   : > { %v2493_v51 = vadd.f32 1.0, %v6045_v16  ;;  %8512 = vst [vmem:[#allocation9_spill] sm:$0xff] %v7543_v34  ;;  %v7547_v16 = vld [vmem:[%s6321_s17 + $0x118] sm:$0xff] }
 0x781   : > { %6052 = vpow2.f32 %v2488_v20  ;;  %v2479_v25 = vsub.f32 0.0, %v2471_v11  ;;  %8513 = vst [vmem:[#allocation10_spill] sm:$0xff] %v7547_v16  ;;  %v7554_v11 = vld [vmem:[%s6321_s17 + $0x110] sm:$0xff] }
 0x782   : > { %6054 = vrcp.f32 %v2493_v51  ;;  %2677 = vmatmul.mubr.f32.gmra.mrb[152].mxu1 %v7543_v34  ;;  %8514 = vst [vmem:[#allocation11_spill] sm:$0xff] %v7554_v11 }
 0x783   : > { %v6047_v44 = vpop.eup %6046  ;;  %v2490_v22 = vmul.f32 1.442695, %v2479_v25  ;;  %4698 = vmatprep.mubr.msk.f32.mxu1 %vm519_vm1, %v7547_v16  ;;  %v7558_v25 = vld [vmem:[%s6321_s17 + $0x128] sm:$0xff] }
 0x784   : > { %v2494_v42 = vadd.f32 1.0, %v6047_v44  ;;  %8515 = vst [vmem:[#allocation12_spill] sm:$0xff] %v7558_v25  ;;  %v7565_v44 = vld [vmem:[%s6321_s17 + $0x120] sm:$0xff] }
 0x785   : > { %6056 = vpow2.f32 %v2490_v22  ;;  %8516 = vst [vmem:[#allocation13_spill] sm:$0xff] %v7565_v44 }
 0x786   : > { %6058 = vrcp.f32 %v2494_v42  ;;  %2682 = vmatmul.mubr.f32.gmra.mrb[154].mxu1 %v7554_v11  ;;  %v7569_v42 = vld [vmem:[%s6321_s17 + $0x138] sm:$0xff] }
 0x787   : > { %v6049_v55 = vpop.eup %6048  ;;  %4699 = vmatprep.mubr.msk.f32.mxu1 %vm519_vm1, %v7558_v25  ;;  %8517 = vst [vmem:[#allocation14_spill] sm:$0xff] %v7569_v42 }
 0x788   : > { %v6051_v18 = vpop.eup %6050  ;;  %v2495_v14 = vadd.f32 1.0, %v6049_v55 }
 0x789   : > { %v2504_v12 = vmul.f32 %v6051_v18, %v7052_v6 }
 0x78a   : > { %6060 = vrcp.f32 %v2495_v14  ;;  %2687 = vmatmul.mubr.f32.gmra.mrb[156].mxu1 %v7565_v44  ;;  %v7580_v14 = vld [vmem:[%s6321_s17 + $0x148] sm:$0xff] }
 0x78b   : > { %v6053_v7 = vpop.eup %6052  ;;  %5384 = vmatprep.mubr.msk.f32.mxu0 %vm777_vm0, %v2504_v12  ;;  %4700 = vmatprep.mubr.msk.f32.mxu1 %vm519_vm1, %v7569_v42  ;;  %8519 = vst [vmem:[#allocation16_spill] sm:$0xff] %v7580_v14 }
 0x78c   : > { %v6055_v36 = vpop.eup %6054  ;;  %v2496_v29 = vadd.f32 1.0, %v6053_v7 }
 0x78d   : > { %v2505_v20 = vmul.f32 %v6055_v36, %v7061_v43  ;;  %v7591_v36 = vld [vmem:[%s6321_s17 + $0x158] sm:$0xff] }
 0x78e   : > { %6062 = vrcp.f32 %v2496_v29  ;;  %8521 = vst [vmem:[#allocation18_spill] sm:$0xff] %v7591_v36 }
 0x78f   : > { %v6057_v6 = vpop.eup %6056  ;;  %5385 = vmatmul.mubr.msk.f32.vlgmr.msra.gmra.mrb[108].mxu0 %vm777_vm0, %v2505_v20  ;;  %v7604_v20 = vld [vmem:[%s6321_s17 + $0x168] sm:$0xff] }
 0x790   : > { %v6059_v17 = vpop.eup %6058  ;;  %v2497_v51 = vadd.f32 1.0, %v6057_v6  ;;  %8523 = vst [vmem:[#allocation20_spill] sm:$0xff] %v7604_v20  ;;  %v7609_v6 = vld [vmem:[%s6321_s17 + $0x160] sm:$0xff] }
 0x791   : > { %v2506_v43 = vmul.f32 %v6059_v17, %v7071_v50  ;;  %v7576_v50 = vld [vmem:[%s6321_s17 + $0x130] sm:$0xff]  ;;  %8524 = vst [vmem:[#allocation21_spill] sm:$0xff] %v7609_v6  ;;  %v7613_v17 = vld [vmem:[%s6321_s17 + $0x178] sm:$0xff] }
 0x792   : > { %6064 = vrcp.f32 %v2497_v51  ;;  %8518 = vst [vmem:[#allocation15_spill] sm:$0xff] %v7576_v50  ;;  %2692 = vmatmul.mubr.f32.gmra.mrb[158].mxu1 %v7576_v50  ;;  %8525 = vst [vmem:[#allocation23_spill] sm:$0xff] %v7613_v17  ;;  %v7622_v51 = vld [vmem:[%s6843_s16 + $0x8] sm:$0xff] }
 0x793   : > { %5387 = vmatprep.mubr.msk.f32.mxu0 %vm777_vm0, %v2506_v43  ;;  %4701 = vmatprep.mubr.msk.f32.mxu1 %vm519_vm1, %v7580_v14  ;;  %8527 = vst [vmem:[#allocation26_spill] sm:$0xff] %v7622_v51 }
 0x794   : > { %v6061_v22 = vpop.eup %6060 }
 0x795   : > { %v2507_v55 = vmul.f32 %v6061_v22, %v7081_v57  ;;  %v7587_v57 = vld [vmem:[%s6321_s17 + $0x140] sm:$0xff] }
 0x796   : > { %8520 = vst [vmem:[#allocation17_spill] sm:$0xff] %v7587_v57  ;;  %2697 = vmatmul.mubr.f32.gmra.mrb[160].mxu1 %v7587_v57 }
 0x797   : > { %5388 = vmatmul.mubr.msk.f32.gmra.mrb[110].mxu0 %vm777_vm0, %v2507_v55  ;;  %4702 = vmatprep.mubr.msk.f32.mxu1 %vm519_vm1, %v7591_v36 }
 0x798   : > { %v6063_v18 = vpop.eup %6062 }
 0x799   : > { %v2508_v12 = vmul.f32 %v6063_v18, %v7091_v10  ;;  %v7598_v10 = vld [vmem:[%s6321_s17 + $0x150] sm:$0xff] }
 0x79a   : > { %8522 = vst [vmem:[#allocation19_spill] sm:$0xff] %v7598_v10  ;;  %2702 = vmatmul.mubr.f32.gmra.mrb[162].mxu1 %v7598_v10 }
 0x79b   : > { %5390 = vmatprep.mubr.msk.f32.mxu0 %vm777_vm0, %v2508_v12  ;;  %4703 = vmatprep.mubr.msk.f32.mxu1 %vm519_vm1, %v7604_v20 }
 0x79c   : > { %v6065_v7 = vpop.eup %6064 }
 0x79d   : > { %v2509_v29 = vmul.f32 %v6065_v7, %v7101_v62  ;;  %v7618_v62 = vld [vmem:[%s6321_s17 + $0x170] sm:$0xff] }
 0x79e   : > { %2707 = vmatmul.mubr.f32.gmra.mrb[164].mxu1 %v7609_v6  ;;  %8526 = vst [vmem:[#allocation24_spill] sm:$0xff] %v7618_v62 }
 0x79f   : > { %5391 = vmatmul.mubr.msk.f32.gmra.mrb[112].mxu0 %vm777_vm0, %v2509_v29  ;;  %4704 = vmatprep.mubr.msk.f32.mxu1 %vm519_vm1, %v7613_v17 }
 0x7a0   : > { %5405 = vmatprep.mubr.msk.f32.mxu0 %vm891_vm2, %v7111_v1  ;;  %v7626_v1 = vpop.f32.mrb[120].mxu1 }
 0x7a1   : > { %v2600_v43 = vpop.f32.mrb[121].mxu1 }
 0x7a2   : > { %2712 = vmatmul.mubr.f32.gmra.mrb[166].mxu1 %v7618_v62  ;;  %v7628_v22 = vpop.f32.mrb[122].mxu1 }
 0x7a3   : > { %4765 = vmatprep.mubr.msk.f32.mxu1 %vm1173_vm3, %v7622_v51  ;;  %v2605_v55 = vpop.f32.mrb[123].mxu1 }
 0x7a6   : > { %v7630_v18 = vpop.f32.mrb[124].mxu1 }
 0x7a7   : > { %v2610_v12 = vpop.f32.mrb[125].mxu1 }
 0x7aa   : > { %v7632_v7 = vpop.f32.mrb[126].mxu1 }
 0x7ab   : > { %v2615_v29 = vpop.f32.mrb[127].mxu1 }
 0x7ae   : > { %v7634_v17 = vpop.f32.mrb[128].mxu1 }
 0x7af   : > { %v2620_v62 = vpop.f32.mrb[129].mxu1 }
 0x7b2   : > { %v7636_v6 = vpop.f32.mrb[130].mxu1 }
 0x7b3   : > { %v2625_v20 = vpop.f32.mrb[131].mxu1 }
 0x7b6   : > { %v7638_v10 = vpop.f32.mrb[132].mxu1 }
 0x7b7   : > { %v2630_v51 = vpop.f32.mrb[133].mxu1 }
 0x7ba   : > { %v7640_v36 = vpop.f32.mrb[134].mxu1 }
 0x7bb   : > { %v2635_v43 = vpop.f32.mrb[135].mxu1 }
 0x7be   : > { %v7642_v57 = vpop.f32.mrb[136].mxu1 }
 0x7bf   : > { %v2640_v55 = vpop.f32.mrb[137].mxu1 }
 0x7c2   : > { %v7644_v14 = vpop.f32.mrb[138].mxu1 }
 0x7c3   : > { %v2645_v12 = vpop.f32.mrb[139].mxu1 }
 0x7c6   : > { %v7646_v50 = vpop.f32.mrb[140].mxu1 }
 0x7c7   : > { %v2650_v29 = vpop.f32.mrb[141].mxu1 }
 0x7ca   : > { %v7648_v42 = vpop.f32.mrb[142].mxu1 }
 0x7cb   : > { %v2655_v62 = vpop.f32.mrb[143].mxu1 }
 0x7cc   : > { %v7669_v62 = vld [vmem:[%s6479_s12 + $0x20] sm:$0xff] }
 0x7cd   : > { %8531 = vst [vmem:[#allocation31_spill] sm:$0xff] %v7669_v62 }
 0x862   : > { %v5386_v44 = vpop.f32.mrb[108].mxu0 }
 0x863   : > { %v2801_v20 = vpop.f32.mrb[109].mxu0 }
 0x864   : > { %v5822_v25 = vpack.c.bf16 %v5386_v44, %v2801_v20  ;;  %v7652_v44 = vld [vmem:[%s6479_s12 + $0x8] sm:$0xff] }
 0x865   : > { %8528 = vst [vmem:[#allocation27_spill] sm:$0xff] %v7652_v44  ;;  %v7676_v20 = vld [vmem:[%s6479_s12 + $0x28] sm:$0xff] }
 0x866   : > { %5823 = vmatprep.subr.bf16.mxu0 %v5822_v25  ;;  %8532 = vst [vmem:[#allocation32_spill] sm:$0xff] %v7676_v20 }
 0x867   : > { %5825 = vmatpush3.bf16.msra.mxu0 %v5822_v25  ;;  %v7657_v25 = vld [vmem:[%s6479_s12 + $0x10] sm:$0xff] }
 0x868   : > { %8529 = vst [vmem:[#allocation29_spill] sm:$0xff] %v7657_v25 }
 0x86a   : > { %v5389_v51 = vpop.f32.mrb[110].mxu0 }
 0x86b   : > { %v2811_v43 = vpop.f32.mrb[111].mxu0 }
 0x86c   : > { %v5826_v55 = vpack.c.bf16 %v5389_v51, %v2811_v43  ;;  %v7681_v51 = vld [vmem:[%s6479_s12 + $0x30] sm:$0xff]  ;;  %v7688_v43 = vld [vmem:[%s6479_s12 + $0x38] sm:$0xff] }
 0x86d   : > { %8533 = vst [vmem:[#allocation33_spill] sm:$0xff] %v7681_v51  ;;  %8534 = vst [vmem:[#allocation34_spill] sm:$0xff] %v7688_v43 }
 0x86e   : > { %5827 = vmatprep.subr.bf16.mxu0 %v5826_v55 }
 0x86f   : > { %5829 = vmatpush3.bf16.msra.mxu0 %v5826_v55  ;;  %v7693_v55 = vld [vmem:[%s6479_s12 + $0x40] sm:$0xff] }
 0x870   : > { %8535 = vst [vmem:[#allocation35_spill] sm:$0xff] %v7693_v55 }
 0x872   : > { %v5392_v12 = vpop.f32.mrb[112].mxu0 }
 0x873   : > { %v2821_v11 = vpop.f32.mrb[113].mxu0 }
 0x874   : > { %v5830_v29 = vpack.c.bf16 %v5392_v12, %v2821_v11  ;;  %v7664_v11 = vld [vmem:[%s6479_s12 + $0x18] sm:$0xff]  ;;  %v7700_v12 = vld [vmem:[%s6479_s12 + $0x48] sm:$0xff] }
 0x875   : > { %8530 = vst [vmem:[#allocation30_spill] sm:$0xff] %v7664_v11  ;;  %8536 = vst [vmem:[#allocation36_spill] sm:$0xff] %v7700_v12 }
 0x876   : > { %5831 = vmatprep.subr.bf16.mxu0 %v5830_v29 }
 0x877   : > { %5833 = vmatpush3.bf16.msra.mxu0 %v5830_v29  ;;  %v7705_v29 = vld [vmem:[%s6479_s12 + $0x50] sm:$0xff] }
 0x878   : > { %5835 = vmatprep.subr.bf16.mxu0 %v8478_v21  ;;  %8537 = vst [vmem:[#allocation37_spill] sm:$0xff] %v7705_v29 }
 0x87a   : > { %5406 = vmatmul.mubr.msk.f32.vlgmr.msra.gmra.mrb[114].mxu0 %vm891_vm2, %v7652_v44 }
 0x87b   : > { %5408 = vmatprep.mubr.msk.f32.mxu0 %vm891_vm2, %v7657_v25  ;;  %5837 = vmatpush3.bf16.msra.mxu0 %v8478_v21 }
 0x87c   : > { %5839 = vmatprep.subr.bf16.mxu0 %v8481_v9 }
 0x87e   : > { %5409 = vmatmul.mubr.msk.f32.gmra.mrb[116].mxu0 %vm891_vm2, %v7664_v11 }
 0x87f   : > { %5411 = vmatprep.mubr.msk.f32.mxu0 %vm891_vm2, %v7669_v62  ;;  %5841 = vmatpush3.bf16.msra.mxu0 %v8481_v9 }
 0x880   : > { %5843 = vmatprep.subr.bf16.mxu0 %v8484_v31 }
 0x882   : > { %5412 = vmatmul.mubr.msk.f32.gmra.mrb[118].mxu0 %vm891_vm2, %v7676_v20 }
 0x883   : > { %5414 = vmatprep.mubr.msk.f32.mxu0 %vm891_vm2, %v7681_v51  ;;  %5845 = vmatpush3.bf16.msra.mxu0 %v8484_v31 }
 0x884   : > { %5847 = vmatprep.subr.bf16.mxu0 %v8487_v15 }
 0x886   : > { %5415 = vmatmul.mubr.msk.f32.gmra.mrb[120].mxu0 %vm891_vm2, %v7688_v43  ;;  %v7710_v43 = vld [vmem:[%s6479_s12 + $0x58] sm:$0xff] }
 0x887   : > { %5417 = vmatprep.mubr.msk.f32.mxu0 %vm891_vm2, %v7693_v55  ;;  %5849 = vmatpush3.bf16.msra.mxu0 %v8487_v15  ;;  %8538 = vst [vmem:[#allocation38_spill] sm:$0xff] %v7710_v43  ;;  %v7715_v55 = vld [vmem:[%s6479_s12 + $0x60] sm:$0xff]  ;;  %v7720_v15 = vld [vmem:[%s6479_s12 + $0x68] sm:$0xff] }
 0x888   : > { %5886 = vmatprep.subr.bf16.mxu0 %v8456_v38  ;;  %8539 = vst [vmem:[#allocation39_spill] sm:$0xff] %v7715_v55  ;;  %8540 = vst [vmem:[#allocation40_spill] sm:$0xff] %v7720_v15 }
 0x88a   : > { %5418 = vmatmul.mubr.msk.f32.gmra.mrb[122].mxu0 %vm891_vm2, %v7700_v12  ;;  %v7725_v12 = vld [vmem:[%s6479_s12 + $0x70] sm:$0xff] }
 0x88b   : > { %5420 = vmatprep.mubr.msk.f32.mxu0 %vm891_vm2, %v7705_v29  ;;  %8541 = vst [vmem:[#allocation41_spill] sm:$0xff] %v7725_v12  ;;  %v7730_v29 = vld [vmem:[%s6479_s12 + $0x78] sm:$0xff] }
 0x88c   : > { %8542 = vst [vmem:[#allocation42_spill] sm:$0xff] %v7730_v29 }
 0x88e   : > { %5421 = vmatmul.mubr.msk.f32.gmra.mrb[124].mxu0 %vm891_vm2, %v7710_v43  ;;  %v7735_v43 = vld [vmem:[%s6479_s12 + $0x80] sm:$0xff] }
 0x88f   : > { %5423 = vmatprep.mubr.msk.f32.mxu0 %vm891_vm2, %v7715_v55  ;;  %8543 = vst [vmem:[#allocation43_spill] sm:$0xff] %v7735_v43  ;;  %v7740_v55 = vld [vmem:[%s6479_s12 + $0x88] sm:$0xff] }
 0x890   : > { %8544 = vst [vmem:[#allocation44_spill] sm:$0xff] %v7740_v55 }
 0x892   : > { %5424 = vmatmul.mubr.msk.f32.gmra.mrb[126].mxu0 %vm891_vm2, %v7720_v15  ;;  %v7745_v15 = vld [vmem:[%s6479_s12 + $0x90] sm:$0xff] }
 0x893   : > { %5426 = vmatprep.mubr.msk.f32.mxu0 %vm891_vm2, %v7725_v12  ;;  %8545 = vst [vmem:[#allocation45_spill] sm:$0xff] %v7745_v15  ;;  %v7750_v12 = vld [vmem:[%s6479_s12 + $0x98] sm:$0xff] }
 0x894   : > { %8546 = vst [vmem:[#allocation46_spill] sm:$0xff] %v7750_v12 }
 0x896   : > { %5427 = vmatmul.mubr.msk.f32.gmra.mrb[128].mxu0 %vm891_vm2, %v7730_v29  ;;  %v7755_v29 = vld [vmem:[%s6479_s12 + $0xa0] sm:$0xff] }
 0x897   : > { %5429 = vmatprep.mubr.msk.f32.mxu0 %vm891_vm2, %v7735_v43  ;;  %8547 = vst [vmem:[#allocation47_spill] sm:$0xff] %v7755_v29  ;;  %v7760_v43 = vld [vmem:[%s6479_s12 + $0xa8] sm:$0xff] }
 0x898   : > { %8548 = vst [vmem:[#allocation49_spill] sm:$0xff] %v7760_v43 }
 0x89a   : > { %5430 = vmatmul.mubr.msk.f32.gmra.mrb[130].mxu0 %vm891_vm2, %v7740_v55  ;;  %v7765_v55 = vld [vmem:[%s6479_s12 + $0xb0] sm:$0xff] }
 0x89b   : > { %5432 = vmatprep.mubr.msk.f32.mxu0 %vm891_vm2, %v7745_v15  ;;  %8549 = vst [vmem:[#allocation50_spill] sm:$0xff] %v7765_v55  ;;  %v7770_v15 = vld [vmem:[%s6479_s12 + $0xb8] sm:$0xff] }
 0x89c   : > { %8550 = vst [vmem:[#allocation51_spill] sm:$0xff] %v7770_v15 }
 0x89e   : > { %5433 = vmatmul.mubr.msk.f32.gmra.mrb[132].mxu0 %vm891_vm2, %v7750_v12  ;;  %v7774_v12 = vpop.f32.mrb[144].mxu1 }
 0x89f   : > { %5435 = vmatprep.mubr.msk.f32.mxu0 %vm891_vm2, %v7755_v29  ;;  %v2660_v51 = vpop.f32.mrb[145].mxu1 }
 0x8a0   : > { %v2663_v20 = vpop.f32.mrb[146].mxu1 }
 0x8a1   : > { %v2665_v29 = vpop.f32.mrb[147].mxu1 }
 0x8a2   : > { %5436 = vmatmul.mubr.msk.f32.gmra.mrb[134].mxu0 %vm891_vm2, %v7760_v43  ;;  %v7776_v31 = vpop.f32.mrb[148].mxu1 }
 0x8a3   : > { %5438 = vmatprep.mubr.msk.f32.mxu0 %vm891_vm2, %v7765_v55  ;;  %v2670_v62 = vpop.f32.mrb[149].mxu1 }
 0x8a4   : > { %v2673_v11 = vpop.f32.mrb[150].mxu1 }
 0x8a5   : > { %v2675_v43 = vpop.f32.mrb[151].mxu1 }
 0x8a6   : > { %5439 = vmatmul.mubr.msk.f32.gmra.mrb[136].mxu0 %vm891_vm2, %v7770_v15  ;;  %v7778_v9 = vpop.f32.mrb[152].mxu1 }
 0x8a7   : > { %v2680_v25 = vpop.f32.mrb[153].mxu1 }
 0x8a8   : > { %v2683_v44 = vpop.f32.mrb[154].mxu1 }
 0x8a9   : > { %v2685_v55 = vpop.f32.mrb[155].mxu1 }
 0x8aa   : > { %v7780_v21 = vpop.f32.mrb[156].mxu1 }
 0x8ab   : > { %v2690_v16 = vpop.f32.mrb[157].mxu1 }
 0x8ac   : > { %v7782_v34 = vpop.f32.mrb[158].mxu1 }
 0x8ad   : > { %v2695_v15 = vpop.f32.mrb[159].mxu1 }
 0x8ae   : > { %v7784_v39 = vpop.f32.mrb[160].mxu1 }
 0x8af   : > { %v2700_v51 = vpop.f32.mrb[161].mxu1 }
 0x8b0   : > { %v7786_v29 = vpop.f32.mrb[162].mxu1 }
 0x8b1   : > { %v2705_v47 = vpop.f32.mrb[163].mxu1 }
 0x8b2   : > { %v7788_v62 = vpop.f32.mrb[164].mxu1 }
 0x8b3   : > { %v2710_v43 = vpop.f32.mrb[165].mxu1 }
 0x8b4   : > { %v7790_v41 = vpop.f32.mrb[166].mxu1 }
 0x8b5   : > { %v2715_v25 = vpop.f32.mrb[167].mxu1 }
 0x94d   : > { %v5407_v48 = vpop.f32.mrb[114].mxu0 }
 0x94e   : > { %v3016_v55 = vmul.f32 %v5407_v48, %v7628_v22  ;;  %v2896_v33 = vpop.f32.mrb[115].mxu0 }
 0x94f   : > { %v3015_v16 = vmul.f32 %v2896_v33, %v7626_v1 }
 0x951   : > { %v5410_v28 = vpop.f32.mrb[116].mxu0  ;;  %5457 = vmatprep.mubr.msk.f32.mxu0 %vm1173_vm3, %v3015_v16 }
 0x952   : > { %v3018_v15 = vmul.f32 %v5410_v28, %v7632_v7  ;;  %v2906_v51 = vpop.f32.mrb[117].mxu0  ;;  %5458 = vmatmul.mubr.msk.f32.vlgmr.msra.gmra.mrb[138].mxu0 %vm1173_vm3, %v3016_v55 }
 0x953   : > { %v3017_v47 = vmul.f32 %v2906_v51, %v7630_v18 }
 0x955   : > { %v5413_v43 = vpop.f32.mrb[118].mxu0  ;;  %5460 = vmatprep.mubr.msk.f32.mxu0 %vm1173_vm3, %v3017_v47 }
 0x956   : > { %v3020_v25 = vmul.f32 %v5413_v43, %v7636_v6  ;;  %v2916_v0 = vpop.f32.mrb[119].mxu0  ;;  %5461 = vmatmul.mubr.msk.f32.gmra.mrb[140].mxu0 %vm1173_vm3, %v3018_v15 }
 0x957   : > { %v3019_v33 = vmul.f32 %v2916_v0, %v7634_v17 }
 0x959   : > { %v5416_v48 = vpop.f32.mrb[120].mxu0  ;;  %5463 = vmatprep.mubr.msk.f32.mxu0 %vm1173_vm3, %v3019_v33 }
 0x95a   : > { %v3022_v28 = vmul.f32 %v5416_v48, %v7640_v36  ;;  %v2926_v1 = vpop.f32.mrb[121].mxu0  ;;  %5464 = vmatmul.mubr.msk.f32.gmra.mrb[142].mxu0 %vm1173_vm3, %v3020_v25 }
 0x95b   : > { %v3021_v22 = vmul.f32 %v2926_v1, %v7638_v10 }
 0x95d   : > { %v5419_v18 = vpop.f32.mrb[122].mxu0  ;;  %5466 = vmatprep.mubr.msk.f32.mxu0 %vm1173_vm3, %v3021_v22 }
 0x95e   : > { %v3024_v6 = vmul.f32 %v5419_v18, %v7644_v14  ;;  %v2936_v7 = vpop.f32.mrb[123].mxu0  ;;  %5467 = vmatmul.mubr.msk.f32.gmra.mrb[144].mxu0 %vm1173_vm3, %v3022_v28 }
 0x95f   : > { %v3023_v0 = vmul.f32 %v2936_v7, %v7642_v57 }
 0x961   : > { %v5422_v17 = vpop.f32.mrb[124].mxu0  ;;  %5469 = vmatprep.mubr.msk.f32.mxu0 %vm1173_vm3, %v3023_v0 }
 0x962   : > { %v3026_v36 = vmul.f32 %v5422_v17, %v7648_v42  ;;  %v2946_v55 = vpop.f32.mrb[125].mxu0  ;;  %5470 = vmatmul.mubr.msk.f32.gmra.mrb[146].mxu0 %vm1173_vm3, %v3024_v6 }
 0x963   : > { %v3025_v10 = vmul.f32 %v2946_v55, %v7646_v50 }
 0x965   : > { %v5425_v16 = vpop.f32.mrb[126].mxu0  ;;  %5472 = vmatprep.mubr.msk.f32.mxu0 %vm1173_vm3, %v3025_v10 }
 0x966   : > { %v3028_v15 = vmul.f32 %v5425_v16, %v2663_v20  ;;  %v2956_v14 = vpop.f32.mrb[127].mxu0  ;;  %5473 = vmatmul.mubr.msk.f32.gmra.mrb[148].mxu0 %vm1173_vm3, %v3026_v36 }
 0x967   : > { %v3027_v51 = vmul.f32 %v2956_v14, %v7774_v12 }
 0x969   : > { %v5428_v57 = vpop.f32.mrb[128].mxu0  ;;  %5475 = vmatprep.mubr.msk.f32.mxu0 %vm1173_vm3, %v3027_v51 }
 0x96a   : > { %v3030_v47 = vmul.f32 %v5428_v57, %v2673_v11  ;;  %v2966_v43 = vpop.f32.mrb[129].mxu0  ;;  %5476 = vmatmul.mubr.msk.f32.gmra.mrb[150].mxu0 %vm1173_vm3, %v3028_v15 }
 0x96b   : > { %v3029_v42 = vmul.f32 %v2966_v43, %v7776_v31 }
 0x96d   : > { %v5431_v25 = vpop.f32.mrb[130].mxu0  ;;  %5478 = vmatprep.mubr.msk.f32.mxu0 %vm1173_vm3, %v3029_v42 }
 0x96e   : > { %v3032_v50 = vmul.f32 %v5431_v25, %v2683_v44  ;;  %v2976_v33 = vpop.f32.mrb[131].mxu0  ;;  %5479 = vmatmul.mubr.msk.f32.gmra.mrb[152].mxu0 %vm1173_vm3, %v3030_v47 }
 0x96f   : > { %v3031_v20 = vmul.f32 %v2976_v33, %v7778_v9 }
 0x971   : > { %v5434_v48 = vpop.f32.mrb[132].mxu0  ;;  %5481 = vmatprep.mubr.msk.f32.mxu0 %vm1173_vm3, %v3031_v20 }
 0x972   : > { %v3034_v12 = vmul.f32 %v5434_v48, %v7782_v34  ;;  %v2986_v11 = vpop.f32.mrb[133].mxu0  ;;  %5482 = vmatmul.mubr.msk.f32.gmra.mrb[154].mxu0 %vm1173_vm3, %v3032_v50 }
 0x973   : > { %v3033_v28 = vmul.f32 %v2986_v11, %v7780_v21 }
 0x975   : > { %v5437_v31 = vpop.f32.mrb[134].mxu0  ;;  %5484 = vmatprep.mubr.msk.f32.mxu0 %vm1173_vm3, %v3033_v28 }
 0x976   : > { %v3036_v44 = vmul.f32 %v5437_v31, %v7786_v29  ;;  %v2996_v1 = vpop.f32.mrb[135].mxu0  ;;  %5485 = vmatmul.mubr.msk.f32.gmra.mrb[156].mxu0 %vm1173_vm3, %v3034_v12 }
 0x977   : > { %v3035_v9 = vmul.f32 %v2996_v1, %v7784_v39 }
 0x979   : > { %v5440_v22 = vpop.f32.mrb[136].mxu0  ;;  %5487 = vmatprep.mubr.msk.f32.mxu0 %vm1173_vm3, %v3035_v9 }
 0x97a   : > { %v3038_v34 = vmul.f32 %v5440_v22, %v7790_v41  ;;  %v3006_v18 = vpop.f32.mrb[137].mxu0  ;;  %5488 = vmatmul.mubr.msk.f32.gmra.mrb[158].mxu0 %vm1173_vm3, %v3036_v44 }
 0x97b   : > { %v3037_v21 = vmul.f32 %v3006_v18, %v7788_v62 }
 0x97d   : > { %5490 = vmatprep.mubr.msk.f32.mxu0 %vm1173_vm3, %v3037_v21 }
 0x97e   : > { %5491 = vmatmul.mubr.msk.f32.gmra.mrb[160].mxu0 %vm1173_vm3, %v3038_v34 }
 0x97f   : > { %4792 = vmatprep.mubr.msk.f32.mxu0 %vm519_vm1, %v7266_v13 }
 0xa25   : > { %v5459_v29 = vpop.f32.mrb[138].mxu0 }
 0xa26   : > { %v3177_v6 = vpop.f32.mrb[139].mxu0 }
 0xa27   : > { %v5851_v39 = vpack.c.bf16 %v5459_v29, %v3177_v6  ;;  %v7852_v29 = vld [vmem:[%s6843_s16] sm:$0xff]  ;;  %v7856_v6 = vld [vmem:[%s6843_s16 + $0x18] sm:$0xff] }
 0xa29   : > { %v5462_v7 = vpop.f32.mrb[140].mxu0  ;;  %5852 = vmatpush1.bf16.msra.mxu1 %v5851_v39  ;;  %v7862_v39 = vld [vmem:[%s6843_s16 + $0x10] sm:$0xff] }
 0xa2a   : > { %v3187_v0 = vpop.f32.mrb[141].mxu0  ;;  %5853 = vmatprep.subr.bf16.mxu1 %v8456_v38 }
 0xa2b   : > { %v5854_v41 = vpack.c.bf16 %v5462_v7, %v3187_v0  ;;  %v7866_v7 = vld [vmem:[%s6843_s16 + $0x28] sm:$0xff]  ;;  %v7871_v0 = vld [vmem:[%s6843_s16 + $0x20] sm:$0xff] }
 0xa2d   : > { %v5465_v17 = vpop.f32.mrb[142].mxu0  ;;  %5855 = vmatpush1.bf16.msra.mxu1 %v5854_v41  ;;  %v7875_v41 = vld [vmem:[%s6843_s16 + $0x38] sm:$0xff] }
 0xa2e   : > { %v3197_v36 = vpop.f32.mrb[143].mxu0  ;;  %5856 = vmatprep.subr.bf16.mxu1 %v8456_v38 }
 0xa2f   : > { %v5857_v62 = vpack.c.bf16 %v5465_v17, %v3197_v36  ;;  %v7884_v17 = vld [vmem:[%s6843_s16 + $0x48] sm:$0xff]  ;;  %v7889_v36 = vld [vmem:[%s6843_s16 + $0x40] sm:$0xff] }
 0xa31   : > { %v5468_v55 = vpop.f32.mrb[144].mxu0  ;;  %5858 = vmatpush1.bf16.msra.mxu1 %v5857_v62  ;;  %v7893_v62 = vld [vmem:[%s6843_s16 + $0x58] sm:$0xff] }
 0xa32   : > { %v3207_v10 = vpop.f32.mrb[145].mxu0  ;;  %5859 = vmatprep.subr.bf16.mxu1 %v8456_v38 }
 0xa33   : > { %v5860_v13 = vpack.c.bf16 %v5468_v55, %v3207_v10  ;;  %v7898_v55 = vld [vmem:[%s6843_s16 + $0x50] sm:$0xff]  ;;  %v4771_v10 = vld [vmem:[%s8298_s4 + $0x1f8] sm:$0xff] }
 0xa35   : > { %v5471_v16 = vpop.f32.mrb[146].mxu0  ;;  %5861 = vmatpush1.bf16.msra.mxu1 %v5860_v13  ;;  %v4772_v13 = vld [vmem:[%s8298_s4 + $0x200] sm:$0xff] }
 0xa36   : > { %v3217_v15 = vpop.f32.mrb[147].mxu0  ;;  %5862 = vmatprep.subr.bf16.mxu1 %v8456_v38 }
 0xa37   : > { %v5863_v14 = vpack.c.bf16 %v5471_v16, %v3217_v15  ;;  %v4773_v16 = vld [vmem:[%s8298_s4 + $0x208] sm:$0xff]  ;;  %v5887_v15 = vpack.c.bf16 %v4772_v13, %v4771_v10 }
 0xa39   : > { %v5474_v51 = vpop.f32.mrb[148].mxu0  ;;  %5864 = vmatpush1.bf16.msra.mxu1 %v5863_v14  ;;  %v4774_v14 = vld [vmem:[%s8298_s4 + $0x210] sm:$0xff]  ;;  %5888 = vmatpush1.bf16.msra.mxu0 %v5887_v15 }
 0xa3a   : > { %v3227_v57 = vpop.f32.mrb[149].mxu0  ;;  %5865 = vmatprep.subr.bf16.mxu1 %v8456_v38  ;;  %5889 = vmatprep.subr.bf16.mxu0 %v8456_v38 }
 0xa3b   : > { %v5866_v47 = vpack.c.bf16 %v5474_v51, %v3227_v57  ;;  %v5890_v51 = vpack.c.bf16 %v4774_v14, %v4773_v16  ;;  %v4775_v57 = vld [vmem:[%s8298_s4 + $0x218] sm:$0xff]  ;;  %v4761_v16 = vld [vmem:[%s8299_s5 + $0x70] sm:$0xff] }
 0xa3d   : > { %v5477_v43 = vpop.f32.mrb[150].mxu0  ;;  %5867 = vmatpush1.bf16.msra.mxu1 %v5866_v47  ;;  %v4776_v47 = vld [vmem:[%s8298_s4 + $0x220] sm:$0xff]  ;;  %5891 = vmatpush1.bf16.msra.mxu0 %v5890_v51 }
 0xa3e   : > { %v3237_v42 = vpop.f32.mrb[151].mxu0  ;;  %5868 = vmatprep.subr.bf16.mxu1 %v8456_v38  ;;  %5892 = vmatprep.subr.bf16.mxu0 %v8456_v38 }
 0xa3f   : > { %v5869_v25 = vpack.c.bf16 %v5477_v43, %v3237_v42  ;;  %v5893_v43 = vpack.c.bf16 %v4776_v47, %v4775_v57  ;;  %v4777_v42 = vld [vmem:[%s8298_s4 + $0x228] sm:$0xff] }
 0xa41   : > { %v5480_v50 = vpop.f32.mrb[152].mxu0  ;;  %5870 = vmatpush1.bf16.msra.mxu1 %v5869_v25  ;;  %v4778_v25 = vld [vmem:[%s8298_s4 + $0x230] sm:$0xff]  ;;  %5894 = vmatpush1.bf16.msra.mxu0 %v5893_v43  ;;  %v4762_v43 = vld [vmem:[%s8299_s5 + $0x78] sm:$0xff] }
 0xa42   : > { %v3247_v33 = vpop.f32.mrb[153].mxu0  ;;  %5871 = vmatprep.subr.bf16.mxu1 %v8456_v38  ;;  %5895 = vmatprep.subr.bf16.mxu0 %v8456_v38 }
 0xa43   : > { %v5872_v20 = vpack.c.bf16 %v5480_v50, %v3247_v33  ;;  %v5896_v50 = vpack.c.bf16 %v4778_v25, %v4777_v42  ;;  %v4779_v33 = vld [vmem:[%s8298_s4 + $0x238] sm:$0xff] }
 0xa45   : > { %v5483_v48 = vpop.f32.mrb[154].mxu0  ;;  %5873 = vmatpush1.bf16.msra.mxu1 %v5872_v20  ;;  %v4780_v20 = vld [vmem:[%s8298_s4 + $0x240] sm:$0xff]  ;;  %5897 = vmatpush1.bf16.msra.mxu0 %v5896_v50 }
 0xa46   : > { %v3257_v12 = vpop.f32.mrb[155].mxu0  ;;  %5874 = vmatprep.subr.bf16.mxu1 %v8456_v38  ;;  %5898 = vmatprep.subr.bf16.mxu0 %v8456_v38 }
 0xa47   : > { %v5875_v11 = vpack.c.bf16 %v5483_v48, %v3257_v12  ;;  %v5899_v48 = vpack.c.bf16 %v4780_v20, %v4779_v33  ;;  %v4781_v12 = vld [vmem:[%s8298_s4 + $0x248] sm:$0xff] }
 0xa49   : > { %v5486_v28 = vpop.f32.mrb[156].mxu0  ;;  %5876 = vmatpush1.bf16.msra.mxu1 %v5875_v11  ;;  %v4782_v11 = vld [vmem:[%s8298_s4 + $0x250] sm:$0xff]  ;;  %5900 = vmatpush1.bf16.msra.mxu0 %v5899_v48  ;;  %v4763_v48 = vld [vmem:[%s8299_s5 + $0x80] sm:$0xff] }
 0xa4a   : > { %v3267_v31 = vpop.f32.mrb[157].mxu0  ;;  %5877 = vmatprep.subr.bf16.mxu1 %v8456_v38  ;;  %5901 = vmatprep.subr.bf16.mxu0 %v8456_v38 }
 0xa4b   : > { %v5878_v44 = vpack.c.bf16 %v5486_v28, %v3267_v31  ;;  %v5902_v28 = vpack.c.bf16 %v4782_v11, %v4781_v12  ;;  %v4759_v31 = vld [vmem:[%s8299_s5 + $0x60] sm:$0xff] }
 0xa4d   : > { %v5489_v1 = vpop.f32.mrb[158].mxu0  ;;  %5879 = vmatpush1.bf16.msra.mxu1 %v5878_v44  ;;  %5903 = vmatpush1.bf16.msra.mxu0 %v5902_v28 }
 0xa4e   : > { %v3277_v9 = vpop.f32.mrb[159].mxu0  ;;  %5880 = vmatprep.subr.bf16.mxu1 %v8456_v38  ;;  %5904 = vmatprep.subr.bf16.mxu0 %v8456_v38 }
 0xa4f   : > { %v5881_v22 = vpack.c.bf16 %v5489_v1, %v3277_v9 }
 0xa51   : > { %v5492_v34 = vpop.f32.mrb[160].mxu0  ;;  %5882 = vmatpush1.bf16.msra.mxu1 %v5881_v22  ;;  %v4760_v22 = vld [vmem:[%s8299_s5 + $0x68] sm:$0xff] }
 0xa52   : > { %v3287_v18 = vpop.f32.mrb[161].mxu0  ;;  %5883 = vmatprep.subr.bf16.mxu1 %v8456_v38 }
 0xa53   : > { %v5884_v21 = vpack.c.bf16 %v5492_v34, %v3287_v18 }
 0xa55   : > { %5885 = vmatpush1.bf16.msra.mxu1 %v5884_v21 }
 0xa56   : > { %5493 = vmatprep.subr.mxu1 %v7284_v5 }
 0xa58   : > { %3368 = vmatmul.mubr.f32.vlgmr.msra.gmra.mrb[168].mxu1 %v7852_v29 }
 0xa59   : > { %4766 = vmatprep.mubr.msk.f32.mxu1 %vm1173_vm3, %v7856_v6  ;;  %5494 = vmatpush3.msra.mxu1 %v7284_v5  ;;  %v7880_v5 = vld [vmem:[%s6843_s16 + $0x30] sm:$0xff] }
 0xa5c   : > { %3373 = vmatmul.mubr.f32.gmra.mrb[170].mxu1 %v7862_v39 }
 0xa5d   : > { %4767 = vmatprep.mubr.msk.f32.mxu1 %vm1173_vm3, %v7866_v7 }
 0xa60   : > { %3378 = vmatmul.mubr.f32.gmra.mrb[172].mxu1 %v7871_v0 }
 0xa61   : > { %4768 = vmatprep.mubr.msk.f32.mxu1 %vm1173_vm3, %v7875_v41 }
 0xa64   : > { %3383 = vmatmul.mubr.f32.gmra.mrb[174].mxu1 %v7880_v5 }
 0xa65   : > { %4769 = vmatprep.mubr.msk.f32.mxu1 %vm1173_vm3, %v7884_v17 }
 0xa68   : > { %3388 = vmatmul.mubr.f32.gmra.mrb[176].mxu1 %v7889_v36 }
 0xa69   : > { %4770 = vmatprep.mubr.msk.f32.mxu1 %vm1173_vm3, %v7893_v62 }
 0xa6c   : > { %3393 = vmatmul.mubr.f32.gmra.mrb[178].mxu1 %v7898_v55 }
 0xb2b   : > { %v3369_v44 = vpop.f32.mrb[168].mxu1 }
 0xb2c   : > { %v3370_v1 = vadd.f32 %v4759_v31, %v3369_v44  ;;  %v3371_v9 = vpop.f32.mrb[169].mxu1 }
 0xb2e   : > { %v3398_v34 = vsub.f32 0.0, %v3370_v1 }
 0xb2f   : > { %v3374_v18 = vpop.f32.mrb[170].mxu1 }
 0xb30   : > { %v3404_v21 = vmul.f32 1.442695, %v3398_v34  ;;  %v3375_v10 = vadd.f32 %v4760_v22, %v3374_v18  ;;  %v3376_v13 = vpop.f32.mrb[171].mxu1  ;;  %v4764_v22 = vld [vmem:[%s8299_s5 + $0x88] sm:$0xff] }
 0xb32   : > { %6066 = vpow2.f32 %v3404_v21  ;;  %v3399_v15 = vsub.f32 0.0, %v3375_v10 }
 0xb33   : > { %v3379_v14 = vpop.f32.mrb[172].mxu1 }
 0xb34   : > { %v3406_v51 = vmul.f32 1.442695, %v3399_v15  ;;  %v3380_v57 = vadd.f32 %v4761_v16, %v3379_v14  ;;  %v3381_v47 = vpop.f32.mrb[173].mxu1 }
 0xb36   : > { %6068 = vpow2.f32 %v3406_v51  ;;  %v3400_v42 = vsub.f32 0.0, %v3380_v57 }
 0xb37   : > { %v3384_v25 = vpop.f32.mrb[174].mxu1 }
 0xb38   : > { %v3408_v50 = vmul.f32 1.442695, %v3400_v42  ;;  %v3385_v33 = vadd.f32 %v4762_v43, %v3384_v25  ;;  %v3386_v20 = vpop.f32.mrb[175].mxu1 }
 0xb3a   : > { %6070 = vpow2.f32 %v3408_v50  ;;  %v3401_v12 = vsub.f32 0.0, %v3385_v33  ;;  %v7964_v50 = vld [vmem:[%s8302_s8] sm:$0xff] }
 0xb3b   : > { %v3389_v11 = vpop.f32.mrb[176].mxu1 }
 0xb3c   : > { %v6067_v28 = vpop.eup %6066  ;;  %v3410_v31 = vmul.f32 1.442695, %v3401_v12  ;;  %v3390_v44 = vadd.f32 %v4763_v48, %v3389_v11  ;;  %v3391_v1 = vpop.f32.mrb[177].mxu1  ;;  %v7971_v11 = vld [vmem:[%s8302_s8 + $0x8] sm:$0xff] }
 0xb3d   : > { %v3416_v9 = vadd.f32 1.0, %v6067_v28 }
 0xb3e   : > { %6072 = vpow2.f32 %v3410_v31  ;;  %v3402_v34 = vsub.f32 0.0, %v3390_v44 }
 0xb3f   : > { %6074 = vrcp.f32 %v3416_v9  ;;  %v3394_v18 = vpop.f32.mrb[178].mxu1  ;;  %v7978_v9 = vld [vmem:[%s8302_s8 + $0x10] sm:$0xff] }
 0xb40   : > { %v6069_v21 = vpop.eup %6068  ;;  %v3412_v10 = vmul.f32 1.442695, %v3402_v34  ;;  %v3395_v13 = vadd.f32 %v4764_v22, %v3394_v18  ;;  %v3396_v16 = vpop.f32.mrb[179].mxu1  ;;  %v7985_v18 = vld [vmem:[%s8302_s8 + $0x18] sm:$0xff] }
 0xb41   : > { %v3417_v15 = vadd.f32 1.0, %v6069_v21 }
 0xb42   : > { %6076 = vpow2.f32 %v3412_v10  ;;  %v3403_v14 = vsub.f32 0.0, %v3395_v13  ;;  %v7992_v13 = vld [vmem:[%s8302_s8 + $0x20] sm:$0xff] }
 0xb43   : > { %6078 = vrcp.f32 %v3417_v15 }
 0xb44   : > { %v6071_v51 = vpop.eup %6070  ;;  %v3414_v57 = vmul.f32 1.442695, %v3403_v14  ;;  %v7999_v14 = vld [vmem:[%s8302_s8 + $0x28] sm:$0xff] }
 0xb45   : > { %v3418_v47 = vadd.f32 1.0, %v6071_v51 }
 0xb46   : > { %6080 = vpow2.f32 %v3414_v57  ;;  %v6205_v57 = vld [vmem:[%s6479_s12] sm:$0xff] }
 0xb47   : > { %6082 = vrcp.f32 %v3418_v47  ;;  %v4783_v47 = vld [vmem:[%s8298_s4 + $0x258] sm:$0xff] }
 0xb48   : > { %v6073_v43 = vpop.eup %6072 }
 0xb49   : > { %v6075_v42 = vpop.eup %6074  ;;  %v3419_v25 = vadd.f32 1.0, %v6073_v43  ;;  %v4784_v43 = vld [vmem:[%s8298_s4 + $0x260] sm:$0xff] }
 0xb4a   : > { %v3428_v33 = vmul.f32 %v7964_v50, %v6075_v42  ;;  %v5905_v42 = vpack.c.bf16 %v4784_v43, %v4783_v47  ;;  %v8575_v47 = vld [vmem:[#allocation27_spill] sm:$0xff]  ;;  %v8576_v43 = vld [vmem:[#allocation29_spill] sm:$0xff] }
 0xb4b   : > { %6084 = vrcp.f32 %v3419_v25  ;;  %v4785_v25 = vld [vmem:[%s8298_s4 + $0x268] sm:$0xff] }
 0xb4c   : > { %v6077_v20 = vpop.eup %6076  ;;  %5495 = vmatprep.mubr.msk.f32.mxu1 %vm777_vm0, %v3428_v33  ;;  %5906 = vmatpush1.bf16.msra.mxu0 %v5905_v42  ;;  %v4786_v33 = vld [vmem:[%s8298_s4 + $0x270] sm:$0xff]  ;;  %v8577_v42 = vld [vmem:[#allocation25_spill] sm:$0xff] }
 0xb4d   : > { %v6079_v48 = vpop.eup %6078  ;;  %v3420_v12 = vadd.f32 1.0, %v6077_v20  ;;  %5907 = vmatprep.subr.bf16.mxu0 %v8456_v38  ;;  %v5908_v20 = vpack.c.bf16 %v4786_v33, %v4785_v25  ;;  %v8578_v25 = vld [vmem:[#allocation30_spill] sm:$0xff]  ;;  %v8579_v33 = vld [vmem:[#allocation31_spill] sm:$0xff] }
 0xb4e   : > { %v3429_v28 = vmul.f32 %v7971_v11, %v6079_v48  ;;  %v4787_v48 = vld [vmem:[%s8298_s4 + $0x278] sm:$0xff] }
 0xb4f   : > { %6086 = vrcp.f32 %v3420_v12  ;;  %v4788_v12 = vld [vmem:[%s8298_s4 + $0x280] sm:$0xff] }
 0xb50   : > { %v6081_v31 = vpop.eup %6080  ;;  %5496 = vmatmul.mubr.msk.f32.vlgmr.msra.gmra.mrb[180].mxu1 %vm777_vm0, %v3429_v28  ;;  %5909 = vmatpush1.bf16.msra.mxu0 %v5908_v20  ;;  %v5911_v28 = vpack.c.bf16 %v4788_v12, %v4787_v48  ;;  %v8580_v20 = vld [vmem:[#allocation28_spill] sm:$0xff]  ;;  %v8582_v12 = vld [vmem:[#allocation33_spill] sm:$0xff] }
 0xb51   : > { %v6083_v44 = vpop.eup %6082  ;;  %v3421_v1 = vadd.f32 1.0, %v6081_v31  ;;  %5910 = vmatprep.subr.bf16.mxu0 %v8456_v38  ;;  %v4789_v31 = vld [vmem:[%s8298_s4 + $0x288] sm:$0xff]  ;;  %v8581_v48 = vld [vmem:[#allocation32_spill] sm:$0xff] }
 0xb52   : > { %v3430_v22 = vmul.f32 %v7978_v9, %v6083_v44  ;;  %v4790_v44 = vld [vmem:[%s8298_s4 + $0x290] sm:$0xff] }
 0xb53   : > { %6088 = vrcp.f32 %v3421_v1  ;;  %v5914_v1 = vpack.c.bf16 %v4790_v44, %v4789_v31  ;;  %v8584_v31 = vld [vmem:[#allocation34_spill] sm:$0xff]  ;;  %v8585_v44 = vld [vmem:[#allocation35_spill] sm:$0xff] }
 0xb54   : > { %5498 = vmatprep.mubr.msk.f32.mxu1 %vm777_vm0, %v3430_v22  ;;  %5912 = vmatpush1.bf16.msra.mxu0 %v5911_v28  ;;  %v4791_v22 = vld [vmem:[%s8298_s4 + $0x298] sm:$0xff]  ;;  %v8583_v28 = vld [vmem:[#allocation48_spill] sm:$0xff] }
 0xb55   : > { %v6085_v34 = vpop.eup %6084  ;;  %5913 = vmatprep.subr.bf16.mxu0 %v8456_v38 }
 0xb56   : > { %v3431_v21 = vmul.f32 %v7985_v18, %v6085_v34 }
 0xb58   : > { %5499 = vmatmul.mubr.msk.f32.gmra.mrb[182].mxu1 %vm777_vm0, %v3431_v21  ;;  %5915 = vmatpush1.bf16.msra.mxu0 %v5914_v1  ;;  %v8586_v1 = vld [vmem:[#allocation36_spill] sm:$0xff] }
 0xb59   : > { %v6087_v10 = vpop.eup %6086  ;;  %3496 = vmatprep.subr.mxu0 %v8457_v24  ;;  %v8551_v24 = vld [vmem:[#allocation2_spill] sm:$0xff] }
 0xb5a   : > { %v3432_v16 = vmul.f32 %v7992_v13, %v6087_v10 }
 0xb5c   : > { %5501 = vmatprep.mubr.msk.f32.mxu1 %vm777_vm0, %v3432_v16  ;;  %3497 = vmatpush1.msra.mxu0 %v4791_v22  ;;  %v8587_v22 = vld [vmem:[#allocation37_spill] sm:$0xff] }
 0xb5d   : > { %v6089_v15 = vpop.eup %6088  ;;  %3521 = vmatmul.mubr.f32.vlgmr.msra.gmra.mrb[162].mxu0 %v7378_v56  ;;  %5944 = vmatprep.subr.bf16.mxu0 %v8456_v38  ;;  %v8552_v56 = vld [vmem:[#allocation3_spill] sm:$0xff] }
 0xb5e   : > { %v3433_v51 = vmul.f32 %v7999_v14, %v6089_v15  ;;  %4793 = vmatprep.mubr.msk.f32.mxu0 %vm519_vm1, %v7383_v45  ;;  %v8553_v45 = vld [vmem:[#allocation4_spill] sm:$0xff] }
 0xb60   : > { %5502 = vmatmul.mubr.msk.f32.gmra.mrb[184].mxu1 %vm777_vm0, %v3433_v51 }
 0xb61   : > { %5516 = vmatprep.mubr.msk.f32.mxu1 %vm891_vm2, %v6205_v57  ;;  %3526 = vmatmul.mubr.f32.gmra.mrb[164].mxu0 %v7388_v58  ;;  %v8554_v58 = vld [vmem:[#allocation5_spill] sm:$0xff]  ;;  %v8574_v57 = vld [vmem:[#allocation22_spill] sm:$0xff] }
 0xb62   : > { %4794 = vmatprep.mubr.msk.f32.mxu0 %vm519_vm1, %v7392_v37  ;;  %v8555_v37 = vld [vmem:[#allocation6_spill] sm:$0xff] }
 0xb65   : > { %3531 = vmatmul.mubr.f32.gmra.mrb[166].mxu0 %v7397_v52  ;;  %v8556_v52 = vld [vmem:[#allocation7_spill] sm:$0xff] }
 0xb66   : > { %4795 = vmatprep.mubr.msk.f32.mxu0 %vm519_vm1, %v7401_v30  ;;  %v8557_v30 = vld [vmem:[#allocation8_spill] sm:$0xff] }
 0xb69   : > { %3536 = vmatmul.mubr.f32.gmra.mrb[168].mxu0 %v7406_v49  ;;  %v8558_v49 = vld [vmem:[#allocation9_spill] sm:$0xff] }
 0xb6a   : > { %4796 = vmatprep.mubr.msk.f32.mxu0 %vm519_vm1, %v7410_v3  ;;  %v8559_v3 = vld [vmem:[#allocation10_spill] sm:$0xff] }
 0xb6d   : > { %3541 = vmatmul.mubr.f32.gmra.mrb[170].mxu0 %v7415_v60  ;;  %v8560_v60 = vld [vmem:[#allocation11_spill] sm:$0xff] }
 0xb6e   : > { %4797 = vmatprep.mubr.msk.f32.mxu0 %vm519_vm1, %v7419_v40  ;;  %v8561_v40 = vld [vmem:[#allocation12_spill] sm:$0xff] }
 0xb71   : > { %3546 = vmatmul.mubr.f32.gmra.mrb[172].mxu0 %v7424_v59  ;;  %v8562_v59 = vld [vmem:[#allocation13_spill] sm:$0xff] }
 0xb72   : > { %4798 = vmatprep.mubr.msk.f32.mxu0 %vm519_vm1, %v7428_v23  ;;  %v8563_v23 = vld [vmem:[#allocation14_spill] sm:$0xff] }
 0xb75   : > { %3551 = vmatmul.mubr.f32.gmra.mrb[174].mxu0 %v7433_v61  ;;  %v8564_v61 = vld [vmem:[#allocation15_spill] sm:$0xff] }
 0xb76   : > { %4799 = vmatprep.mubr.msk.f32.mxu0 %vm519_vm1, %v7437_v19  ;;  %v8565_v19 = vld [vmem:[#allocation16_spill] sm:$0xff] }
 0xb79   : > { %3556 = vmatmul.mubr.f32.gmra.mrb[176].mxu0 %v7442_v2  ;;  %v8566_v2 = vld [vmem:[#allocation17_spill] sm:$0xff] }
 0xb7a   : > { %4800 = vmatprep.mubr.msk.f32.mxu0 %vm519_vm1, %v7449_v63  ;;  %v8567_v63 = vld [vmem:[#allocation18_spill] sm:$0xff] }
 0xb7d   : > { %3561 = vmatmul.mubr.f32.gmra.mrb[178].mxu0 %v7454_v8  ;;  %v8568_v8 = vld [vmem:[#allocation19_spill] sm:$0xff] }
 0xb7e   : > { %4801 = vmatprep.mubr.msk.f32.mxu0 %vm519_vm1, %v7461_v26  ;;  %v8569_v26 = vld [vmem:[#allocation20_spill] sm:$0xff] }
 0xb81   : > { %3566 = vmatmul.mubr.f32.gmra.mrb[180].mxu0 %v7466_v32  ;;  %v8570_v32 = vld [vmem:[#allocation21_spill] sm:$0xff] }
 0xb82   : > { %4802 = vmatprep.mubr.msk.f32.mxu0 %vm519_vm1, %v7473_v4  ;;  %v8571_v4 = vld [vmem:[#allocation23_spill] sm:$0xff] }
 0xb85   : > { %3571 = vmatmul.mubr.f32.gmra.mrb[182].mxu0 %v7478_v27  ;;  %v8572_v27 = vld [vmem:[#allocation24_spill] sm:$0xff] }
 0xb86   : > { %4803 = vmatprep.mubr.msk.f32.mxu0 %vm519_vm1, %v7485_v46  ;;  %v8573_v46 = vld [vmem:[#allocation26_spill] sm:$0xff] }
 0xb89   : > { %3576 = vmatmul.mubr.f32.gmra.mrb[184].mxu0 %v7490_v53 }
 0xb8a   : > { %4804 = vmatprep.mubr.msk.f32.mxu0 %vm519_vm1, %v7497_v54 }
 0xb8d   : > { %3581 = vmatmul.mubr.f32.gmra.mrb[186].mxu0 %v7502_v35 }
 0xb8e   : > { %4805 = vmatprep.mubr.msk.f32.mxu0 %vm519_vm1, %v8551_v24  ;;  %v8588_v24 = vld [vmem:[#allocation38_spill] sm:$0xff] }
 0xb91   : > { %3586 = vmatmul.mubr.f32.gmra.mrb[188].mxu0 %v8552_v56  ;;  %v8589_v56 = vld [vmem:[#allocation39_spill] sm:$0xff] }
 0xb92   : > { %4806 = vmatprep.mubr.msk.f32.mxu0 %vm519_vm1, %v8553_v45  ;;  %v8590_v45 = vld [vmem:[#allocation40_spill] sm:$0xff] }
 0xb95   : > { %3591 = vmatmul.mubr.f32.gmra.mrb[190].mxu0 %v8554_v58  ;;  %v8591_v58 = vld [vmem:[#allocation41_spill] sm:$0xff] }
 0xb96   : > { %4807 = vmatprep.mubr.msk.f32.mxu0 %vm519_vm1, %v8555_v37  ;;  %v8592_v37 = vld [vmem:[#allocation42_spill] sm:$0xff] }
 0xb99   : > { %3596 = vmatmul.mubr.f32.gmra.mrb[192].mxu0 %v8556_v52  ;;  %v8593_v52 = vld [vmem:[#allocation43_spill] sm:$0xff] }
 0xb9a   : > { %4808 = vmatprep.mubr.msk.f32.mxu0 %vm519_vm1, %v8557_v30  ;;  %v8594_v30 = vld [vmem:[#allocation44_spill] sm:$0xff] }
 0xb9d   : > { %3601 = vmatmul.mubr.f32.gmra.mrb[194].mxu0 %v8558_v49  ;;  %v8595_v49 = vld [vmem:[#allocation45_spill] sm:$0xff] }
 0xb9e   : > { %4809 = vmatprep.mubr.msk.f32.mxu0 %vm519_vm1, %v8559_v3 }
 0xba1   : > { %3606 = vmatmul.mubr.f32.gmra.mrb[196].mxu0 %v8560_v60  ;;  %v8596_v60 = vld [vmem:[#allocation46_spill] sm:$0xff] }
 0xba2   : > { %4810 = vmatprep.mubr.msk.f32.mxu0 %vm519_vm1, %v8561_v40 }
 0xba5   : > { %3611 = vmatmul.mubr.f32.gmra.mrb[198].mxu0 %v8562_v59  ;;  %v8597_v59 = vld [vmem:[#allocation47_spill] sm:$0xff] }
 0xba6   : > { %4811 = vmatprep.mubr.msk.f32.mxu0 %vm519_vm1, %v8563_v23 }
 0xba9   : > { %3616 = vmatmul.mubr.f32.gmra.mrb[200].mxu0 %v8564_v61  ;;  %v8598_v61 = vld [vmem:[#allocation49_spill] sm:$0xff] }
 0xbaa   : > { %4812 = vmatprep.mubr.msk.f32.mxu0 %vm519_vm1, %v8565_v19 }
 0xbad   : > { %3621 = vmatmul.mubr.f32.gmra.mrb[202].mxu0 %v8566_v2  ;;  %v8599_v2 = vld [vmem:[#allocation50_spill] sm:$0xff] }
 0xbae   : > { %4813 = vmatprep.mubr.msk.f32.mxu0 %vm519_vm1, %v8567_v63  ;;  %v8600_v63 = vld [vmem:[#allocation51_spill] sm:$0xff] }
 0xbb1   : > { %3626 = vmatmul.mubr.f32.gmra.mrb[204].mxu0 %v8568_v8 }
 0xbb2   : > { %4814 = vmatprep.mubr.msk.f32.mxu0 %vm519_vm1, %v8569_v26 }
 0xbb5   : > { %3631 = vmatmul.mubr.f32.gmra.mrb[206].mxu0 %v8570_v32 }
 0xbb6   : > { %4815 = vmatprep.mubr.msk.f32.mxu0 %vm519_vm1, %v8571_v4 }
 0xbb9   : > { %3636 = vmatmul.mubr.f32.gmra.mrb[208].mxu0 %v8572_v27 }
 0xbba   : > { %4876 = vmatprep.mubr.msk.f32.mxu0 %vm1173_vm3, %v8573_v46 }
 0xc23   : > { %v5497_v53 = vpop.f32.mrb[180].mxu1 }
 0xc24   : > { %v3725_v54 = vpop.f32.mrb[181].mxu1 }
 0xc25   : > { %v5916_v35 = vpack.c.bf16 %v5497_v53, %v3725_v54 }
 0xc27   : > { %5917 = vmatprep.subr.bf16.mxu1 %v5916_v35 }
 0xc28   : > { %5919 = vmatpush3.bf16.msra.mxu1 %v5916_v35 }
 0xc2b   : > { %v5500_v34 = vpop.f32.mrb[182].mxu1 }
 0xc2c   : > { %v3735_v21 = vpop.f32.mrb[183].mxu1 }
 0xc2d   : > { %v5920_v10 = vpack.c.bf16 %v5500_v34, %v3735_v21 }
 0xc2f   : > { %5921 = vmatprep.subr.bf16.mxu1 %v5920_v10 }
 0xc30   : > { %5923 = vmatpush3.bf16.msra.mxu1 %v5920_v10  ;;  %v3522_v3 = vpop.f32.mrb[162].mxu0 }
 0xc31   : > { %v3524_v40 = vpop.f32.mrb[163].mxu0 }
 0xc33   : > { %v5503_v16 = vpop.f32.mrb[184].mxu1 }
 0xc34   : > { %v3745_v15 = vpop.f32.mrb[185].mxu1  ;;  %v3527_v23 = vpop.f32.mrb[164].mxu0 }
 0xc35   : > { %v5924_v51 = vpack.c.bf16 %v5503_v16, %v3745_v15  ;;  %v3529_v19 = vpop.f32.mrb[165].mxu0 }
 0xc37   : > { %5925 = vmatprep.subr.bf16.mxu1 %v5924_v51 }
 0xc38   : > { %5927 = vmatpush3.bf16.msra.mxu1 %v5924_v51  ;;  %v3532_v8 = vpop.f32.mrb[166].mxu0 }
 0xc39   : > { %5929 = vmatprep.subr.bf16.mxu1 %v8574_v57  ;;  %v3534_v26 = vpop.f32.mrb[167].mxu0 }
 0xc3b   : > { %5517 = vmatmul.mubr.msk.f32.vlgmr.msra.gmra.mrb[186].mxu1 %vm891_vm2, %v8575_v47 }
 0xc3c   : > { %5519 = vmatprep.mubr.msk.f32.mxu1 %vm891_vm2, %v8576_v43  ;;  %5931 = vmatpush3.bf16.msra.mxu1 %v8574_v57  ;;  %v3537_v32 = vpop.f32.mrb[168].mxu0 }
 0xc3d   : > { %5933 = vmatprep.subr.bf16.mxu1 %v8577_v42  ;;  %v3539_v4 = vpop.f32.mrb[169].mxu0 }
 0xc3f   : > { %5520 = vmatmul.mubr.msk.f32.gmra.mrb[188].mxu1 %vm891_vm2, %v8578_v25 }
 0xc40   : > { %5522 = vmatprep.mubr.msk.f32.mxu1 %vm891_vm2, %v8579_v33  ;;  %5935 = vmatpush3.bf16.msra.mxu1 %v8577_v42  ;;  %v3542_v27 = vpop.f32.mrb[170].mxu0 }
 0xc41   : > { %5937 = vmatprep.subr.bf16.mxu1 %v8580_v20  ;;  %v3544_v46 = vpop.f32.mrb[171].mxu0 }
 0xc43   : > { %5523 = vmatmul.mubr.msk.f32.gmra.mrb[190].mxu1 %vm891_vm2, %v8581_v48 }
 0xc44   : > { %5525 = vmatprep.mubr.msk.f32.mxu1 %vm891_vm2, %v8582_v12  ;;  %5939 = vmatpush3.bf16.msra.mxu1 %v8580_v20  ;;  %v3547_v53 = vpop.f32.mrb[172].mxu0 }
 0xc45   : > { %5941 = vmatprep.subr.bf16.mxu1 %v8583_v28  ;;  %v3549_v54 = vpop.f32.mrb[173].mxu0 }
 0xc47   : > { %5526 = vmatmul.mubr.msk.f32.gmra.mrb[192].mxu1 %vm891_vm2, %v8584_v31 }
 0xc48   : > { %5528 = vmatprep.mubr.msk.f32.mxu1 %vm891_vm2, %v8585_v44  ;;  %5943 = vmatpush3.bf16.msra.mxu1 %v8583_v28  ;;  %v3552_v35 = vpop.f32.mrb[174].mxu0 }
 0xc49   : > { %5980 = vmatprep.subr.bf16.mxu1 %v8456_v38  ;;  %v3554_v34 = vpop.f32.mrb[175].mxu0 }
 0xc4b   : > { %5529 = vmatmul.mubr.msk.f32.gmra.mrb[194].mxu1 %vm891_vm2, %v8586_v1 }
 0xc4c   : > { %5531 = vmatprep.mubr.msk.f32.mxu1 %vm891_vm2, %v8587_v22  ;;  %v3557_v21 = vpop.f32.mrb[176].mxu0 }
 0xc4d   : > { %v3559_v10 = vpop.f32.mrb[177].mxu0 }
 0xc4f   : > { %5532 = vmatmul.mubr.msk.f32.gmra.mrb[196].mxu1 %vm891_vm2, %v8588_v24 }
 0xc50   : > { %5534 = vmatprep.mubr.msk.f32.mxu1 %vm891_vm2, %v8589_v56  ;;  %v3562_v16 = vpop.f32.mrb[178].mxu0 }
 0xc51   : > { %v3564_v15 = vpop.f32.mrb[179].mxu0 }
 0xc53   : > { %5535 = vmatmul.mubr.msk.f32.gmra.mrb[198].mxu1 %vm891_vm2, %v8590_v45 }
 0xc54   : > { %5537 = vmatprep.mubr.msk.f32.mxu1 %vm891_vm2, %v8591_v58  ;;  %v3567_v51 = vpop.f32.mrb[180].mxu0 }
 0xc55   : > { %v3569_v57 = vpop.f32.mrb[181].mxu0 }
 0xc57   : > { %5538 = vmatmul.mubr.msk.f32.gmra.mrb[200].mxu1 %vm891_vm2, %v8592_v37 }
 0xc58   : > { %5540 = vmatprep.mubr.msk.f32.mxu1 %vm891_vm2, %v8593_v52  ;;  %v3572_v47 = vpop.f32.mrb[182].mxu0 }
 0xc59   : > { %v3574_v43 = vpop.f32.mrb[183].mxu0 }
 0xc5b   : > { %5541 = vmatmul.mubr.msk.f32.gmra.mrb[202].mxu1 %vm891_vm2, %v8594_v30 }
 0xc5c   : > { %5543 = vmatprep.mubr.msk.f32.mxu1 %vm891_vm2, %v8595_v49  ;;  %v3577_v42 = vpop.f32.mrb[184].mxu0 }
 0xc5d   : > { %v3579_v25 = vpop.f32.mrb[185].mxu0 }
 0xc5f   : > { %5544 = vmatmul.mubr.msk.f32.gmra.mrb[204].mxu1 %vm891_vm2, %v8596_v60 }
 0xc60   : > { %5546 = vmatprep.mubr.msk.f32.mxu1 %vm891_vm2, %v8597_v59  ;;  %v8164_v33 = vpop.f32.mrb[186].mxu0 }
 0xc61   : > { %v3584_v20 = vpop.f32.mrb[187].mxu0 }
 0xc63   : > { %5547 = vmatmul.mubr.msk.f32.gmra.mrb[206].mxu1 %vm891_vm2, %v8598_v61 }
 0xc64   : > { %5549 = vmatprep.mubr.msk.f32.mxu1 %vm891_vm2, %v8599_v2  ;;  %v3587_v48 = vpop.f32.mrb[188].mxu0 }
 0xc65   : > { %v3589_v12 = vpop.f32.mrb[189].mxu0 }
 0xc67   : > { %5550 = vmatmul.mubr.msk.f32.gmra.mrb[208].mxu1 %vm891_vm2, %v8600_v63 }
 0xc68   : > { %v8166_v28 = vpop.f32.mrb[190].mxu0 }
 0xc69   : > { %v3594_v31 = vpop.f32.mrb[191].mxu0 }
 0xc6c   : > { %v3597_v44 = vpop.f32.mrb[192].mxu0 }
 0xc6d   : > { %v3599_v1 = vpop.f32.mrb[193].mxu0 }
 0xc70   : > { %v8168_v22 = vpop.f32.mrb[194].mxu0 }
 0xc71   : > { %v3604_v24 = vpop.f32.mrb[195].mxu0 }
 0xc74   : > { %v8170_v56 = vpop.f32.mrb[196].mxu0 }
 0xc75   : > { %v3609_v45 = vpop.f32.mrb[197].mxu0 }
 0xc78   : > { %v8172_v58 = vpop.f32.mrb[198].mxu0 }
 0xc79   : > { %v3614_v37 = vpop.f32.mrb[199].mxu0 }
 0xc7c   : > { %v8174_v52 = vpop.f32.mrb[200].mxu0 }
 0xc7d   : > { %v3619_v30 = vpop.f32.mrb[201].mxu0 }
 0xc80   : > { %v8176_v49 = vpop.f32.mrb[202].mxu0 }
 0xc81   : > { %v3624_v60 = vpop.f32.mrb[203].mxu0 }
 0xc84   : > { %v8178_v40 = vpop.f32.mrb[204].mxu0 }
 0xc85   : > { %v3629_v59 = vpop.f32.mrb[205].mxu0 }
 0xc88   : > { %v8180_v61 = vpop.f32.mrb[206].mxu0 }
 0xc89   : > { %v3634_v19 = vpop.f32.mrb[207].mxu0 }
 0xc8c   : > { %v8182_v2 = vpop.f32.mrb[208].mxu0 }
 0xc8d   : > { %v3639_v63 = vpop.f32.mrb[209].mxu0 }
 0xd0e   : > { %v5518_v26 = vpop.f32.mrb[186].mxu1 }
 0xd0f   : > { %v3940_v4 = vmul.f32 %v5518_v26, %v3527_v23  ;;  %v3820_v46 = vpop.f32.mrb[187].mxu1 }
 0xd10   : > { %v3939_v54 = vmul.f32 %v3820_v46, %v3522_v3 }
 0xd12   : > { %5568 = vmatprep.mubr.msk.f32.mxu1 %vm1173_vm3, %v3939_v54  ;;  %v5521_v34 = vpop.f32.mrb[188].mxu1 }
 0xd13   : > { %5569 = vmatmul.mubr.msk.f32.vlgmr.msra.gmra.mrb[210].mxu1 %vm1173_vm3, %v3940_v4  ;;  %v3830_v10 = vpop.f32.mrb[189].mxu1  ;;  %v3942_v15 = vmul.f32 %v5521_v34, %v3537_v32 }
 0xd14   : > { %v3941_v57 = vmul.f32 %v3830_v10, %v3532_v8 }
 0xd16   : > { %5571 = vmatprep.mubr.msk.f32.mxu1 %vm1173_vm3, %v3941_v57  ;;  %v5524_v43 = vpop.f32.mrb[190].mxu1 }
 0xd17   : > { %5572 = vmatmul.mubr.msk.f32.gmra.mrb[212].mxu1 %vm1173_vm3, %v3942_v15  ;;  %v3840_v25 = vpop.f32.mrb[191].mxu1  ;;  %v3944_v20 = vmul.f32 %v5524_v43, %v3547_v53 }
 0xd18   : > { %v3943_v12 = vmul.f32 %v3840_v25, %v3542_v27 }
 0xd1a   : > { %5574 = vmatprep.mubr.msk.f32.mxu1 %vm1173_vm3, %v3943_v12  ;;  %v5527_v23 = vpop.f32.mrb[192].mxu1 }
 0xd1b   : > { %5575 = vmatmul.mubr.msk.f32.gmra.mrb[214].mxu1 %vm1173_vm3, %v3944_v20  ;;  %v3850_v3 = vpop.f32.mrb[193].mxu1  ;;  %v3946_v31 = vmul.f32 %v5527_v23, %v3557_v21 }
 0xd1c   : > { %v3945_v1 = vmul.f32 %v3850_v3, %v3552_v35 }
 0xd1e   : > { %5577 = vmatprep.mubr.msk.f32.mxu1 %vm1173_vm3, %v3945_v1  ;;  %v5530_v32 = vpop.f32.mrb[194].mxu1 }
 0xd1f   : > { %5578 = vmatmul.mubr.msk.f32.gmra.mrb[216].mxu1 %vm1173_vm3, %v3946_v31  ;;  %v3860_v8 = vpop.f32.mrb[195].mxu1  ;;  %v3948_v24 = vmul.f32 %v5530_v32, %v3567_v51 }
 0xd20   : > { %v3947_v45 = vmul.f32 %v3860_v8, %v3562_v16 }
 0xd22   : > { %5580 = vmatprep.mubr.msk.f32.mxu1 %vm1173_vm3, %v3947_v45  ;;  %v5533_v53 = vpop.f32.mrb[196].mxu1 }
 0xd23   : > { %5581 = vmatmul.mubr.msk.f32.gmra.mrb[218].mxu1 %vm1173_vm3, %v3948_v24  ;;  %v3870_v27 = vpop.f32.mrb[197].mxu1  ;;  %v3950_v37 = vmul.f32 %v5533_v53, %v3577_v42 }
 0xd24   : > { %v3949_v30 = vmul.f32 %v3870_v27, %v3572_v47 }
 0xd26   : > { %5583 = vmatprep.mubr.msk.f32.mxu1 %vm1173_vm3, %v3949_v30  ;;  %v5536_v21 = vpop.f32.mrb[198].mxu1 }
 0xd27   : > { %5584 = vmatmul.mubr.msk.f32.gmra.mrb[220].mxu1 %vm1173_vm3, %v3950_v37  ;;  %v3880_v35 = vpop.f32.mrb[199].mxu1  ;;  %v3952_v60 = vmul.f32 %v5536_v21, %v3587_v48 }
 0xd28   : > { %v3951_v59 = vmul.f32 %v3880_v35, %v8164_v33 }
 0xd2a   : > { %5586 = vmatprep.mubr.msk.f32.mxu1 %vm1173_vm3, %v3951_v59  ;;  %v5539_v16 = vpop.f32.mrb[200].mxu1 }
 0xd2b   : > { %5587 = vmatmul.mubr.msk.f32.gmra.mrb[222].mxu1 %vm1173_vm3, %v3952_v60  ;;  %v3890_v51 = vpop.f32.mrb[201].mxu1  ;;  %v3954_v19 = vmul.f32 %v5539_v16, %v3597_v44 }
 0xd2c   : > { %v3953_v63 = vmul.f32 %v3890_v51, %v8166_v28 }
 0xd2e   : > { %5589 = vmatprep.mubr.msk.f32.mxu1 %vm1173_vm3, %v3953_v63  ;;  %v5542_v47 = vpop.f32.mrb[202].mxu1 }
 0xd2f   : > { %5590 = vmatmul.mubr.msk.f32.gmra.mrb[224].mxu1 %vm1173_vm3, %v3954_v19  ;;  %v3900_v42 = vpop.f32.mrb[203].mxu1  ;;  %v3956_v26 = vmul.f32 %v5542_v47, %v8170_v56 }
 0xd30   : > { %v3955_v48 = vmul.f32 %v3900_v42, %v8168_v22 }
 0xd32   : > { %5592 = vmatprep.mubr.msk.f32.mxu1 %vm1173_vm3, %v3955_v48  ;;  %v5545_v33 = vpop.f32.mrb[204].mxu1 }
 0xd33   : > { %5593 = vmatmul.mubr.msk.f32.gmra.mrb[226].mxu1 %vm1173_vm3, %v3956_v26  ;;  %v3910_v4 = vpop.f32.mrb[205].mxu1  ;;  %v3958_v44 = vmul.f32 %v5545_v33, %v8174_v52 }
 0xd34   : > { %v3957_v28 = vmul.f32 %v3910_v4, %v8172_v58 }
 0xd36   : > { %5595 = vmatprep.mubr.msk.f32.mxu1 %vm1173_vm3, %v3957_v28  ;;  %v5548_v46 = vpop.f32.mrb[206].mxu1 }
 0xd37   : > { %5596 = vmatmul.mubr.msk.f32.gmra.mrb[228].mxu1 %vm1173_vm3, %v3958_v44  ;;  %v3920_v54 = vpop.f32.mrb[207].mxu1  ;;  %v3960_v56 = vmul.f32 %v5548_v46, %v8178_v40 }
 0xd38   : > { %v3959_v22 = vmul.f32 %v3920_v54, %v8176_v49 }
 0xd3a   : > { %5598 = vmatprep.mubr.msk.f32.mxu1 %vm1173_vm3, %v3959_v22  ;;  %v5551_v34 = vpop.f32.mrb[208].mxu1 }
 0xd3b   : > { %5599 = vmatmul.mubr.msk.f32.gmra.mrb[230].mxu1 %vm1173_vm3, %v3960_v56  ;;  %v3930_v10 = vpop.f32.mrb[209].mxu1  ;;  %v3962_v52 = vmul.f32 %v5551_v34, %v8182_v2 }
 0xd3c   : > { %v3961_v58 = vmul.f32 %v3930_v10, %v8180_v61 }
 0xd3e   : > { %5601 = vmatprep.mubr.msk.f32.mxu1 %vm1173_vm3, %v3961_v58 }
 0xd3f   : > { %5602 = vmatmul.mubr.msk.f32.gmra.mrb[232].mxu1 %vm1173_vm3, %v3962_v52  ;;  %v4872_v52 = vld [vmem:[%s8299_s5 + $0xa0] sm:$0xff] }
 0xd40   : > { %4880 = vmatprep.mubr.msk.f32.mxu1 %vm1173_vm3, %v7884_v17 }
 0xde6   : > { %v5570_v40 = vpop.f32.mrb[210].mxu1 }
 0xde7   : > { %v4101_v15 = vpop.f32.mrb[211].mxu1 }
 0xde8   : > { %v5945_v49 = vpack.c.bf16 %v5570_v40, %v4101_v15 }
 0xdea   : > { %5946 = vmatpush1.bf16.msra.mxu0 %v5945_v49  ;;  %5992 = vmatpush1.bf16.msra.mxu1 %v5945_v49  ;;  %v5573_v57 = vpop.f32.mrb[212].mxu1 }
 0xdeb   : > { %v4111_v43 = vpop.f32.mrb[213].mxu1  ;;  %5947 = vmatprep.subr.bf16.mxu0 %v8456_v38  ;;  %5981 = vmatprep.subr.bf16.mxu1 %v8456_v38 }
 0xdec   : > { %v5948_v2 = vpack.c.bf16 %v5573_v57, %v4111_v43 }
 0xdee   : > { %5949 = vmatpush1.bf16.msra.mxu0 %v5948_v2  ;;  %5993 = vmatpush1.bf16.msra.mxu1 %v5948_v2  ;;  %v5576_v61 = vpop.f32.mrb[214].mxu1 }
 0xdef   : > { %v4121_v25 = vpop.f32.mrb[215].mxu1  ;;  %5950 = vmatprep.subr.bf16.mxu0 %v8456_v38  ;;  %5982 = vmatprep.subr.bf16.mxu1 %v8456_v38 }
 0xdf0   : > { %v5951_v17 = vpack.c.bf16 %v5576_v61, %v4121_v25  ;;  %v4873_v61 = vld [vmem:[%s8299_s5 + $0xa8] sm:$0xff] }
 0xdf2   : > { %5952 = vmatpush1.bf16.msra.mxu0 %v5951_v17  ;;  %5994 = vmatpush1.bf16.msra.mxu1 %v5951_v17  ;;  %v5579_v20 = vpop.f32.mrb[216].mxu1 }
 0xdf3   : > { %v4131_v12 = vpop.f32.mrb[217].mxu1  ;;  %5953 = vmatprep.subr.bf16.mxu0 %v8456_v38  ;;  %5983 = vmatprep.subr.bf16.mxu1 %v8456_v38 }
 0xdf4   : > { %v5954_v23 = vpack.c.bf16 %v5579_v20, %v4131_v12 }
 0xdf6   : > { %5955 = vmatpush1.bf16.msra.mxu0 %v5954_v23  ;;  %5995 = vmatpush1.bf16.msra.mxu1 %v5954_v23  ;;  %v5582_v3 = vpop.f32.mrb[218].mxu1 }
 0xdf7   : > { %v4141_v31 = vpop.f32.mrb[219].mxu1  ;;  %5956 = vmatprep.subr.bf16.mxu0 %v8456_v38  ;;  %5984 = vmatprep.subr.bf16.mxu1 %v8456_v38 }
 0xdf8   : > { %v5957_v1 = vpack.c.bf16 %v5582_v3, %v4141_v31 }
 0xdfa   : > { %5958 = vmatpush1.bf16.msra.mxu0 %v5957_v1  ;;  %5996 = vmatpush1.bf16.msra.mxu1 %v5957_v1  ;;  %v5585_v32 = vpop.f32.mrb[220].mxu1 }
 0xdfb   : > { %v4151_v8 = vpop.f32.mrb[221].mxu1  ;;  %5959 = vmatprep.subr.bf16.mxu0 %v8456_v38  ;;  %5985 = vmatprep.subr.bf16.mxu1 %v8456_v38 }
 0xdfc   : > { %v5960_v24 = vpack.c.bf16 %v5585_v32, %v4151_v8 }
 0xdfe   : > { %5961 = vmatpush1.bf16.msra.mxu0 %v5960_v24  ;;  %5997 = vmatpush1.bf16.msra.mxu1 %v5960_v24  ;;  %v5588_v45 = vpop.f32.mrb[222].mxu1 }
 0xdff   : > { %v4161_v53 = vpop.f32.mrb[223].mxu1  ;;  %5962 = vmatprep.subr.bf16.mxu0 %v8456_v38  ;;  %5986 = vmatprep.subr.bf16.mxu1 %v8456_v38 }
 0xe00   : > { %v5963_v27 = vpack.c.bf16 %v5588_v45, %v4161_v53 }
 0xe02   : > { %5964 = vmatpush1.bf16.msra.mxu0 %v5963_v27  ;;  %5998 = vmatpush1.bf16.msra.mxu1 %v5963_v27  ;;  %v5591_v37 = vpop.f32.mrb[224].mxu1 }
 0xe03   : > { %v4171_v30 = vpop.f32.mrb[225].mxu1  ;;  %5965 = vmatprep.subr.bf16.mxu0 %v8456_v38  ;;  %5987 = vmatprep.subr.bf16.mxu1 %v8456_v38 }
 0xe04   : > { %v5966_v21 = vpack.c.bf16 %v5591_v37, %v4171_v30 }
 0xe06   : > { %5967 = vmatpush1.bf16.msra.mxu0 %v5966_v21  ;;  %5999 = vmatpush1.bf16.msra.mxu1 %v5966_v21  ;;  %v5594_v35 = vpop.f32.mrb[226].mxu1 }
 0xe07   : > { %v4181_v60 = vpop.f32.mrb[227].mxu1  ;;  %5968 = vmatprep.subr.bf16.mxu0 %v8456_v38  ;;  %5988 = vmatprep.subr.bf16.mxu1 %v8456_v38 }
 0xe08   : > { %v5969_v59 = vpack.c.bf16 %v5594_v35, %v4181_v60 }
 0xe0a   : > { %5970 = vmatpush1.bf16.msra.mxu0 %v5969_v59  ;;  %6000 = vmatpush1.bf16.msra.mxu1 %v5969_v59  ;;  %v5597_v16 = vpop.f32.mrb[228].mxu1 }
 0xe0b   : > { %v4191_v51 = vpop.f32.mrb[229].mxu1  ;;  %5971 = vmatprep.subr.bf16.mxu0 %v8456_v38  ;;  %5989 = vmatprep.subr.bf16.mxu1 %v8456_v38 }
 0xe0c   : > { %v5972_v19 = vpack.c.bf16 %v5597_v16, %v4191_v51 }
 0xe0e   : > { %5973 = vmatpush1.bf16.msra.mxu0 %v5972_v19  ;;  %6001 = vmatpush1.bf16.msra.mxu1 %v5972_v19  ;;  %v5600_v63 = vpop.f32.mrb[230].mxu1 }
 0xe0f   : > { %v4201_v47 = vpop.f32.mrb[231].mxu1  ;;  %5974 = vmatprep.subr.bf16.mxu0 %v8456_v38  ;;  %5990 = vmatprep.subr.bf16.mxu1 %v8456_v38 }
 0xe10   : > { %v5975_v42 = vpack.c.bf16 %v5600_v63, %v4201_v47 }
 0xe12   : > { %5976 = vmatpush1.bf16.msra.mxu0 %v5975_v42  ;;  %6002 = vmatpush1.bf16.msra.mxu1 %v5975_v42  ;;  %v5603_v26 = vpop.f32.mrb[232].mxu1 }
 0xe13   : > { %v4211_v48 = vpop.f32.mrb[233].mxu1  ;;  %5977 = vmatprep.subr.bf16.mxu0 %v8456_v38  ;;  %5991 = vmatprep.subr.bf16.mxu1 %v8456_v38  ;;  %v4870_v38 = vld [vmem:[%s8299_s5 + $0x90] sm:$0xff] }
 0xe14   : > { %v5978_v33 = vpack.c.bf16 %v5603_v26, %v4211_v48 }
 0xe16   : > { %5979 = vmatpush1.bf16.msra.mxu0 %v5978_v33  ;;  %6003 = vmatpush1.bf16.msra.mxu1 %v5978_v33 }
 0xe19   : > { %4292 = vmatmul.mubr.f32.vlgmr.msra.gmra.mrb[210].mxu0 %v7852_v29  ;;  %4312 = vmatmul.mubr.f32.vlgmr.msra.gmra.mrb[234].mxu1 %v7889_v36  ;;  %v4874_v29 = vld [vmem:[%s8299_s5 + $0xb0] sm:$0xff] }
 0xe1a   : > { %4877 = vmatprep.mubr.msk.f32.mxu0 %vm1173_vm3, %v7856_v6  ;;  %4881 = vmatprep.mubr.msk.f32.mxu1 %vm1173_vm3, %v7893_v62 }
 0xe1d   : > { %4297 = vmatmul.mubr.f32.gmra.mrb[212].mxu0 %v7862_v39  ;;  %4317 = vmatmul.mubr.f32.gmra.mrb[236].mxu1 %v7898_v55 }
 0xe1e   : > { %4878 = vmatprep.mubr.msk.f32.mxu0 %vm1173_vm3, %v7866_v7 }
 0xe21   : > { %4302 = vmatmul.mubr.f32.gmra.mrb[214].mxu0 %v7871_v0  ;;  %v4871_v0 = vld [vmem:[%s8299_s5 + $0x98] sm:$0xff] }
 0xe22   : > { %4879 = vmatprep.mubr.msk.f32.mxu0 %vm1173_vm3, %v7875_v41  ;;  %v4875_v41 = vld [vmem:[%s8299_s5 + $0xb8] sm:$0xff] }
 0xe25   : > { %4307 = vmatmul.mubr.f32.gmra.mrb[216].mxu0 %v7880_v5 }
 0xeec   : > { %v4293_v6 = vpop.f32.mrb[210].mxu0  ;;  %v4313_v39 = vpop.f32.mrb[234].mxu1 }
 0xeed   : > { %v4294_v36 = vadd.f32 %v4870_v38, %v4293_v6  ;;  %v4295_v62 = vpop.f32.mrb[211].mxu0  ;;  %v4314_v7 = vadd.f32 %v4874_v29, %v4313_v39  ;;  %v4315_v55 = vpop.f32.mrb[235].mxu1 }
 0xeef   : > { %v4322_v5 = vsub.f32 0.0, %v4294_v36  ;;  %v4326_v4 = vsub.f32 0.0, %v4314_v7 }
 0xef0   : > { %v4298_v44 = vpop.f32.mrb[212].mxu0  ;;  %v4318_v28 = vpop.f32.mrb[236].mxu1 }
 0xef1   : > { %v4328_v46 = vmul.f32 1.442695, %v4322_v5  ;;  %v4299_v54 = vadd.f32 %v4871_v0, %v4298_v44  ;;  %v4300_v56 = vpop.f32.mrb[213].mxu0  ;;  %v4336_v22 = vmul.f32 1.442695, %v4326_v4  ;;  %v4319_v34 = vadd.f32 %v4875_v41, %v4318_v28  ;;  %v4320_v10 = vpop.f32.mrb[237].mxu1 }
 0xef3   : > { %6090 = vpow2.f32 %v4328_v46  ;;  %v4323_v58 = vsub.f32 0.0, %v4299_v54  ;;  %v4327_v40 = vsub.f32 0.0, %v4319_v34 }
 0xef4   : > { %v4303_v15 = vpop.f32.mrb[214].mxu0  ;;  %6092 = vpow2.f32 %v4336_v22 }
 0xef5   : > { %v4330_v49 = vmul.f32 1.442695, %v4323_v58  ;;  %v4304_v57 = vadd.f32 %v4872_v52, %v4303_v15  ;;  %v4305_v43 = vpop.f32.mrb[215].mxu0  ;;  %v4338_v2 = vmul.f32 1.442695, %v4327_v40 }
 0xef7   : > { %6094 = vpow2.f32 %v4330_v49  ;;  %v4324_v25 = vsub.f32 0.0, %v4304_v57 }
 0xef8   : > { %v4308_v17 = vpop.f32.mrb[216].mxu0  ;;  %6096 = vpow2.f32 %v4338_v2 }
 0xef9   : > { %v4332_v20 = vmul.f32 1.442695, %v4324_v25  ;;  %v4309_v12 = vadd.f32 %v4873_v61, %v4308_v17  ;;  %v4310_v23 = vpop.f32.mrb[217].mxu0 }
 0xefb   : > { %6098 = vpow2.f32 %v4332_v20  ;;  %v4325_v3 = vsub.f32 0.0, %v4309_v12 }
 0xefd   : > { %v6091_v31 = vpop.eup %6090  ;;  %v4334_v1 = vmul.f32 1.442695, %v4325_v3 }
 0xefe   : > { %v6093_v32 = vpop.eup %6092  ;;  %v4340_v8 = vadd.f32 1.0, %v6091_v31 }
 0xeff   : > { %v4344_v24 = vadd.f32 1.0, %v6093_v32  ;;  %6100 = vpow2.f32 %v4334_v1 }
 0xf00   : > { %6102 = vrcp.f32 %v4340_v8 }
 0xf01   : > { %v6095_v45 = vpop.eup %6094  ;;  %6104 = vrcp.f32 %v4344_v24 }
 0xf02   : > { %v6097_v53 = vpop.eup %6096  ;;  %v4341_v27 = vadd.f32 1.0, %v6095_v45 }
 0xf03   : > { %v4345_v37 = vadd.f32 1.0, %v6097_v53 }
 0xf04   : > { %6106 = vrcp.f32 %v4341_v27 }
 0xf05   : > { %v6099_v30 = vpop.eup %6098  ;;  %6108 = vrcp.f32 %v4345_v37 }
 0xf06   : > { %v4342_v21 = vadd.f32 1.0, %v6099_v30 }
 0xf08   : > { %6110 = vrcp.f32 %v4342_v21 }
 0xf09   : > { %v6101_v35 = vpop.eup %6100 }
 0xf0a   : > { %v6103_v60 = vpop.eup %6102  ;;  %v4343_v59 = vadd.f32 1.0, %v6101_v35 }
 0xf0b   : > { %v6105_v16 = vpop.eup %6104  ;;  %v4352_v51 = vmul.f32 %v7964_v50, %v6103_v60 }
 0xf0c   : > { %v4356_v19 = vmul.f32 %v7992_v13, %v6105_v16  ;;  %6112 = vrcp.f32 %v4343_v59 }
 0xf0d   : > { %4358 = vst.msk [vmem:[%s392_s29] sm:$0xff] %vm777_vm0, %v4352_v51 }
 0xf0e   : > { %v6107_v63 = vpop.eup %6106  ;;  %4362 = vst.msk [vmem:[%s392_s29 + $0x20] sm:$0xff] %vm777_vm0, %v4356_v19 }
 0xf0f   : > { %v6109_v47 = vpop.eup %6108  ;;  %v4353_v42 = vmul.f32 %v7971_v11, %v6107_v63 }
 0xf10   : > { %v4357_v26 = vmul.f32 %v7999_v14, %v6109_v47 }
 0xf11   : > { %4359 = vst.msk [vmem:[%s392_s29 + $0x8] sm:$0xff] %vm777_vm0, %v4353_v42 }
 0xf12   : > { %v6111_v48 = vpop.eup %6110  ;;  %4363 = vst.msk [vmem:[%s392_s29 + $0x28] sm:$0xff] %vm777_vm0, %v4357_v26 }
 0xf13   : > { %v4354_v50 = vmul.f32 %v7978_v9, %v6111_v48 }
 0xf15   : > { %4360 = vst.msk [vmem:[%s392_s29 + $0x10] sm:$0xff] %vm777_vm0, %v4354_v50 }
 0xf16   : > { %v6113_v13 = vpop.eup %6112 }
 0xf17   : > { %v4355_v33 = vmul.f32 %v7985_v18, %v6113_v13 }
 0xf19   : > { %4361 = vst.msk [vmem:[%s392_s29 + $0x18] sm:$0xff] %vm777_vm0, %v4355_v33 }
 0xf1a PF: > { %s19_s30 = sadd.s32 1, %s6212_s30  }
 0xf1b   : > { %p16_p4 = scmp.ge.s32.totalorder %s19_s30, 4  }
 0xf1d   :  { %18 = sbr.rel (!%p16_p4) target bundleno = 1 (0x1), region = 101 }

</bundles_post_ra>
